<compile_context>
chip_gen: v7x
topology: tpu7x:2x2x1
jax: 0.10.0
libtpu: 0.0.40
codegen_flags: <defaults>
</compile_context>

<pallas_src>
import jax
import jax.numpy as jnp
from jax.experimental import pallas as pl
from jax.experimental.pallas import tpu as pltpu

NUM_FEATURES = 28
DIM = 256      # GraphConv width; fc1 = Linear(4*dim, dim) forces dim == 256
F0_PAD = 128   # input feature dim padded to one full lane group
OUT_PAD = 128  # final 256 -> 1 projection padded to a lane-dense 128-wide output


def _full_spec(shape):
    nd = len(shape)
    return pl.BlockSpec(shape, lambda i, _nd=nd: (0,) * _nd)


# ----------------------------------------------------------------------------- kernel

def _netgine_fused_kernel(a_ref, p_ref, invc_ref, x0_ref,
                          w1_ref, b1_ref, w2_ref, b2_ref, w3_ref, b3_ref,
                          w4_ref, b4_ref, fc1w_ref, fc1b_ref,
                          fc2w_ref, fc2b_ref, fc3w_ref, fc3b_ref,
                          fc4w_ref, fc4b_ref,
                          o_ref, cat_ref):
    """Whole NetGINE forward for one (padded) batch of graphs, fully VMEM-resident."""
    cdt = a_ref.dtype                      # MXU operand dtype (bf16 or f32)
    f32 = jnp.float32

    def mm(lhs, rhs):                      # MXU matmul, f32 accumulation
        return jnp.dot(lhs.astype(cdt), rhs.astype(cdt), preferred_element_type=f32)

    a = a_ref[...]                         # (N, N)   adjacency: a[dst, src] = multiplicity
    p = p_ref[...]                         # (B, N)   exact 0/1 one-hot (graph SUM pooling)
    x0 = x0_ref[...]                       # (N, 128) zero-padded input features

    # ---- conv1: merged [A@x0 | x0] @ [W1rel; W1root]  (one MXU pass, K = 256) ----
    agg0 = mm(a, x0).astype(cdt)                                   # (N, 128)
    h = mm(jnp.concatenate([agg0, x0], axis=-1), w1_ref[...]) + b1_ref[...]
    x_c = jnp.maximum(h, 0.0).astype(cdt)                          # cast ONCE per layer
    # start the fc1 accumulation with the x1 block (concat(x1..x4) is never built);
    # this is the UNNORMALIZED (sum-pooled) accumulator — 1/count is applied later in f32.
    zacc = mm(mm(p, x_c), fc1w_ref[0])                             # (B, 256) f32

    # ---- conv2..conv4: merged [A@x | x] @ [Wrel; Wroot] via the persistent scratch ----
    for k, (w_ref, b_ref) in enumerate(
            ((w2_ref, b2_ref), (w3_ref, b3_ref), (w4_ref, b4_ref)), start=1):
        cat_ref[:, 0:DIM] = mm(a, x_c).astype(cdt)                 # new aggregation half
        cat_ref[:, DIM:2 * DIM] = x_c                              # previous layer's x half
        h = mm(cat_ref[...], w_ref[...]) + b_ref[...]              # (N,512)@(512,256), f32 acc
        x_c = jnp.maximum(h, 0.0).astype(cdt)
        zacc = zacc + mm(mm(p, x_c), fc1w_ref[k])

    # ---- MLP head (tiny M = padded batch rows); mean 1/count scaling + bias/ReLU in f32 ----
    h1 = jnp.maximum(zacc * invc_ref[...] + fc1b_ref[...], 0.0)
    h2 = jnp.maximum(mm(h1, fc2w_ref[...]) + fc2b_ref[...], 0.0)
    h3 = jnp.maximum(mm(h2, fc3w_ref[...]) + fc3b_ref[...], 0.0)
    o_ref[...] = mm(h3, fc4w_ref[...]) + fc4b_ref[...]


# ----------------------------------------------------------------------------- weight prep

def prepare_netgine_params(params, matmul_dtype=jnp.bfloat16):
    """Pack / pad / pre-cast the weights once (hoisted out of the per-call path)."""
    cdt = matmul_dtype
    f32 = jnp.float32

    # conv1: pad 28 -> 128 feature rows, stack [Wrel; Wroot] -> (256, 256)
    w1 = jnp.zeros((2 * F0_PAD, DIM), f32)
    w1 = w1.at[0:NUM_FEATURES].set(params["conv1_wrel"])
    w1 = w1.at[F0_PAD:F0_PAD + NUM_FEATURES].set(params["conv1_wroot"])

    def stack(i):  # conv2..4: [Wrel; Wroot] -> (512, 256), one MXU matmul per layer
        return jnp.concatenate([params[f"conv{i}_wrel"], params[f"conv{i}_wroot"]], axis=0)

    # final 256 -> 1 projection padded to 128 lanes (only column 0 is real)
    fc4_w = jnp.zeros((DIM, OUT_PAD), f32).at[:, 0:1].set(params["fc4_w"])
    fc4_b = jnp.zeros((1, OUT_PAD), f32).at[0, 0].set(params["fc4_b"][0])

    return {
        "w1": w1.astype(cdt), "b1": params["conv1_b"].reshape(1, DIM).astype(f32),
        "w2": stack(2).astype(cdt), "b2": params["conv2_b"].reshape(1, DIM).astype(f32),
        "w3": stack(3).astype(cdt), "b3": params["conv3_b"].reshape(1, DIM).astype(f32),
        "w4": stack(4).astype(cdt), "b4": params["conv4_b"].reshape(1, DIM).astype(f32),
        "fc1w": params["fc1_w"].reshape(4, DIM, DIM).astype(cdt),  # blocks aligned with x1..x4
        "fc1b": params["fc1_b"].reshape(1, DIM).astype(f32),
        "fc2w": params["fc2_w"].astype(cdt), "fc2b": params["fc2_b"].reshape(1, DIM).astype(f32),
        "fc3w": params["fc3_w"].astype(cdt), "fc3b": params["fc3_b"].reshape(1, DIM).astype(f32),
        "fc4w": fc4_w.astype(cdt), "fc4b": fc4_b,
    }


# ----------------------------------------------------------------------------- wrapper

def netgine_forward(prep, x, edge_index, batch, num_graphs):
    """Fused NetGINE forward.  `prep` comes from prepare_netgine_params (pre-cast weights)."""
    n = x.shape[0]
    cdt = prep["w2"].dtype
    f32 = jnp.float32
    src, dst = edge_index[0], edge_index[1]

    npad = ((n + 127) // 128) * 128                    # lane-dense node dimension
    bpad = max(8, ((num_graphs + 7) // 8) * 8)         # sublane-aligned batch rows

    # Dense adjacency built directly in the MXU operand dtype (multiplicities <= 256 are
    # exact in bf16) — no f32 A materialize + recast round-trip through HBM.
    # TODO(synk): for large sparse graphs replace this dense O(N^2) adjacency (and the
    # wrapper scatter-adds) with a gather / block-sparse PrefetchScalarGridSpec
    # formulation, make the node-row axis a "parallel" grid dimension (required to use
    # both v7x TensorCores and to stream row blocks of A once it no longer fits VMEM),
    # and store the streamed A as int8 on the 64 MiB-VMEM part.
    adj = jnp.zeros((npad, npad), cdt).at[dst, src].add(1.0)

    # Exact 0/1 one-hot SUM-pooling matrix (exact in bf16); mean scaling stays f32 in-kernel.
    onehot = (batch[None, :] == jnp.arange(num_graphs)[:, None]).astype(cdt)
    pool = jnp.zeros((bpad, npad), cdt).at[:num_graphs, :n].set(onehot)
    counts = jnp.zeros((num_graphs,), f32).at[batch].add(1.0)
    invc = jnp.zeros((bpad, 1), f32).at[:num_graphs, 0].set(1.0 / jnp.maximum(counts, 1.0))

    # zero-pad the 28-wide input feature dim to 128 lanes (exact)
    x0 = jnp.zeros((npad, F0_PAD), cdt).at[:n, :NUM_FEATURES].set(x.astype(cdt))

    args = (adj, pool, invc, x0,
            prep["w1"], prep["b1"], prep["w2"], prep["b2"], prep["w3"], prep["b3"],
            prep["w4"], prep["b4"], prep["fc1w"], prep["fc1b"], prep["fc2w"], prep["fc2b"],
            prep["fc3w"], prep["fc3b"], prep["fc4w"], prep["fc4b"])

    # VMEM budget derived from the actual footprint (+2x for the 1-step pipeline's
    # buffering, + headroom) instead of a fixed 48 MiB (too big a share of v7x's 64 MiB).
    itemsize = jnp.dtype(cdt).itemsize
    scratch_bytes = npad * 2 * DIM * itemsize
    out_bytes = bpad * OUT_PAD * 4
    in_bytes = sum(int(a.size) * a.dtype.itemsize for a in args)
    vmem_limit = 2 * (in_bytes + out_bytes) + scratch_bytes + (4 << 20)
    vmem_limit = int(min(max(vmem_limit, 8 << 20), 64 << 20))

    # NOTE: grid=(1,) keeps A, weights and all activations VMEM-resident for the whole
    # pass (single launch, A DMA'd exactly once) — the right shape at these sizes; see
    # the TODO above for the large-N / dual-TensorCore (v7x) row-block variant.
    out = pl.pallas_call(
        _netgine_fused_kernel,
        out_shape=jax.ShapeDtypeStruct((bpad, OUT_PAD), f32),
        grid=(1,),
        in_specs=[_full_spec(a.shape) for a in args],
        out_specs=_full_spec((bpad, OUT_PAD)),
        scratch_shapes=[pltpu.VMEM((npad, 2 * DIM), cdt)],   # persistent [agg | x] operand
        compiler_params=pltpu.CompilerParams(
            dimension_semantics=("arbitrary",),
            vmem_limit_bytes=vmem_limit,
        ),
    )(*args)
    return out[:num_graphs, 0]                   # == x.view(-1)


# ----------------------------------------------------------------------------- params

def _glorot(key, shape):
    fan_in, fan_out = shape
    limit = (6.0 / (fan_in + fan_out)) ** 0.5
    return jax.random.uniform(key, shape, jnp.float32, -limit, limit)


def init_params(key):
    ks = jax.random.split(key, 16)
    p = {}
    dims = [(NUM_FEATURES, DIM), (DIM, DIM), (DIM, DIM), (DIM, DIM)]
    for i, (fi, fo) in enumerate(dims):
        p[f"conv{i+1}_wrel"] = _glorot(ks[3 * i + 0], (fi, fo))
        p[f"conv{i+1}_wroot"] = _glorot(ks[3 * i + 1], (fi, fo))
        p[f"conv{i+1}_b"] = jnp.zeros((fo,), jnp.float32)
    p["fc1_w"] = _glorot(ks[12], (4 * DIM, DIM)); p["fc1_b"] = jnp.zeros((DIM,), jnp.float32)
    p["fc2_w"] = _glorot(ks[13], (DIM, DIM));     p["fc2_b"] = jnp.zeros((DIM,), jnp.float32)
    p["fc3_w"] = _glorot(ks[14], (DIM, DIM));     p["fc3_b"] = jnp.zeros((DIM,), jnp.float32)
    p["fc4_w"] = _glorot(ks[15], (DIM, 1));       p["fc4_b"] = jnp.zeros((1,), jnp.float32)
    return p


# ----------------------------------------------------------------------------- reference

def netgine_reference(params, x, edge_index, batch, num_graphs,
                      matmul_dtype=jnp.float32):
    """Plain-XLA reference.  matmul_dtype=bf16 builds an operand-quantization-matched
    reference (f32 accumulation, exact one-hot sum pooling with f32 1/count scaling)."""
    dt = matmul_dtype

    def mm(a, b):
        return jnp.dot(a.astype(dt), b.astype(dt), preferred_element_type=jnp.float32)

    n = x.shape[0]
    src, dst = edge_index[0], edge_index[1]
    adj = jnp.zeros((n, n), jnp.float32).at[dst, src].add(1.0)

    def conv(h, wrel, wroot, b):
        return jax.nn.relu(mm(mm(adj, h), wrel) + b + mm(h, wroot))

    x1 = conv(x, params["conv1_wrel"], params["conv1_wroot"], params["conv1_b"])
    x2 = conv(x1, params["conv2_wrel"], params["conv2_wroot"], params["conv2_b"])
    x3 = conv(x2, params["conv3_wrel"], params["conv3_wroot"], params["conv3_b"])
    x4 = conv(x3, params["conv4_wrel"], params["conv4_wroot"], params["conv4_b"])
    h = jnp.concatenate([x1, x2, x3, x4], axis=-1)

    counts = jnp.zeros((num_graphs,), jnp.float32).at[batch].add(1.0)
    onehot = (batch[None, :] == jnp.arange(num_graphs)[:, None]).astype(jnp.float32)
    pooled = mm(onehot, h)                                   # graph-wise SUM
    invc = 1.0 / jnp.maximum(counts, 1.0)

    # mean-pool then fc1 == fc1 then 1/count row-scaling (linearity); scaling kept in f32
    z = jax.nn.relu(mm(pooled, params["fc1_w"]) * invc[:, None] + params["fc1_b"])
    z = jax.nn.relu(mm(z, params["fc2_w"]) + params["fc2_b"])
    z = jax.nn.relu(mm(z, params["fc3_w"]) + params["fc3_b"])
    z = mm(z, params["fc4_w"]) + params["fc4_b"]
    return z.reshape(-1)


if __name__ == "__main__":
    key = jax.random.PRNGKey(0)
    k_par, k_x, k_e = jax.random.split(key, 3)

    N, E, B = 64, 192, 4  # nodes, edges, graphs in the batch (small toy shapes)
    params = init_params(k_par)

    x = jax.random.normal(k_x, (N, NUM_FEATURES), jnp.float32)
    edge_index = jax.random.randint(k_e, (2, E), 0, N, jnp.int32)
    batch = jnp.repeat(jnp.arange(B, dtype=jnp.int32), N // B)

    # 1) exact-precision mode: must match the f32 module semantics tightly
    prep_f32 = prepare_netgine_params(params, jnp.float32)
    out_f32 = jax.block_until_ready(netgine_forward(prep_f32, x, edge_index, batch, B))
    ref_f32 = jax.block_until_ready(
        netgine_reference(params, x, edge_index, batch, B, jnp.float32))
    assert out_f32.shape == (B,)
    assert jnp.allclose(out_f32, ref_f32, atol=1e-3, rtol=1e-3), (out_f32, ref_f32)

    # 2) default bf16-MXU-operand mode vs a reference that quantizes operands identically
    #    (exact one-hot sum pooling, f32 1/count scaling, f32 accumulation in both paths).
    prep_bf16 = prepare_netgine_params(params, jnp.bfloat16)
    out_bf16 = jax.block_until_ready(netgine_forward(prep_bf16, x, edge_index, batch, B))
    ref_bf16 = jax.block_until_ready(
        netgine_reference(params, x, edge_index, batch, B, jnp.bfloat16))
    assert out_bf16.shape == (B,)
    assert jnp.allclose(out_bf16, ref_bf16, atol=1e-2, rtol=1e-2), (out_bf16, ref_bf16)

    print("KERNEL_OK")
</pallas_src>

<mosaic_0001>
module attributes {stable_mosaic.version = 11 : i64} {
  func.func @_netgine_fused_kernel(%arg0: i32, %arg1: memref<128x128xf32, #tpu.memory_space<vmem>>, %arg2: memref<8x128xf32, #tpu.memory_space<vmem>>, %arg3: memref<8x1xf32, #tpu.memory_space<vmem>>, %arg4: memref<128x128xf32, #tpu.memory_space<vmem>>, %arg5: memref<256x256xf32, #tpu.memory_space<vmem>>, %arg6: memref<1x256xf32, #tpu.memory_space<vmem>>, %arg7: memref<512x256xf32, #tpu.memory_space<vmem>>, %arg8: memref<1x256xf32, #tpu.memory_space<vmem>>, %arg9: memref<512x256xf32, #tpu.memory_space<vmem>>, %arg10: memref<1x256xf32, #tpu.memory_space<vmem>>, %arg11: memref<512x256xf32, #tpu.memory_space<vmem>>, %arg12: memref<1x256xf32, #tpu.memory_space<vmem>>, %arg13: memref<4x256x256xf32, #tpu.memory_space<vmem>>, %arg14: memref<1x256xf32, #tpu.memory_space<vmem>>, %arg15: memref<256x256xf32, #tpu.memory_space<vmem>>, %arg16: memref<1x256xf32, #tpu.memory_space<vmem>>, %arg17: memref<256x256xf32, #tpu.memory_space<vmem>>, %arg18: memref<1x256xf32, #tpu.memory_space<vmem>>, %arg19: memref<256x128xf32, #tpu.memory_space<vmem>>, %arg20: memref<1x128xf32, #tpu.memory_space<vmem>>, %arg21: memref<8x128xf32, #tpu.memory_space<vmem>>, %arg22: memref<128x512xf32, #tpu.memory_space<vmem>>) attributes {dimension_semantics = [#tpu.dimension_semantics<arbitrary>], iteration_bounds = array<i64: 1>, scalar_prefetch = 0 : i64, scratch_operands = 1 : i64, tpu.core_type = #tpu.core_type<tc>, window_params = [{pipeline_mode = #tpu.pipeline_mode<synchronous>, transform_indices = @transform_0, window_bounds = array<i64: 128, 128>}, {pipeline_mode = #tpu.pipeline_mode<synchronous>, transform_indices = @transform_1, window_bounds = array<i64: 8, 128>}, {pipeline_mode = #tpu.pipeline_mode<synchronous>, transform_indices = @transform_2, window_bounds = array<i64: 8, 1>}, {pipeline_mode = #tpu.pipeline_mode<synchronous>, transform_indices = @transform_3, window_bounds = array<i64: 128, 128>}, {pipeline_mode = #tpu.pipeline_mode<synchronous>, transform_indices = @transform_4, window_bounds = array<i64: 256, 256>}, {pipeline_mode = #tpu.pipeline_mode<synchronous>, transform_indices = @transform_5, window_bounds = array<i64: 1, 256>}, {pipeline_mode = #tpu.pipeline_mode<synchronous>, transform_indices = @transform_6, window_bounds = array<i64: 512, 256>}, {pipeline_mode = #tpu.pipeline_mode<synchronous>, transform_indices = @transform_7, window_bounds = array<i64: 1, 256>}, {pipeline_mode = #tpu.pipeline_mode<synchronous>, transform_indices = @transform_8, window_bounds = array<i64: 512, 256>}, {pipeline_mode = #tpu.pipeline_mode<synchronous>, transform_indices = @transform_9, window_bounds = array<i64: 1, 256>}, {pipeline_mode = #tpu.pipeline_mode<synchronous>, transform_indices = @transform_10, window_bounds = array<i64: 512, 256>}, {pipeline_mode = #tpu.pipeline_mode<synchronous>, transform_indices = @transform_11, window_bounds = array<i64: 1, 256>}, {pipeline_mode = #tpu.pipeline_mode<synchronous>, transform_indices = @transform_12, window_bounds = array<i64: 4, 256, 256>}, {pipeline_mode = #tpu.pipeline_mode<synchronous>, transform_indices = @transform_13, window_bounds = array<i64: 1, 256>}, {pipeline_mode = #tpu.pipeline_mode<synchronous>, transform_indices = @transform_14, window_bounds = array<i64: 256, 256>}, {pipeline_mode = #tpu.pipeline_mode<synchronous>, transform_indices = @transform_15, window_bounds = array<i64: 1, 256>}, {pipeline_mode = #tpu.pipeline_mode<synchronous>, transform_indices = @transform_16, window_bounds = array<i64: 256, 256>}, {pipeline_mode = #tpu.pipeline_mode<synchronous>, transform_indices = @transform_17, window_bounds = array<i64: 1, 256>}, {pipeline_mode = #tpu.pipeline_mode<synchronous>, transform_indices = @transform_18, window_bounds = array<i64: 256, 128>}, {pipeline_mode = #tpu.pipeline_mode<synchronous>, transform_indices = @transform_19, window_bounds = array<i64: 1, 128>}, {pipeline_mode = #tpu.pipeline_mode<synchronous>, transform_indices = @transform_20, window_bounds = array<i64: 8, 128>}]} {
    %c0 = arith.constant 0 : index
    %c0_0 = arith.constant 0 : index
    %0 = vector.load %arg1[%c0, %c0_0] : memref<128x128xf32, #tpu.memory_space<vmem>>, vector<128x128xf32>
    %c0_1 = arith.constant 0 : index
    %c0_2 = arith.constant 0 : index
    %1 = vector.load %arg2[%c0_1, %c0_2] : memref<8x128xf32, #tpu.memory_space<vmem>>, vector<8x128xf32>
    %c0_3 = arith.constant 0 : index
    %c0_4 = arith.constant 0 : index
    %2 = vector.load %arg4[%c0_3, %c0_4] : memref<128x128xf32, #tpu.memory_space<vmem>>, vector<128x128xf32>
    %cst = arith.constant dense<0.000000e+00> : vector<128x128xf32>
    %3 = tpu.matmul %0, %2, %cst {dimension_numbers = #tpu.dot_dimension_numbers<[1], [0], [0], [1], [0, 0, 1, 1], [], []>} : vector<128x128xf32>, vector<128x128xf32>, vector<128x128xf32> -> vector<128x128xf32>
    %4 = tpu.concatenate %3, %2 in 1 : vector<128x128xf32>, vector<128x128xf32> -> vector<128x256xf32>
    %c0_5 = arith.constant 0 : index
    %c0_6 = arith.constant 0 : index
    %5 = vector.load %arg5[%c0_5, %c0_6] : memref<256x256xf32, #tpu.memory_space<vmem>>, vector<256x256xf32>
    %cst_7 = arith.constant dense<0.000000e+00> : vector<128x256xf32>
    %6 = tpu.matmul %4, %5, %cst_7 {dimension_numbers = #tpu.dot_dimension_numbers<[1], [0], [0], [1], [0, 0, 1, 1], [], []>} : vector<128x256xf32>, vector<256x256xf32>, vector<128x256xf32> -> vector<128x256xf32>
    %c0_8 = arith.constant 0 : index
    %c0_9 = arith.constant 0 : index
    %7 = vector.load %arg6[%c0_8, %c0_9] : memref<1x256xf32, #tpu.memory_space<vmem>>, vector<1x256xf32>
    %8 = vector.broadcast %7 : vector<1x256xf32> to vector<128x256xf32>
    %9 = arith.addf %6, %8 : vector<128x256xf32>
    %cst_10 = arith.constant 0.000000e+00 : f32
    %10 = vector.broadcast %cst_10 : f32 to vector<128x256xf32>
    %11 = arith.maximumf %9, %10 : vector<128x256xf32>
    %cst_11 = arith.constant dense<0.000000e+00> : vector<8x256xf32>
    %12 = tpu.matmul %1, %11, %cst_11 {dimension_numbers = #tpu.dot_dimension_numbers<[1], [0], [0], [1], [0, 0, 1, 1], [], []>} : vector<8x128xf32>, vector<128x256xf32>, vector<8x256xf32> -> vector<8x256xf32>
    %c0_12 = arith.constant 0 : index
    %c0_13 = arith.constant 0 : index
    %c0_14 = arith.constant 0 : index
    %13 = vector.load %arg13[%c0_12, %c0_13, %c0_14] : memref<4x256x256xf32, #tpu.memory_space<vmem>>, vector<1x256x256xf32>
    %14 = vector.shape_cast %13 : vector<1x256x256xf32> to vector<256x256xf32>
    %cst_15 = arith.constant dense<0.000000e+00> : vector<8x256xf32>
    %15 = tpu.matmul %12, %14, %cst_15 {dimension_numbers = #tpu.dot_dimension_numbers<[1], [0], [0], [1], [0, 0, 1, 1], [], []>} : vector<8x256xf32>, vector<256x256xf32>, vector<8x256xf32> -> vector<8x256xf32>
    %cst_16 = arith.constant dense<0.000000e+00> : vector<128x256xf32>
    %16 = tpu.matmul %0, %11, %cst_16 {dimension_numbers = #tpu.dot_dimension_numbers<[1], [0], [0], [1], [0, 0, 1, 1], [], []>} : vector<128x128xf32>, vector<128x256xf32>, vector<128x256xf32> -> vector<128x256xf32>
    %c0_17 = arith.constant 0 : index
    %c0_18 = arith.constant 0 : index
    %17 = vector.load %arg22[%c0_17, %c0_18] : memref<128x512xf32, #tpu.memory_space<vmem>>, vector<128x256xf32>
    tpu.vector_store %arg22[%c0_17, %c0_18], %16 {strides = array<i32>} : memref<128x512xf32, #tpu.memory_space<vmem>>, vector<128x256xf32>,
    %c0_19 = arith.constant 0 : index
    %c256 = arith.constant 256 : index
    %18 = vector.load %arg22[%c0_19, %c256] : memref<128x512xf32, #tpu.memory_space<vmem>>, vector<128x256xf32>
    tpu.vector_store %arg22[%c0_19, %c256], %11 {strides = array<i32>} : memref<128x512xf32, #tpu.memory_space<vmem>>, vector<128x256xf32>,
    %c0_20 = arith.constant 0 : index
    %c0_21 = arith.constant 0 : index
    %19 = vector.load %arg22[%c0_20, %c0_21] : memref<128x512xf32, #tpu.memory_space<vmem>>, vector<128x512xf32>
    %c0_22 = arith.constant 0 : index
    %c0_23 = arith.constant 0 : index
    %20 = vector.load %arg7[%c0_22, %c0_23] : memref<512x256xf32, #tpu.memory_space<vmem>>, vector<512x256xf32>
    %cst_24 = arith.constant dense<0.000000e+00> : vector<128x256xf32>
    %21 = tpu.matmul %19, %20, %cst_24 {dimension_numbers = #tpu.dot_dimension_numbers<[1], [0], [0], [1], [0, 0, 1, 1], [], []>} : vector<128x512xf32>, vector<512x256xf32>, vector<128x256xf32> -> vector<128x256xf32>
    %c0_25 = arith.constant 0 : index
    %c0_26 = arith.constant 0 : index
    %22 = vector.load %arg8[%c0_25, %c0_26] : memref<1x256xf32, #tpu.memory_space<vmem>>, vector<1x256xf32>
    %23 = vector.broadcast %22 : vector<1x256xf32> to vector<128x256xf32>
    %24 = arith.addf %21, %23 : vector<128x256xf32>
    %cst_27 = arith.constant 0.000000e+00 : f32
    %25 = vector.broadcast %cst_27 : f32 to vector<128x256xf32>
    %26 = arith.maximumf %24, %25 : vector<128x256xf32>
    %cst_28 = arith.constant dense<0.000000e+00> : vector<8x256xf32>
    %27 = tpu.matmul %1, %26, %cst_28 {dimension_numbers = #tpu.dot_dimension_numbers<[1], [0], [0], [1], [0, 0, 1, 1], [], []>} : vector<8x128xf32>, vector<128x256xf32>, vector<8x256xf32> -> vector<8x256xf32>
    %c1 = arith.constant 1 : index
    %c0_29 = arith.constant 0 : index
    %c0_30 = arith.constant 0 : index
    %28 = vector.load %arg13[%c1, %c0_29, %c0_30] : memref<4x256x256xf32, #tpu.memory_space<vmem>>, vector<1x256x256xf32>
    %29 = vector.shape_cast %28 : vector<1x256x256xf32> to vector<256x256xf32>
    %cst_31 = arith.constant dense<0.000000e+00> : vector<8x256xf32>
    %30 = tpu.matmul %27, %29, %cst_31 {dimension_numbers = #tpu.dot_dimension_numbers<[1], [0], [0], [1], [0, 0, 1, 1], [], []>} : vector<8x256xf32>, vector<256x256xf32>, vector<8x256xf32> -> vector<8x256xf32>
    %31 = arith.addf %15, %30 : vector<8x256xf32>
    %cst_32 = arith.constant dense<0.000000e+00> : vector<128x256xf32>
    %32 = tpu.matmul %0, %26, %cst_32 {dimension_numbers = #tpu.dot_dimension_numbers<[1], [0], [0], [1], [0, 0, 1, 1], [], []>} : vector<128x128xf32>, vector<128x256xf32>, vector<128x256xf32> -> vector<128x256xf32>
    %c0_33 = arith.constant 0 : index
    %c0_34 = arith.constant 0 : index
    %33 = vector.load %arg22[%c0_33, %c0_34] : memref<128x512xf32, #tpu.memory_space<vmem>>, vector<128x256xf32>
    tpu.vector_store %arg22[%c0_33, %c0_34], %32 {strides = array<i32>} : memref<128x512xf32, #tpu.memory_space<vmem>>, vector<128x256xf32>,
    %c0_35 = arith.constant 0 : index
    %c256_36 = arith.constant 256 : index
    %34 = vector.load %arg22[%c0_35, %c256_36] : memref<128x512xf32, #tpu.memory_space<vmem>>, vector<128x256xf32>
    tpu.vector_store %arg22[%c0_35, %c256_36], %26 {strides = array<i32>} : memref<128x512xf32, #tpu.memory_space<vmem>>, vector<128x256xf32>,
    %c0_37 = arith.constant 0 : index
    %c0_38 = arith.constant 0 : index
    %35 = vector.load %arg22[%c0_37, %c0_38] : memref<128x512xf32, #tpu.memory_space<vmem>>, vector<128x512xf32>
    %c0_39 = arith.constant 0 : index
    %c0_40 = arith.constant 0 : index
    %36 = vector.load %arg9[%c0_39, %c0_40] : memref<512x256xf32, #tpu.memory_space<vmem>>, vector<512x256xf32>
    %cst_41 = arith.constant dense<0.000000e+00> : vector<128x256xf32>
    %37 = tpu.matmul %35, %36, %cst_41 {dimension_numbers = #tpu.dot_dimension_numbers<[1], [0], [0], [1], [0, 0, 1, 1], [], []>} : vector<128x512xf32>, vector<512x256xf32>, vector<128x256xf32> -> vector<128x256xf32>
    %c0_42 = arith.constant 0 : index
    %c0_43 = arith.constant 0 : index
    %38 = vector.load %arg10[%c0_42, %c0_43] : memref<1x256xf32, #tpu.memory_space<vmem>>, vector<1x256xf32>
    %39 = vector.broadcast %38 : vector<1x256xf32> to vector<128x256xf32>
    %40 = arith.addf %37, %39 : vector<128x256xf32>
    %cst_44 = arith.constant 0.000000e+00 : f32
    %41 = vector.broadcast %cst_44 : f32 to vector<128x256xf32>
    %42 = arith.maximumf %40, %41 : vector<128x256xf32>
    %cst_45 = arith.constant dense<0.000000e+00> : vector<8x256xf32>
    %43 = tpu.matmul %1, %42, %cst_45 {dimension_numbers = #tpu.dot_dimension_numbers<[1], [0], [0], [1], [0, 0, 1, 1], [], []>} : vector<8x128xf32>, vector<128x256xf32>, vector<8x256xf32> -> vector<8x256xf32>
    %c2 = arith.constant 2 : index
    %c0_46 = arith.constant 0 : index
    %c0_47 = arith.constant 0 : index
    %44 = vector.load %arg13[%c2, %c0_46, %c0_47] : memref<4x256x256xf32, #tpu.memory_space<vmem>>, vector<1x256x256xf32>
    %45 = vector.shape_cast %44 : vector<1x256x256xf32> to vector<256x256xf32>
    %cst_48 = arith.constant dense<0.000000e+00> : vector<8x256xf32>
    %46 = tpu.matmul %43, %45, %cst_48 {dimension_numbers = #tpu.dot_dimension_numbers<[1], [0], [0], [1], [0, 0, 1, 1], [], []>} : vector<8x256xf32>, vector<256x256xf32>, vector<8x256xf32> -> vector<8x256xf32>
    %47 = arith.addf %31, %46 : vector<8x256xf32>
    %cst_49 = arith.constant dense<0.000000e+00> : vector<128x256xf32>
    %48 = tpu.matmul %0, %42, %cst_49 {dimension_numbers = #tpu.dot_dimension_numbers<[1], [0], [0], [1], [0, 0, 1, 1], [], []>} : vector<128x128xf32>, vector<128x256xf32>, vector<128x256xf32> -> vector<128x256xf32>
    %c0_50 = arith.constant 0 : index
    %c0_51 = arith.constant 0 : index
    %49 = vector.load %arg22[%c0_50, %c0_51] : memref<128x512xf32, #tpu.memory_space<vmem>>, vector<128x256xf32>
    tpu.vector_store %arg22[%c0_50, %c0_51], %48 {strides = array<i32>} : memref<128x512xf32, #tpu.memory_space<vmem>>, vector<128x256xf32>,
    %c0_52 = arith.constant 0 : index
    %c256_53 = arith.constant 256 : index
    %50 = vector.load %arg22[%c0_52, %c256_53] : memref<128x512xf32, #tpu.memory_space<vmem>>, vector<128x256xf32>
    tpu.vector_store %arg22[%c0_52, %c256_53], %42 {strides = array<i32>} : memref<128x512xf32, #tpu.memory_space<vmem>>, vector<128x256xf32>,
    %c0_54 = arith.constant 0 : index
    %c0_55 = arith.constant 0 : index
    %51 = vector.load %arg22[%c0_54, %c0_55] : memref<128x512xf32, #tpu.memory_space<vmem>>, vector<128x512xf32>
    %c0_56 = arith.constant 0 : index
    %c0_57 = arith.constant 0 : index
    %52 = vector.load %arg11[%c0_56, %c0_57] : memref<512x256xf32, #tpu.memory_space<vmem>>, vector<512x256xf32>
    %cst_58 = arith.constant dense<0.000000e+00> : vector<128x256xf32>
    %53 = tpu.matmul %51, %52, %cst_58 {dimension_numbers = #tpu.dot_dimension_numbers<[1], [0], [0], [1], [0, 0, 1, 1], [], []>} : vector<128x512xf32>, vector<512x256xf32>, vector<128x256xf32> -> vector<128x256xf32>
    %c0_59 = arith.constant 0 : index
    %c0_60 = arith.constant 0 : index
    %54 = vector.load %arg12[%c0_59, %c0_60] : memref<1x256xf32, #tpu.memory_space<vmem>>, vector<1x256xf32>
    %55 = vector.broadcast %54 : vector<1x256xf32> to vector<128x256xf32>
    %56 = arith.addf %53, %55 : vector<128x256xf32>
    %cst_61 = arith.constant 0.000000e+00 : f32
    %57 = vector.broadcast %cst_61 : f32 to vector<128x256xf32>
    %58 = arith.maximumf %56, %57 : vector<128x256xf32>
    %cst_62 = arith.constant dense<0.000000e+00> : vector<8x256xf32>
    %59 = tpu.matmul %1, %58, %cst_62 {dimension_numbers = #tpu.dot_dimension_numbers<[1], [0], [0], [1], [0, 0, 1, 1], [], []>} : vector<8x128xf32>, vector<128x256xf32>, vector<8x256xf32> -> vector<8x256xf32>
    %c3 = arith.constant 3 : index
    %c0_63 = arith.constant 0 : index
    %c0_64 = arith.constant 0 : index
    %60 = vector.load %arg13[%c3, %c0_63, %c0_64] : memref<4x256x256xf32, #tpu.memory_space<vmem>>, vector<1x256x256xf32>
    %61 = vector.shape_cast %60 : vector<1x256x256xf32> to vector<256x256xf32>
    %cst_65 = arith.constant dense<0.000000e+00> : vector<8x256xf32>
    %62 = tpu.matmul %59, %61, %cst_65 {dimension_numbers = #tpu.dot_dimension_numbers<[1], [0], [0], [1], [0, 0, 1, 1], [], []>} : vector<8x256xf32>, vector<256x256xf32>, vector<8x256xf32> -> vector<8x256xf32>
    %63 = arith.addf %47, %62 : vector<8x256xf32>
    %c0_66 = arith.constant 0 : index
    %c0_67 = arith.constant 0 : index
    %64 = vector.load %arg3[%c0_66, %c0_67] : memref<8x1xf32, #tpu.memory_space<vmem>>, vector<8x1xf32>
    %65 = vector.broadcast %64 : vector<8x1xf32> to vector<8x256xf32>
    %66 = arith.mulf %63, %65 : vector<8x256xf32>
    %c0_68 = arith.constant 0 : index
    %c0_69 = arith.constant 0 : index
    %67 = vector.load %arg14[%c0_68, %c0_69] : memref<1x256xf32, #tpu.memory_space<vmem>>, vector<1x256xf32>
    %68 = vector.broadcast %67 : vector<1x256xf32> to vector<8x256xf32>
    %69 = arith.addf %66, %68 : vector<8x256xf32>
    %cst_70 = arith.constant 0.000000e+00 : f32
    %70 = vector.broadcast %cst_70 : f32 to vector<8x256xf32>
    %71 = arith.maximumf %69, %70 : vector<8x256xf32>
    %c0_71 = arith.constant 0 : index
    %c0_72 = arith.constant 0 : index
    %72 = vector.load %arg15[%c0_71, %c0_72] : memref<256x256xf32, #tpu.memory_space<vmem>>, vector<256x256xf32>
    %cst_73 = arith.constant dense<0.000000e+00> : vector<8x256xf32>
    %73 = tpu.matmul %71, %72, %cst_73 {dimension_numbers = #tpu.dot_dimension_numbers<[1], [0], [0], [1], [0, 0, 1, 1], [], []>} : vector<8x256xf32>, vector<256x256xf32>, vector<8x256xf32> -> vector<8x256xf32>
    %c0_74 = arith.constant 0 : index
    %c0_75 = arith.constant 0 : index
    %74 = vector.load %arg16[%c0_74, %c0_75] : memref<1x256xf32, #tpu.memory_space<vmem>>, vector<1x256xf32>
    %75 = vector.broadcast %74 : vector<1x256xf32> to vector<8x256xf32>
    %76 = arith.addf %73, %75 : vector<8x256xf32>
    %cst_76 = arith.constant 0.000000e+00 : f32
    %77 = vector.broadcast %cst_76 : f32 to vector<8x256xf32>
    %78 = arith.maximumf %76, %77 : vector<8x256xf32>
    %c0_77 = arith.constant 0 : index
    %c0_78 = arith.constant 0 : index
    %79 = vector.load %arg17[%c0_77, %c0_78] : memref<256x256xf32, #tpu.memory_space<vmem>>, vector<256x256xf32>
    %cst_79 = arith.constant dense<0.000000e+00> : vector<8x256xf32>
    %80 = tpu.matmul %78, %79, %cst_79 {dimension_numbers = #tpu.dot_dimension_numbers<[1], [0], [0], [1], [0, 0, 1, 1], [], []>} : vector<8x256xf32>, vector<256x256xf32>, vector<8x256xf32> -> vector<8x256xf32>
    %c0_80 = arith.constant 0 : index
    %c0_81 = arith.constant 0 : index
    %81 = vector.load %arg18[%c0_80, %c0_81] : memref<1x256xf32, #tpu.memory_space<vmem>>, vector<1x256xf32>
    %82 = vector.broadcast %81 : vector<1x256xf32> to vector<8x256xf32>
    %83 = arith.addf %80, %82 : vector<8x256xf32>
    %cst_82 = arith.constant 0.000000e+00 : f32
    %84 = vector.broadcast %cst_82 : f32 to vector<8x256xf32>
    %85 = arith.maximumf %83, %84 : vector<8x256xf32>
    %c0_83 = arith.constant 0 : index
    %c0_84 = arith.constant 0 : index
    %86 = vector.load %arg19[%c0_83, %c0_84] : memref<256x128xf32, #tpu.memory_space<vmem>>, vector<256x128xf32>
    %cst_85 = arith.constant dense<0.000000e+00> : vector<8x128xf32>
    %87 = tpu.matmul %85, %86, %cst_85 {dimension_numbers = #tpu.dot_dimension_numbers<[1], [0], [0], [1], [0, 0, 1, 1], [], []>} : vector<8x256xf32>, vector<256x128xf32>, vector<8x128xf32> -> vector<8x128xf32>
    %c0_86 = arith.constant 0 : index
    %c0_87 = arith.constant 0 : index
    %88 = vector.load %arg20[%c0_86, %c0_87] : memref<1x128xf32, #tpu.memory_space<vmem>>, vector<1x128xf32>
    %89 = vector.broadcast %88 : vector<1x128xf32> to vector<8x128xf32>
    %90 = arith.addf %87, %89 : vector<8x128xf32>
    %c0_88 = arith.constant 0 : index
    %c0_89 = arith.constant 0 : index
    %91 = vector.load %arg21[%c0_88, %c0_89] : memref<8x128xf32, #tpu.memory_space<vmem>>, vector<8x128xf32>
    tpu.vector_store %arg21[%c0_88, %c0_89], %90 {strides = array<i32>} : memref<8x128xf32, #tpu.memory_space<vmem>>, vector<8x128xf32>,
    return
  }
  func.func @transform_0(%arg0: i32) -> (i32, i32) {
    %c0_i32 = arith.constant 0 : i32
    %c0_i32_0 = arith.constant 0 : i32
    %c0_i32_1 = arith.constant 0 : i32
    return %c0_i32, %c0_i32_0 : i32, i32
  }
  func.func @transform_1(%arg0: i32) -> (i32, i32) {
    %c0_i32 = arith.constant 0 : i32
    %c0_i32_0 = arith.constant 0 : i32
    %c0_i32_1 = arith.constant 0 : i32
    return %c0_i32, %c0_i32_0 : i32, i32
  }
  func.func @transform_2(%arg0: i32) -> (i32, i32) {
    %c0_i32 = arith.constant 0 : i32
    %c0_i32_0 = arith.constant 0 : i32
    %c0_i32_1 = arith.constant 0 : i32
    return %c0_i32, %c0_i32_0 : i32, i32
  }
  func.func @transform_3(%arg0: i32) -> (i32, i32) {
    %c0_i32 = arith.constant 0 : i32
    %c0_i32_0 = arith.constant 0 : i32
    %c0_i32_1 = arith.constant 0 : i32
    return %c0_i32, %c0_i32_0 : i32, i32
  }
  func.func @transform_4(%arg0: i32) -> (i32, i32) {
    %c0_i32 = arith.constant 0 : i32
    %c0_i32_0 = arith.constant 0 : i32
    %c0_i32_1 = arith.constant 0 : i32
    return %c0_i32, %c0_i32_0 : i32, i32
  }
  func.func @transform_5(%arg0: i32) -> (i32, i32) {
    %c0_i32 = arith.constant 0 : i32
    %c0_i32_0 = arith.constant 0 : i32
    %c0_i32_1 = arith.constant 0 : i32
    return %c0_i32, %c0_i32_0 : i32, i32
  }
  func.func @transform_6(%arg0: i32) -> (i32, i32) {
    %c0_i32 = arith.constant 0 : i32
    %c0_i32_0 = arith.constant 0 : i32
    %c0_i32_1 = arith.constant 0 : i32
    return %c0_i32, %c0_i32_0 : i32, i32
  }
  func.func @transform_7(%arg0: i32) -> (i32, i32) {
    %c0_i32 = arith.constant 0 : i32
    %c0_i32_0 = arith.constant 0 : i32
    %c0_i32_1 = arith.constant 0 : i32
    return %c0_i32, %c0_i32_0 : i32, i32
  }
  func.func @transform_8(%arg0: i32) -> (i32, i32) {
    %c0_i32 = arith.constant 0 : i32
    %c0_i32_0 = arith.constant 0 : i32
    %c0_i32_1 = arith.constant 0 : i32
    return %c0_i32, %c0_i32_0 : i32, i32
  }
  func.func @transform_9(%arg0: i32) -> (i32, i32) {
    %c0_i32 = arith.constant 0 : i32
    %c0_i32_0 = arith.constant 0 : i32
    %c0_i32_1 = arith.constant 0 : i32
    return %c0_i32, %c0_i32_0 : i32, i32
  }
  func.func @transform_10(%arg0: i32) -> (i32, i32) {
    %c0_i32 = arith.constant 0 : i32
    %c0_i32_0 = arith.constant 0 : i32
    %c0_i32_1 = arith.constant 0 : i32
    return %c0_i32, %c0_i32_0 : i32, i32
  }
  func.func @transform_11(%arg0: i32) -> (i32, i32) {
    %c0_i32 = arith.constant 0 : i32
    %c0_i32_0 = arith.constant 0 : i32
    %c0_i32_1 = arith.constant 0 : i32
    return %c0_i32, %c0_i32_0 : i32, i32
  }
  func.func @transform_12(%arg0: i32) -> (i32, i32, i32) {
    %c0_i32 = arith.constant 0 : i32
    %c0_i32_0 = arith.constant 0 : i32
    %c0_i32_1 = arith.constant 0 : i32
    %c0_i32_2 = arith.constant 0 : i32
    return %c0_i32, %c0_i32_0, %c0_i32_1 : i32, i32, i32
  }
  func.func @transform_13(%arg0: i32) -> (i32, i32) {
    %c0_i32 = arith.constant 0 : i32
    %c0_i32_0 = arith.constant 0 : i32
    %c0_i32_1 = arith.constant 0 : i32
    return %c0_i32, %c0_i32_0 : i32, i32
  }
  func.func @transform_14(%arg0: i32) -> (i32, i32) {
    %c0_i32 = arith.constant 0 : i32
    %c0_i32_0 = arith.constant 0 : i32
    %c0_i32_1 = arith.constant 0 : i32
    return %c0_i32, %c0_i32_0 : i32, i32
  }
  func.func @transform_15(%arg0: i32) -> (i32, i32) {
    %c0_i32 = arith.constant 0 : i32
    %c0_i32_0 = arith.constant 0 : i32
    %c0_i32_1 = arith.constant 0 : i32
    return %c0_i32, %c0_i32_0 : i32, i32
  }
  func.func @transform_16(%arg0: i32) -> (i32, i32) {
    %c0_i32 = arith.constant 0 : i32
    %c0_i32_0 = arith.constant 0 : i32
    %c0_i32_1 = arith.constant 0 : i32
    return %c0_i32, %c0_i32_0 : i32, i32
  }
  func.func @transform_17(%arg0: i32) -> (i32, i32) {
    %c0_i32 = arith.constant 0 : i32
    %c0_i32_0 = arith.constant 0 : i32
    %c0_i32_1 = arith.constant 0 : i32
    return %c0_i32, %c0_i32_0 : i32, i32
  }
  func.func @transform_18(%arg0: i32) -> (i32, i32) {
    %c0_i32 = arith.constant 0 : i32
    %c0_i32_0 = arith.constant 0 : i32
    %c0_i32_1 = arith.constant 0 : i32
    return %c0_i32, %c0_i32_0 : i32, i32
  }
  func.func @transform_19(%arg0: i32) -> (i32, i32) {
    %c0_i32 = arith.constant 0 : i32
    %c0_i32_0 = arith.constant 0 : i32
    %c0_i32_1 = arith.constant 0 : i32
    return %c0_i32, %c0_i32_0 : i32, i32
  }
  func.func @transform_20(%arg0: i32) -> (i32, i32) {
    %c0_i32 = arith.constant 0 : i32
    %c0_i32_0 = arith.constant 0 : i32
    %c0_i32_1 = arith.constant 0 : i32
    return %c0_i32, %c0_i32_0 : i32, i32
  }
}

</mosaic_0001>

<bundles_post_ra>
// kernel: tpu_custom_call.1
= control target key start
LH: loop header
LB: loop body
LE: loop exit
PB: predicated region body
PF: predicated region fallthrough
CT: control target
= control target key end

     0   :  { %s7483_s0 = inlined_call_operand.hbm [shape: f32[128,128], index: 0, kind: input, shape index: {}]   ;;  %s7484_s1 = inlined_call_operand.vmem [shape: f32[8,128], index: 1, kind: input, shape index: {}]   ;;  %s7485_s2 = inlined_call_operand.vmem [shape: f32[8,1], index: 2, kind: input, shape index: {}]   ;;  %s7486_s3 = inlined_call_operand.hbm [shape: f32[128,128], index: 3, kind: input, shape index: {}]   ;;  %s7487_s4 = inlined_call_operand.hbm [shape: f32[256,256], index: 4, kind: input, shape index: {}]   ;;  %s7488_s5 = inlined_call_operand.vmem [shape: f32[1,256], index: 5, kind: input, shape index: {}]   ;;  %s7489_s6 = inlined_call_operand.hbm [shape: f32[512,256], index: 6, kind: input, shape index: {}]   ;;  %s7490_s7 = inlined_call_operand.vmem [shape: f32[1,256], index: 7, kind: input, shape index: {}]   ;;  %s7491_s8 = inlined_call_operand.hbm [shape: f32[512,256], index: 8, kind: input, shape index: {}]   ;;  %s7492_s9 = inlined_call_operand.vmem [shape: f32[1,256], index: 9, kind: input, shape index: {}]   ;;  %s7493_s10 = inlined_call_operand.hbm [shape: f32[512,256], index: 10, kind: input, shape index: {}]   ;;  %s7494_s11 = inlined_call_operand.vmem [shape: f32[1,256], index: 11, kind: input, shape index: {}]   ;;  %s7495_s12 = inlined_call_operand.hbm [shape: f32[4,256,256], index: 12, kind: input, shape index: {}]   ;;  %s7496_s13 = inlined_call_operand.vmem [shape: f32[1,256], index: 13, kind: input, shape index: {}]   ;;  %s7497_s14 = inlined_call_operand.hbm [shape: f32[256,256], index: 14, kind: input, shape index: {}]   ;;  %s7498_s15 = inlined_call_operand.vmem [shape: f32[1,256], index: 15, kind: input, shape index: {}]   ;;  %s7499_s16 = inlined_call_operand.hbm [shape: f32[256,256], index: 16, kind: input, shape index: {}]   ;;  %s7500_s17 = inlined_call_operand.vmem [shape: f32[1,256], index: 17, kind: input, shape index: {}]   ;;  %s7501_s18 = inlined_call_operand.hbm [shape: f32[256,128], index: 18, kind: input, shape index: {}]   ;;  %s7502_s19 = inlined_call_operand.vmem [shape: f32[1,128], index: 19, kind: input, shape index: {}]   ;;  %s7503_s20 = inlined_call_operand.hbm [shape: f32[8,128], index: 20, kind: output, shape index: {}]  }
   0x1   :  { %7622 = sst [smem:[#allocation44_spill]] %s7483_s0 }
   0x2   :  { %7623 = sst [smem:[#allocation45_spill]] %s7484_s1 }
   0x3   :  { %7624 = sst [smem:[#allocation46_spill]] %s7485_s2 }
   0x4   :  { %7625 = sst [smem:[#allocation47_spill]] %s7486_s3 }
   0x5   :  { %7626 = sst [smem:[#allocation48_spill]] %s7487_s4 }
   0x6   :  { %7627 = sst [smem:[#allocation49_spill]] %s7502_s19 }
   0x7   :  { %7628 = sst [smem:[#allocation50_spill]] %s7503_s20 }
   0x8   :  { %25 = vsyncpa [#allocation4], 0 }
   0x9   :  { %26 = vsyncpa [#allocation7], 0 }
   0xa   :  { %27 = vsyncpa [#allocation10], 0 }
   0xb   :  { %28 = vsyncpa [#allocation13], 0 }
   0xc   :  { %29 = vsyncpa [#allocation16], 0 }
   0xd   :  { %30 = vsyncpa [#allocation19], 0 }
   0xe   :  { %31 = vsyncpa [#allocation5], 0  ;;  %s6032_s1 = smov [#allocation6]   ;;  %s7629_s2 = sld [smem:[#allocation47_spill]] }
   0xf   :  { %s53_s22 = sshll.u32 %s6032_s1, 4  ;;  %s54_s22 = int_to_ptr.vmem [resolvable:$true] %s53_s22 }
  0x14   :  { %s5776_s25 = scalar_lea.hbm %s7629_s2, 2048 }
  0x15   :  { %p5777_p0 = scmp.ne.s32.totalorder %s7629_s2, %s5776_s25  ;;  %p5780_p1 = scmp.lt.u32.totalorder %s5776_s25, %s7629_s2 }
  0x17   :  { %p5782_p2 = pnand %p5780_p1, %p5777_p0 }
  0x19   :  { %5785 = shalt.err (!%p5782_p2)
}
  0x1a   :  { %s5786_s4 = scalar_lea.vmem %s54_s22, 2048  ;;  %p5791_p4 = scmp.lt.s32.totalorder %s54_s22, %s54_s22 }
  0x1b   :  { %p5787_p3 = scmp.ne.s32.totalorder %s54_s22, %s5786_s4  ;;  %p5792_p5 = scmp.lt.s32.totalorder %s5786_s4, %s5786_s4 }
  0x1d   :  { %p5793_p6 = por %p5792_p5, %p5791_p4 }
  0x1f   :  { %p5794_p7 = pnand %p5793_p6, %p5787_p3 }
  0x21   :  { %5797 = shalt.err (!%p5794_p7)
}
  0x22   :  { %s6033_s29 = smov 128   ;;  %s6034_s30 = smov 8  }
  0x23   :  { %59 = dma.hbm_to_vmem [thread:$0]  %s7629_s2, 2048, %s54_s22, [#allocation7], %s6033_s29, %s6033_s29, %s6034_s30  }
  0x24   :  { %s6035_s1 = smov [#allocation9]   ;;  %s6036_s24 = smov [#allocation12]  }
  0x25   :  { %s79_s23 = sshll.u32 %s6035_s1, 4  ;;  %s107_s25 = sshll.u32 %s6036_s24, 4  ;;  %s80_s23 = int_to_ptr.vmem [resolvable:$true] %s79_s23  ;;  %s108_s25 = int_to_ptr.vmem [resolvable:$true] %s107_s25 }
  0x26   :  { %s5798_s27 = scalar_lea.hbm %s7489_s6, 16384 }
  0x27   :  { %p5799_p8 = scmp.ne.s32.totalorder %s7489_s6, %s5798_s27  ;;  %p5802_p9 = scmp.lt.u32.totalorder %s5798_s27, %s7489_s6 }
  0x29   :  { %p5804_p10 = pnand %p5802_p9, %p5799_p8 }
  0x2b   :  { %5807 = shalt.err (!%p5804_p10)
}
  0x2c   :  { %s5808_s22 = scalar_lea.vmem %s80_s23, 16384  ;;  %p5813_p12 = scmp.lt.s32.totalorder %s80_s23, %s80_s23 }
  0x2d   :  { %p5809_p11 = scmp.ne.s32.totalorder %s80_s23, %s5808_s22  ;;  %p5814_p13 = scmp.lt.s32.totalorder %s5808_s22, %s5808_s22 }
  0x2f   :  { %p5815_p0 = por %p5814_p13, %p5813_p12 }
  0x31   :  { %p5816_p1 = pnand %p5815_p0, %p5809_p11 }
  0x33   :  { %5819 = shalt.err (!%p5816_p1)
}
  0x34   :  { %s6037_s2 = smov 256   ;;  %s6038_s0 = smov 16  }
  0x35   :  { %85 = dma.hbm_to_vmem [thread:$0]  %s7489_s6, 16384, %s80_s23, [#allocation10], %s6037_s2, %s6037_s2, %s6038_s0  }
  0x36   :  { %s5820_s24 = scalar_lea.hbm %s7493_s10, 16384 }
  0x37   :  { %p5821_p2 = scmp.ne.s32.totalorder %s7493_s10, %s5820_s24  ;;  %p5824_p3 = scmp.lt.u32.totalorder %s5820_s24, %s7493_s10 }
  0x39   :  { %p5826_p4 = pnand %p5824_p3, %p5821_p2 }
  0x3b   :  { %5829 = shalt.err (!%p5826_p4)
}
  0x3c   :  { %s5830_s4 = scalar_lea.vmem %s108_s25, 16384  ;;  %p5835_p6 = scmp.lt.s32.totalorder %s108_s25, %s108_s25 }
  0x3d   :  { %p5831_p5 = scmp.ne.s32.totalorder %s108_s25, %s5830_s4  ;;  %p5836_p7 = scmp.lt.s32.totalorder %s5830_s4, %s5830_s4 }
  0x3f   :  { %p5837_p8 = por %p5836_p7, %p5835_p6 }
  0x41   :  { %p5838_p9 = pnand %p5837_p8, %p5831_p5 }
  0x43   :  { %5841 = shalt.err (!%p5838_p9)
}
  0x44   :  { %113 = dma.hbm_to_vmem [thread:$0]  %s7493_s10, 16384, %s108_s25, [#allocation13], %s6037_s2, %s6037_s2, %s6038_s0  }
  0x45   :  { %s6039_s22 = smov [#allocation15]   ;;  %s6040_s1 = smov [#allocation3]  }
  0x46   :  { %s135_s21 = sshll.u32 %s6039_s22, 4  ;;  %s37_s19 = sshll.u32 %s6040_s1, 4  ;;  %s136_s21 = int_to_ptr.vmem [resolvable:$true] %s135_s21  ;;  %s38_s19 = int_to_ptr.vmem [resolvable:$true] %s37_s19 }
  0x47   :  { %s5842_s3 = scalar_lea.hbm %s7497_s14, 8192 }
  0x48   :  { %p5843_p10 = scmp.ne.s32.totalorder %s7497_s14, %s5842_s3  ;;  %p5846_p11 = scmp.lt.u32.totalorder %s5842_s3, %s7497_s14 }
  0x4a   :  { %p5848_p12 = pnand %p5846_p11, %p5843_p10 }
  0x4c   :  { %5851 = shalt.err (!%p5848_p12)
}
  0x4d   :  { %s5852_s10 = scalar_lea.vmem %s136_s21, 8192  ;;  %p5857_p0 = scmp.lt.s32.totalorder %s136_s21, %s136_s21 }
  0x4e   :  { %p5853_p13 = scmp.ne.s32.totalorder %s136_s21, %s5852_s10  ;;  %p5858_p1 = scmp.lt.s32.totalorder %s5852_s10, %s5852_s10 }
  0x50   :  { %p5859_p2 = por %p5858_p1, %p5857_p0 }
  0x52   :  { %p5860_p3 = pnand %p5859_p2, %p5853_p13 }
  0x54   :  { %5863 = shalt.err (!%p5860_p3)
}
  0x55   :  { %141 = dma.hbm_to_vmem [thread:$0]  %s7497_s14, 8192, %s136_s21, [#allocation16], %s6037_s2, %s6037_s2, %s6038_s0  }
  0x56   :  { %s7630_s1 = sld [smem:[#allocation44_spill]] }
  0x5c   :  { %s5864_s20 = scalar_lea.hbm %s7630_s1, 2048 }
  0x5d   :  { %p5865_p4 = scmp.ne.s32.totalorder %s7630_s1, %s5864_s20  ;;  %p5868_p5 = scmp.lt.u32.totalorder %s5864_s20, %s7630_s1 }
  0x5f   :  { %p5870_p6 = pnand %p5868_p5, %p5865_p4 }
  0x61   :  { %5873 = shalt.err (!%p5870_p6)
}
  0x62   :  { %s5874_s28 = scalar_lea.vmem %s38_s19, 2048  ;;  %p5879_p8 = scmp.lt.s32.totalorder %s38_s19, %s38_s19 }
  0x63   :  { %p5875_p7 = scmp.ne.s32.totalorder %s38_s19, %s5874_s28  ;;  %p5880_p9 = scmp.lt.s32.totalorder %s5874_s28, %s5874_s28 }
  0x65   :  { %p5881_p10 = por %p5880_p9, %p5879_p8 }
  0x67   :  { %p5882_p11 = pnand %p5881_p10, %p5875_p7 }
  0x69   :  { %5885 = shalt.err (!%p5882_p11)
}
  0x6a   :  { %43 = dma.hbm_to_vmem [thread:$0]  %s7630_s1, 2048, %s38_s19, [#allocation4], %s6033_s29, %s6033_s29, %s6034_s30  }
  0x6b   :  { %s6041_s4 = smov [#allocation8]   ;;  %s6042_s25 = smov [#allocation11]  }
  0x6c   :  { %s65_s10 = sshll.u32 %s6041_s4, 4  ;;  %s93_s6 = sshll.u32 %s6042_s25, 4  ;;  %s66_s10 = int_to_ptr.vmem [resolvable:$true] %s65_s10  ;;  %s94_s6 = int_to_ptr.vmem [resolvable:$true] %s93_s6 }
  0x6d   :  { %s7631_s20 = sld [smem:[#allocation48_spill]] }
  0x73   :  { %s5886_s24 = scalar_lea.hbm %s7631_s20, 8192 }
  0x74   :  { %p5887_p12 = scmp.ne.s32.totalorder %s7631_s20, %s5886_s24  ;;  %p5890_p13 = scmp.lt.u32.totalorder %s5886_s24, %s7631_s20 }
  0x76   :  { %p5892_p0 = pnand %p5890_p13, %p5887_p12 }
  0x78   :  { %5895 = shalt.err (!%p5892_p0)
}
  0x79   :  { %s5896_s19 = scalar_lea.vmem %s66_s10, 8192  ;;  %p5901_p2 = scmp.lt.s32.totalorder %s66_s10, %s66_s10 }
  0x7a   :  { %p5897_p1 = scmp.ne.s32.totalorder %s66_s10, %s5896_s19  ;;  %p5902_p3 = scmp.lt.s32.totalorder %s5896_s19, %s5896_s19 }
  0x7c   :  { %p5903_p4 = por %p5902_p3, %p5901_p2 }
  0x7e   :  { %p5904_p5 = pnand %p5903_p4, %p5897_p1 }
  0x80   :  { %5907 = shalt.err (!%p5904_p5)
}
  0x81   :  { %71 = dma.hbm_to_vmem [thread:$0]  %s7631_s20, 8192, %s66_s10, [#allocation7], %s6037_s2, %s6037_s2, %s6038_s0  }
  0x82   :  { %s5908_s25 = scalar_lea.hbm %s7491_s8, 16384 }
  0x83   :  { %p5909_p6 = scmp.ne.s32.totalorder %s7491_s8, %s5908_s25  ;;  %p5912_p7 = scmp.lt.u32.totalorder %s5908_s25, %s7491_s8 }
  0x85   :  { %p5914_p8 = pnand %p5912_p7, %p5909_p6 }
  0x87   :  { %5917 = shalt.err (!%p5914_p8)
}
  0x88   :  { %s5918_s26 = scalar_lea.vmem %s94_s6, 16384  ;;  %p5923_p10 = scmp.lt.s32.totalorder %s94_s6, %s94_s6 }
  0x89   :  { %p5919_p9 = scmp.ne.s32.totalorder %s94_s6, %s5918_s26  ;;  %p5924_p11 = scmp.lt.s32.totalorder %s5918_s26, %s5918_s26 }
  0x8b   :  { %p5925_p12 = por %p5924_p11, %p5923_p10 }
  0x8d   :  { %p5926_p13 = pnand %p5925_p12, %p5919_p9 }
  0x8f   :  { %5929 = shalt.err (!%p5926_p13)
}
  0x90   :  { %99 = dma.hbm_to_vmem [thread:$0]  %s7491_s8, 16384, %s94_s6, [#allocation10], %s6037_s2, %s6037_s2, %s6038_s0  }
  0x91   :  { %s6043_s27 = smov [#allocation14]   ;;  %s6044_s19 = smov [#allocation17]  }
  0x92   :  { %s121_s28 = sshll.u32 %s6043_s27, 4  ;;  %s149_s1 = sshll.u32 %s6044_s19, 4  ;;  %s122_s28 = int_to_ptr.vmem [resolvable:$true] %s121_s28  ;;  %s150_s1 = int_to_ptr.vmem [resolvable:$true] %s149_s1 }
  0x93   :  { %s5930_s4 = scalar_lea.hbm %s7495_s12, 32768 }
  0x94   :  { %p5931_p0 = scmp.ne.s32.totalorder %s7495_s12, %s5930_s4  ;;  %p5934_p1 = scmp.lt.u32.totalorder %s5930_s4, %s7495_s12 }
  0x96   :  { %p5936_p2 = pnand %p5934_p1, %p5931_p0 }
  0x98   :  { %5939 = shalt.err (!%p5936_p2)
}
  0x99   :  { %s5940_s8 = scalar_lea.vmem %s122_s28, 32768  ;;  %p5945_p4 = scmp.lt.s32.totalorder %s122_s28, %s122_s28 }
  0x9a   :  { %p5941_p3 = scmp.ne.s32.totalorder %s122_s28, %s5940_s8  ;;  %p5946_p5 = scmp.lt.s32.totalorder %s5940_s8, %s5940_s8 }
  0x9c   :  { %p5947_p6 = por %p5946_p5, %p5945_p4 }
  0x9e   :  { %p5948_p7 = pnand %p5947_p6, %p5941_p3 }
  0xa0   :  { %5951 = shalt.err (!%p5948_p7)
}
  0xa1   :  { %127 = dma.hbm_to_vmem [thread:$0]  %s7495_s12, 32768, %s122_s28, [#allocation13], %s6037_s2, %s6037_s2, %s6038_s0  }
  0xa2   :  { %s5952_s20 = scalar_lea.hbm %s7499_s16, 8192 }
  0xa3   :  { %p5953_p8 = scmp.ne.s32.totalorder %s7499_s16, %s5952_s20  ;;  %p5956_p9 = scmp.lt.u32.totalorder %s5952_s20, %s7499_s16 }
  0xa5   :  { %p5958_p10 = pnand %p5956_p9, %p5953_p8 }
  0xa7   :  { %5961 = shalt.err (!%p5958_p10)
}
  0xa8   :  { %s5962_s4 = scalar_lea.vmem %s150_s1, 8192  ;;  %p5967_p12 = scmp.lt.s32.totalorder %s150_s1, %s150_s1 }
  0xa9   :  { %p5963_p11 = scmp.ne.s32.totalorder %s150_s1, %s5962_s4  ;;  %p5968_p13 = scmp.lt.s32.totalorder %s5962_s4, %s5962_s4 }
  0xab   :  { %p5969_p0 = por %p5968_p13, %p5967_p12 }
  0xad   :  { %p5970_p1 = pnand %p5969_p0, %p5963_p11 }
  0xaf   :  { %5973 = shalt.err (!%p5970_p1)
}
  0xb0   :  { %155 = dma.hbm_to_vmem [thread:$0]  %s7499_s16, 8192, %s150_s1, [#allocation16], %s6037_s2, %s6037_s2, %s6038_s0  }
  0xb1   :  { %s6045_s25 = smov [#allocation18]   ;;  %s5974_s8 = scalar_lea.hbm %s7501_s18, 4096 }
  0xb2   :  { %s163_s23 = sshll.u32 %s6045_s25, 4  ;;  %p5975_p2 = scmp.ne.s32.totalorder %s7501_s18, %s5974_s8  ;;  %s164_s23 = int_to_ptr.vmem [resolvable:$true] %s163_s23 }
  0xb3   :  { %p5978_p3 = scmp.lt.u32.totalorder %s5974_s8, %s7501_s18 }
  0xb5   :  { %p5980_p4 = pnand %p5978_p3, %p5975_p2 }
  0xb7   :  { %5983 = shalt.err (!%p5980_p4)
}
  0xb8   :  { %s5984_s20 = scalar_lea.vmem %s164_s23, 4096  ;;  %p5989_p6 = scmp.lt.s32.totalorder %s164_s23, %s164_s23 }
  0xb9   :  { %p5985_p5 = scmp.ne.s32.totalorder %s164_s23, %s5984_s20  ;;  %p5990_p7 = scmp.lt.s32.totalorder %s5984_s20, %s5984_s20 }
  0xbb   :  { %p5991_p8 = por %p5990_p7, %p5989_p6 }
  0xbd   :  { %p5992_p9 = pnand %p5991_p8, %p5985_p5 }
  0xbf   :  { %5995 = shalt.err (!%p5992_p9)
}
  0xc0   :  { %169 = dma.hbm_to_vmem [thread:$0]  %s7501_s18, 4096, %s164_s23, [#allocation19], %s6033_s29, %s6033_s29, %s6034_s30  }
  0xc1   :  { %6018 = dma.done.wait [#allocation4], 2048  }
  0xc2   :  { %6019 = vsyncadd [#allocation4], 4294965248 }
  0xc3   :  { %6020 = dma.done.wait [#allocation7], 10240  }
  0xc4   :  { %6021 = vsyncadd [#allocation7], 4294957056 }
  0xc5   :  { %6022 = dma.done.wait [#allocation10], 32768  }
  0xc6   :  { %6023 = vsyncadd [#allocation10], 4294934528 }
  0xc7   :  { %6024 = dma.done.wait [#allocation13], 49152  }
  0xc8   :  { %6025 = vsyncadd [#allocation13], 4294918144 }
  0xc9   :  { %6026 = dma.done.wait [#allocation16], 16384  }
  0xca   :  { %6027 = vsyncadd [#allocation16], 4294950912 }
  0xcb   :  { %6028 = dma.done.wait [#allocation19], 4096  }
  0xcc   :  { %6029 = vsyncadd [#allocation19], 4294963200  ;;  %v219_v0 = vld [vmem:[#allocation6] sm:$0xff]  ;;  %v6304_v1 = vld [vmem:[#allocation6 + $0x8] sm:$0xff]  ;;  %s7651_s0 = sld [smem:[#allocation45_spill]]  ;;  %s7770_s24 = sld [smem:[#allocation46_spill]] }
  0xcd   :  { %v6306_v2 = vld [vmem:[#allocation6 + $0x10] sm:$0xff]  ;;  %v4405_v3 = vpack.c.bf16 %v6304_v1, %v219_v0  ;;  %v6309_v4 = vld [vmem:[#allocation6 + $0x18] sm:$0xff]  ;;  %520 = vmatprep.mubr.f32.mxu1 %v219_v0  ;;  %v6313_v6 = vld [vmem:[#allocation6 + $0x20] sm:$0xff]  ;;  %s7771_s16 = sld [smem:[#allocation49_spill]]  ;;  %s6048_s2 = smov [#allocation20]  }
  0xce   :  { %v4409_v5 = vpack.c.bf16 %v6309_v4, %v6306_v2  ;;  %v6315_v7 = vld [vmem:[#allocation6 + $0x28] sm:$0xff]  ;;  %v6319_v9 = vld [vmem:[#allocation3] sm:$0xff]  ;;  %v6321_v10 = vld [vmem:[#allocation6 + $0x30] sm:$0xff] }
  0xcf   :  { %4406 = vmatprep.subr.bf16.mxu0 %v4405_v3  ;;  %v4413_v8 = vpack.c.bf16 %v6315_v7, %v6313_v6  ;;  %v6323_v11 = vld [vmem:[#allocation6 + $0x38] sm:$0xff]  ;;  %4381 = vmatprep.mubr.f32.mxu0 %v6319_v9  ;;  %v6328_v13 = vld [vmem:[#allocation6 + $0x40] sm:$0xff]  ;;  %v6330_v14 = vld [vmem:[#allocation6 + $0x48] sm:$0xff] }
  0xd0   :  { %4408 = vmatpush3.bf16.msra.mxu0 %v4405_v3  ;;  %v4417_v12 = vpack.c.bf16 %v6323_v11, %v6321_v10  ;;  %v381_v15 = vld [vmem:[#allocation8 + $0x8] sm:$0xff]  ;;  %v383_v16 = vld [vmem:[#allocation8 + $0x18] sm:$0xff]  ;;  %v380_v17 = vld [vmem:[#allocation8] sm:$0xff]  ;;  %v4421_v24 = vpack.c.bf16 %v6330_v14, %v6328_v13 }
  0xd1   :  { %4410 = vmatprep.subr.bf16.mxu0 %v4409_v5  ;;  %v382_v18 = vld [vmem:[#allocation8 + $0x10] sm:$0xff]  ;;  %v4437_v19 = vpack.c.bf16 %v383_v16, %v381_v15  ;;  %v385_v21 = vld [vmem:[#allocation8 + $0x28] sm:$0xff]  ;;  %v387_v22 = vld [vmem:[#allocation8 + $0x38] sm:$0xff] }
  0xd2   :  { %v4439_v20 = vpack.c.bf16 %v382_v18, %v380_v17  ;;  %v384_v23 = vld [vmem:[#allocation8 + $0x20] sm:$0xff]  ;;  %v4441_v25 = vpack.c.bf16 %v387_v22, %v385_v21  ;;  %v386_v26 = vld [vmem:[#allocation8 + $0x30] sm:$0xff]  ;;  %v389_v27 = vld [vmem:[#allocation8 + $0x48] sm:$0xff] }
  0xd3   :  { %v391_v28 = vld [vmem:[#allocation8 + $0x58] sm:$0xff]  ;;  %v6334_v29 = vld [vmem:[#allocation6 + $0x50] sm:$0xff]  ;;  %4438 = vmatprep.subr.bf16.mxu1 %v4437_v19  ;;  %v4443_v31 = vpack.c.bf16 %v386_v26, %v384_v23  ;;  %v388_v33 = vld [vmem:[#allocation8 + $0x40] sm:$0xff] }
  0xd4   :  { %4412 = vmatpush3.bf16.msra.mxu0 %v4409_v5  ;;  %v6336_v30 = vld [vmem:[#allocation6 + $0x58] sm:$0xff]  ;;  %4440 = vmatpush1.bf16.msra.mxu1 %v4439_v20  ;;  %v4445_v32 = vpack.c.bf16 %v391_v28, %v389_v27  ;;  %v390_v34 = vld [vmem:[#allocation8 + $0x50] sm:$0xff]  ;;  %v393_v36 = vld [vmem:[#allocation8 + $0x68] sm:$0xff] }
  0xd5   :  { %4414 = vmatprep.subr.bf16.mxu0 %v4413_v8  ;;  %4442 = vmatprep.subr.bf16.mxu1 %v4441_v25  ;;  %v4425_v35 = vpack.c.bf16 %v6336_v30, %v6334_v29  ;;  %v395_v37 = vld [vmem:[#allocation8 + $0x78] sm:$0xff]  ;;  %v6340_v38 = vld [vmem:[#allocation6 + $0x60] sm:$0xff]  ;;  %v6342_v39 = vld [vmem:[#allocation6 + $0x68] sm:$0xff]  ;;  %v4447_v40 = vpack.c.bf16 %v390_v34, %v388_v33 }
  0xd6   :  { %v4449_v41 = vpack.c.bf16 %v395_v37, %v393_v36  ;;  %v392_v42 = vld [vmem:[#allocation8 + $0x60] sm:$0xff]  ;;  %v394_v43 = vld [vmem:[#allocation8 + $0x70] sm:$0xff]  ;;  %v4429_v44 = vpack.c.bf16 %v6342_v39, %v6340_v38  ;;  %v397_v45 = vld [vmem:[#allocation8 + $0x88] sm:$0xff] }
  0xd7   :  { %v399_v46 = vld [vmem:[#allocation8 + $0x98] sm:$0xff]  ;;  %v6346_v47 = vld [vmem:[#allocation6 + $0x70] sm:$0xff]  ;;  %v4451_v49 = vpack.c.bf16 %v394_v43, %v392_v42  ;;  %v396_v51 = vld [vmem:[#allocation8 + $0x80] sm:$0xff] }
  0xd8   :  { %4416 = vmatpush3.bf16.msra.mxu0 %v4413_v8  ;;  %4444 = vmatpush1.bf16.msra.mxu1 %v4443_v31  ;;  %v6348_v48 = vld [vmem:[#allocation6 + $0x78] sm:$0xff]  ;;  %v4453_v50 = vpack.c.bf16 %v399_v46, %v397_v45  ;;  %v398_v52 = vld [vmem:[#allocation8 + $0x90] sm:$0xff]  ;;  %v401_v54 = vld [vmem:[#allocation8 + $0xa8] sm:$0xff] }
  0xd9   :  { %4418 = vmatprep.subr.bf16.mxu0 %v4417_v12  ;;  %4446 = vmatprep.subr.bf16.mxu1 %v4445_v32  ;;  %v4433_v53 = vpack.c.bf16 %v6348_v48, %v6346_v47  ;;  %v403_v55 = vld [vmem:[#allocation8 + $0xb8] sm:$0xff]  ;;  %v4455_v56 = vpack.c.bf16 %v398_v52, %v396_v51  ;;  %v400_v58 = vld [vmem:[#allocation8 + $0xa0] sm:$0xff]  ;;  %v402_v59 = vld [vmem:[#allocation8 + $0xb0] sm:$0xff] }
  0xda   :  { %v4457_v57 = vpack.c.bf16 %v403_v55, %v401_v54  ;;  %v405_v60 = vld [vmem:[#allocation8 + $0xc8] sm:$0xff]  ;;  %v407_v61 = vld [vmem:[#allocation8 + $0xd8] sm:$0xff]  ;;  %v4459_v62 = vpack.c.bf16 %v402_v59, %v400_v58  ;;  %v404_v3 = vld [vmem:[#allocation8 + $0xc0] sm:$0xff] }
  0xdb   :  { %v6352_v63 = vld [vmem:[#allocation3 + $0x8] sm:$0xff]  ;;  %v4461_v0 = vpack.c.bf16 %v407_v61, %v405_v60  ;;  %v406_v5 = vld [vmem:[#allocation8 + $0xd0] sm:$0xff]  ;;  %v411_v15 = vld [vmem:[#allocation8 + $0xf8] sm:$0xff] }
  0xdc   :  { %4420 = vmatpush3.bf16.msra.mxu0 %v4417_v12  ;;  %4448 = vmatpush1.bf16.msra.mxu1 %v4447_v40  ;;  %v6354_v8 = vld [vmem:[#allocation3 + $0x10] sm:$0xff]  ;;  %v409_v12 = vld [vmem:[#allocation8 + $0xe8] sm:$0xff]  ;;  %v4463_v16 = vpack.c.bf16 %v406_v5, %v404_v3  ;;  %v6358_v17 = vld [vmem:[#allocation3 + $0x18] sm:$0xff] }
  0xdd   :  { %4422 = vmatprep.subr.bf16.mxu0 %v4421_v24  ;;  %4450 = vmatprep.subr.bf16.mxu1 %v4449_v41  ;;  %v4465_v18 = vpack.c.bf16 %v411_v15, %v409_v12  ;;  %v408_v19 = vld [vmem:[#allocation8 + $0xe0] sm:$0xff]  ;;  %v410_v20 = vld [vmem:[#allocation8 + $0xf0] sm:$0xff]  ;;  %v413_v22 = vld [vmem:[#allocation8 + $0x108] sm:$0xff] }
  0xde   :  { %v6360_v21 = vld [vmem:[#allocation3 + $0x20] sm:$0xff]  ;;  %v415_v23 = vld [vmem:[#allocation8 + $0x118] sm:$0xff]  ;;  %v6364_v25 = vld [vmem:[#allocation3 + $0x28] sm:$0xff] }
  0xdf   :  { %v4469_v26 = vpack.c.bf16 %v415_v23, %v413_v22  ;;  %v412_v27 = vld [vmem:[#allocation8 + $0x100] sm:$0xff]  ;;  %v414_v28 = vld [vmem:[#allocation8 + $0x110] sm:$0xff]  ;;  %v417_v32 = vld [vmem:[#allocation8 + $0x128] sm:$0xff] }
  0xe0   :  { %4424 = vmatpush3.bf16.msra.mxu0 %v4421_v24  ;;  %4452 = vmatpush1.bf16.msra.mxu1 %v4451_v49  ;;  %v4467_v24 = vpack.c.bf16 %v410_v20, %v408_v19  ;;  %v6366_v31 = vld [vmem:[#allocation3 + $0x30] sm:$0xff]  ;;  %v419_v33 = vld [vmem:[#allocation8 + $0x138] sm:$0xff]  ;;  %v4471_v34 = vpack.c.bf16 %v414_v28, %v412_v27  ;;  %v416_v37 = vld [vmem:[#allocation8 + $0x120] sm:$0xff] }
  0xe1   :  { %4426 = vmatprep.subr.bf16.mxu0 %v4425_v35  ;;  %4454 = vmatprep.subr.bf16.mxu1 %v4453_v50  ;;  %v4473_v36 = vpack.c.bf16 %v419_v33, %v417_v32  ;;  %v418_v40 = vld [vmem:[#allocation8 + $0x130] sm:$0xff]  ;;  %v6372_v41 = vld [vmem:[#allocation3 + $0x40] sm:$0xff]  ;;  %v421_v42 = vld [vmem:[#allocation8 + $0x148] sm:$0xff] }
  0xe2   :  { %v423_v43 = vld [vmem:[#allocation8 + $0x158] sm:$0xff]  ;;  %v6376_v45 = vld [vmem:[#allocation3 + $0x48] sm:$0xff]  ;;  %v420_v49 = vld [vmem:[#allocation8 + $0x140] sm:$0xff] }
  0xe3   :  { %v4477_v46 = vpack.c.bf16 %v423_v43, %v421_v42  ;;  %v422_v50 = vld [vmem:[#allocation8 + $0x150] sm:$0xff]  ;;  %v425_v52 = vld [vmem:[#allocation8 + $0x168] sm:$0xff]  ;;  %v6382_v55 = vld [vmem:[#allocation3 + $0x58] sm:$0xff] }
  0xe4   :  { %4428 = vmatpush3.bf16.msra.mxu0 %v4425_v35  ;;  %4456 = vmatpush1.bf16.msra.mxu1 %v4455_v56  ;;  %v6370_v35 = vld [vmem:[#allocation3 + $0x38] sm:$0xff]  ;;  %v6378_v51 = vld [vmem:[#allocation3 + $0x50] sm:$0xff]  ;;  %v4479_v54 = vpack.c.bf16 %v422_v50, %v420_v49  ;;  %v6384_v59 = vld [vmem:[#allocation3 + $0x60] sm:$0xff] }
  0xe5   :  { %4430 = vmatprep.subr.bf16.mxu0 %v4429_v44  ;;  %4458 = vmatprep.subr.bf16.mxu1 %v4457_v57  ;;  %v424_v57 = vld [vmem:[#allocation8 + $0x160] sm:$0xff]  ;;  %v426_v58 = vld [vmem:[#allocation8 + $0x170] sm:$0xff]  ;;  %v429_v60 = vld [vmem:[#allocation8 + $0x188] sm:$0xff] }
  0xe6   :  { %v431_v61 = vld [vmem:[#allocation8 + $0x198] sm:$0xff]  ;;  %v428_v5 = vld [vmem:[#allocation8 + $0x180] sm:$0xff]  ;;  %v430_v12 = vld [vmem:[#allocation8 + $0x190] sm:$0xff] }
  0xe7   :  { %v4485_v3 = vpack.c.bf16 %v431_v61, %v429_v60  ;;  %v6390_v15 = vld [vmem:[#allocation3 + $0x70] sm:$0xff]  ;;  %v4487_v19 = vpack.c.bf16 %v430_v12, %v428_v5  ;;  %v6394_v20 = vld [vmem:[#allocation3 + $0x78] sm:$0xff]  ;;  %v432_v23 = vld [vmem:[#allocation8 + $0x1a0] sm:$0xff] }
  0xe8   :  { %4432 = vmatpush3.bf16.msra.mxu0 %v4429_v44  ;;  %4460 = vmatpush1.bf16.msra.mxu1 %v4459_v62  ;;  %v4475_v44 = vpack.c.bf16 %v418_v40, %v416_v37  ;;  %v4483_v62 = vpack.c.bf16 %v426_v58, %v424_v57  ;;  %v439_v27 = vld [vmem:[#allocation8 + $0x1d8] sm:$0xff]  ;;  %v436_v33 = vld [vmem:[#allocation8 + $0x1c0] sm:$0xff] }
  0xe9   :  { %4434 = vmatprep.subr.bf16.mxu0 %v4433_v53  ;;  %4462 = vmatprep.subr.bf16.mxu1 %v4461_v0  ;;  %v6388_v0 = vld [vmem:[#allocation3 + $0x68] sm:$0xff]  ;;  %v443_v37 = vld [vmem:[#allocation8 + $0x1f8] sm:$0xff]  ;;  %v440_v43 = vld [vmem:[#allocation8 + $0x1e0] sm:$0xff] }
  0xec   :  { %4436 = vmatpush3.bf16.msra.mxu0 %v4433_v53  ;;  %4464 = vmatpush1.bf16.msra.mxu1 %v4463_v16  ;;  %v427_v53 = vld [vmem:[#allocation8 + $0x178] sm:$0xff]  ;;  %v433_v16 = vld [vmem:[#allocation8 + $0x1a8] sm:$0xff] }
  0xed   :  { %4466 = vmatprep.subr.bf16.mxu1 %v4465_v18  ;;  %v4481_v56 = vpack.c.bf16 %v427_v53, %v425_v52  ;;  %v435_v18 = vld [vmem:[#allocation8 + $0x1b8] sm:$0xff] }
  0xee   :  { %v4489_v22 = vpack.c.bf16 %v435_v18, %v433_v16 }
  0xef   :  { %4382 = vmatmul.mubr.f32.vlgmr.msra.gmra.mrb[0].mxu0 %v6352_v63 }
  0xf0   :  { %4384 = vmatprep.mubr.f32.mxu0 %v6354_v8  ;;  %4468 = vmatpush1.bf16.msra.mxu1 %v4467_v24  ;;  %v434_v24 = vld [vmem:[#allocation8 + $0x1b0] sm:$0xff] }
  0xf1   :  { %4470 = vmatprep.subr.bf16.mxu1 %v4469_v26  ;;  %v437_v26 = vld [vmem:[#allocation8 + $0x1c8] sm:$0xff]  ;;  %v4491_v28 = vpack.c.bf16 %v434_v24, %v432_v23 }
  0xf2   :  { %v4493_v32 = vpack.c.bf16 %v439_v27, %v437_v26 }
  0xf3   :  { %4385 = vmatmul.mubr.f32.gmra.mrb[2].mxu0 %v6358_v17 }
  0xf4   :  { %4387 = vmatprep.mubr.f32.mxu0 %v6360_v21  ;;  %4472 = vmatpush1.bf16.msra.mxu1 %v4471_v34  ;;  %v438_v34 = vld [vmem:[#allocation8 + $0x1d0] sm:$0xff] }
  0xf5   :  { %4474 = vmatprep.subr.bf16.mxu1 %v4473_v36  ;;  %v441_v36 = vld [vmem:[#allocation8 + $0x1e8] sm:$0xff]  ;;  %v4495_v40 = vpack.c.bf16 %v438_v34, %v436_v33 }
  0xf6   :  { %v4497_v42 = vpack.c.bf16 %v443_v37, %v441_v36 }
  0xf7   :  { %4388 = vmatmul.mubr.f32.gmra.mrb[4].mxu0 %v6364_v25 }
  0xf8   :  { %4390 = vmatprep.mubr.f32.mxu0 %v6366_v31  ;;  %4476 = vmatpush1.bf16.msra.mxu1 %v4475_v44  ;;  %v442_v44 = vld [vmem:[#allocation8 + $0x1f0] sm:$0xff] }
  0xf9   :  { %4478 = vmatprep.subr.bf16.mxu1 %v4477_v46  ;;  %v4499_v46 = vpack.c.bf16 %v442_v44, %v440_v43 }
  0xfb   :  { %4391 = vmatmul.mubr.f32.gmra.mrb[6].mxu0 %v6370_v35 }
  0xfc   :  { %4393 = vmatprep.mubr.f32.mxu0 %v6372_v41  ;;  %4480 = vmatpush1.bf16.msra.mxu1 %v4479_v54 }
  0xfd   :  { %4482 = vmatprep.subr.bf16.mxu1 %v4481_v56 }
  0xff   :  { %4394 = vmatmul.mubr.f32.gmra.mrb[8].mxu0 %v6376_v45 }
 0x100   :  { %4396 = vmatprep.mubr.f32.mxu0 %v6378_v51  ;;  %4484 = vmatpush1.bf16.msra.mxu1 %v4483_v62 }
 0x101   :  { %4486 = vmatprep.subr.bf16.mxu1 %v4485_v3 }
 0x103   :  { %4397 = vmatmul.mubr.f32.gmra.mrb[10].mxu0 %v6382_v55 }
 0x104   :  { %4399 = vmatprep.mubr.f32.mxu0 %v6384_v59  ;;  %4488 = vmatpush1.bf16.msra.mxu1 %v4487_v19 }
 0x105   :  { %4490 = vmatprep.subr.bf16.mxu1 %v4489_v22 }
 0x107   :  { %4400 = vmatmul.mubr.f32.gmra.mrb[12].mxu0 %v6388_v0 }
 0x108   :  { %4402 = vmatprep.mubr.f32.mxu0 %v6390_v15  ;;  %4492 = vmatpush1.bf16.msra.mxu1 %v4491_v28 }
 0x109   :  { %4494 = vmatprep.subr.bf16.mxu1 %v4493_v32 }
 0x10b   :  { %4403 = vmatmul.mubr.f32.gmra.mrb[14].mxu0 %v6394_v20 }
 0x10c   :  { %4496 = vmatpush1.bf16.msra.mxu1 %v4495_v40 }
 0x10d   :  { %4498 = vmatprep.subr.bf16.mxu1 %v4497_v42 }
 0x110   :  { %4500 = vmatpush1.bf16.msra.mxu1 %v4499_v46 }
 0x1c2   :  { %v4383_v49 = vpop.f32.mrb[0].mxu0 }
 0x1c3   :  { %v301_v50 = vpop.f32.mrb[1].mxu0 }
 0x1c4   :  { %521 = vmatmul.mubr.f32.vlgmr.msra.gmra.mrb[0].mxu1 %v301_v50 }
 0x1c5   :  { %526 = vmatprep.mubr.f32.mxu1 %v6304_v1 }
 0x1c6   :  { %v4386_v52 = vpop.f32.mrb[2].mxu0 }
 0x1c7   :  { %v311_v53 = vpop.f32.mrb[3].mxu0 }
 0x1c8   :  { %527 = vmatmul.mubr.f32.gmra.mrb[2].mxu1 %v4383_v49 }
 0x1c9   :  { %532 = vmatprep.mubr.f32.mxu1 %v6306_v2 }
 0x1ca   :  { %v4389_v54 = vpop.f32.mrb[4].mxu0 }
 0x1cb   :  { %v321_v56 = vpop.f32.mrb[5].mxu0 }
 0x1cc   :  { %533 = vmatmul.mubr.f32.gmra.mrb[4].mxu1 %v311_v53 }
 0x1cd   :  { %538 = vmatprep.mubr.f32.mxu1 %v6309_v4 }
 0x1ce   :  { %v4392_v57 = vpop.f32.mrb[6].mxu0 }
 0x1cf   :  { %v331_v58 = vpop.f32.mrb[7].mxu0 }
 0x1d0   :  { %539 = vmatmul.mubr.f32.gmra.mrb[6].mxu1 %v4386_v52 }
 0x1d1   :  { %544 = vmatprep.mubr.f32.mxu1 %v6313_v6  ;;  %v7525_v6 = vmov 0.0  }
 0x1d2   :  { %v4395_v60 = vpop.f32.mrb[8].mxu0  ;;  %713 = vmatprep.mubr.f32.mxu0 %v7525_v6 }
 0x1d3   :  { %v341_v61 = vpop.f32.mrb[9].mxu0 }
 0x1d4   :  { %545 = vmatmul.mubr.f32.gmra.mrb[8].mxu1 %v321_v56 }
 0x1d5   :  { %550 = vmatprep.mubr.f32.mxu1 %v6315_v7  ;;  %v446_v7 = vlaneseq }
 0x1d6   :  { %v4398_v1 = vpop.f32.mrb[10].mxu0 }
 0x1d7   :  { %v351_v62 = vpop.f32.mrb[11].mxu0 }
 0x1d8   :  { %551 = vmatmul.mubr.f32.gmra.mrb[10].mxu1 %v4389_v54 }
 0x1d9   :  { %556 = vmatprep.mubr.f32.mxu1 %v6321_v10  ;;  %v447_v10 = vshrl.u32 %v446_v7, 7 }
 0x1da   :  { %v4401_v2 = vpop.f32.mrb[12].mxu0 }
 0x1db   :  { %v361_v3 = vpop.f32.mrb[13].mxu0 }
 0x1dc   :  { %557 = vmatmul.mubr.f32.gmra.mrb[12].mxu1 %v331_v58 }
 0x1dd   :  { %562 = vmatprep.mubr.f32.mxu1 %v6323_v11  ;;  %v6413_v11 = vsub.s32 1, %v447_v10 }
 0x1de   :  { %v4404_v4 = vpop.f32.mrb[14].mxu0 }
 0x1df   :  { %v371_v5 = vpop.f32.mrb[15].mxu0  ;;  %7632 = vst [vmem:[#allocation28_spill] sm:$0xff] %v6413_v11 }
 0x1e0   :  { %563 = vmatmul.mubr.f32.gmra.mrb[14].mxu1 %v4392_v57 }
 0x1e1   :  { %568 = vmatprep.mubr.f32.mxu1 %v6328_v13  ;;  %v444_v13 = vld [vmem:[%s7488_s5] sm:$0x3] }
 0x1e4   :  { %569 = vmatmul.mubr.f32.gmra.mrb[16].mxu1 %v341_v61 }
 0x1e5   :  { %574 = vmatprep.mubr.f32.mxu1 %v6330_v14  ;;  %v6418_v14 = vsub.s32 0, %v447_v10 }
 0x1e7   :  { %7633 = vst [vmem:[#allocation29_spill] sm:$0xff] %v6418_v14 }
 0x1e8   :  { %575 = vmatmul.mubr.f32.gmra.mrb[18].mxu1 %v4395_v60 }
 0x1e9   :  { %580 = vmatprep.mubr.f32.mxu1 %v6334_v29 }
 0x1ec   :  { %581 = vmatmul.mubr.f32.gmra.mrb[20].mxu1 %v351_v62 }
 0x1ed   :  { %586 = vmatprep.mubr.f32.mxu1 %v6336_v30  ;;  %v6421_v30 = vrot.slane %v444_v13, %v6413_v11 }
 0x1f0   :  { %587 = vmatmul.mubr.f32.gmra.mrb[22].mxu1 %v4398_v1 }
 0x1f1   :  { %592 = vmatprep.mubr.f32.mxu1 %v6340_v38  ;;  %v6424_v38 = vrot.slane %v444_v13, %v6418_v14 }
 0x1f4   :  { %593 = vmatmul.mubr.f32.gmra.mrb[24].mxu1 %v361_v3 }
 0x1f5   :  { %598 = vmatprep.mubr.f32.mxu1 %v6342_v39 }
 0x1f8   :  { %599 = vmatmul.mubr.f32.gmra.mrb[26].mxu1 %v4401_v2 }
 0x1f9   :  { %604 = vmatprep.mubr.f32.mxu1 %v6346_v47 }
 0x1fc   :  { %605 = vmatmul.mubr.f32.gmra.mrb[28].mxu1 %v371_v5 }
 0x1fd   :  { %610 = vmatprep.mubr.f32.mxu1 %v6348_v48 }
 0x200   :  { %611 = vmatmul.mubr.f32.gmra.mrb[30].mxu1 %v4404_v4 }
 0x297   :  { %v522_v29 = vpop.f32.mrb[0].mxu1 }
 0x298   :  { %v524_v39 = vpop.f32.mrb[1].mxu1  ;;  %v6430_v12 = vadd.f32 %v522_v29, %v6424_v38 }
 0x299   :  { %v6427_v47 = vadd.f32 %v524_v39, %v6421_v30 }
 0x29a   :  { %v7523_v27 = vmax.f32 %v6430_v12, 0.0 }
 0x29b   :  { %v528_v48 = vpop.f32.mrb[2].mxu1  ;;  %v7524_v23 = vmax.f32 %v6427_v47, 0.0 }
 0x29c   :  { %v6433_v16 = vadd.f32 %v528_v48, %v6424_v38  ;;  %v530_v18 = vpop.f32.mrb[3].mxu1 }
 0x29d   :  { %v6436_v19 = vadd.f32 %v530_v18, %v6421_v30 }
 0x29e   :  { %v7521_v22 = vmax.f32 %v6433_v16, 0.0 }
 0x29f   :  { %v7522_v24 = vmax.f32 %v6436_v19, 0.0  ;;  %v534_v26 = vpop.f32.mrb[4].mxu1 }
 0x2a0   :  { %v536_v28 = vpop.f32.mrb[5].mxu1  ;;  %v6452_v33 = vpack.c.bf16 %v7521_v22, %v7523_v27  ;;  %v6459_v37 = vadd.f32 %v534_v26, %v6424_v38  ;;  %v1079_v27 = vld [vmem:[#allocation9 + $0x30] sm:$0xff] }
 0x2a1   :  { %v6446_v32 = vpack.c.bf16 %v7522_v24, %v7524_v23  ;;  %v6455_v34 = vadd.f32 %v536_v28, %v6421_v30  ;;  %v1077_v24 = vld [vmem:[#allocation9 + $0x20] sm:$0xff]  ;;  %v1082_v23 = vld [vmem:[#allocation9 + $0x48] sm:$0xff] }
 0x2a2   :  { %v7519_v52 = vmax.f32 %v6459_v37, 0.0 }
 0x2a3   :  { %v540_v36 = vpop.f32.mrb[6].mxu1  ;;  %4502 = vmatprep.subr.bf16.mxu0 %v6446_v32  ;;  %v7520_v46 = vmax.f32 %v6455_v34, 0.0 }
 0x2a4   :  { %v6462_v40 = vadd.f32 %v540_v36, %v6424_v38  ;;  %v542_v42 = vpop.f32.mrb[7].mxu1  ;;  %4504 = vmatpush1.bf16.msra.mxu0 %v6452_v33 }
 0x2a5   :  { %v6466_v43 = vadd.f32 %v542_v42, %v6421_v30 }
 0x2a6   :  { %v7513_v44 = vmax.f32 %v6462_v40, 0.0 }
 0x2a7   :  { %v7518_v49 = vmax.f32 %v6466_v43, 0.0  ;;  %v546_v50 = vpop.f32.mrb[8].mxu1 }
 0x2a8   :  { %v548_v53 = vpop.f32.mrb[9].mxu1  ;;  %v6482_v56 = vpack.c.bf16 %v7513_v44, %v7519_v52  ;;  %v6489_v60 = vadd.f32 %v546_v50, %v6424_v38 }
 0x2a9   :  { %v6476_v54 = vpack.c.bf16 %v7518_v49, %v7520_v46  ;;  %v6485_v57 = vadd.f32 %v548_v53, %v6421_v30  ;;  %v1078_v49 = vld [vmem:[#allocation9 + $0x28] sm:$0xff] }
 0x2aa   :  { %v7511_v7 = vmax.f32 %v6489_v60, 0.0 }
 0x2ab   :  { %v552_v58 = vpop.f32.mrb[10].mxu1  ;;  %4506 = vmatprep.subr.bf16.mxu0 %v6476_v54  ;;  %v7512_v3 = vmax.f32 %v6485_v57, 0.0 }
 0x2ac   :  { %v6492_v61 = vadd.f32 %v552_v58, %v6424_v38  ;;  %v554_v1 = vpop.f32.mrb[11].mxu1  ;;  %4508 = vmatpush1.bf16.msra.mxu0 %v6482_v56 }
 0x2ad   :  { %v6496_v62 = vadd.f32 %v554_v1, %v6421_v30 }
 0x2ae   :  { %7634 = vst [vmem:[#allocation30_spill] sm:$0xff] %v6492_v61  ;;  %v7509_v2 = vmax.f32 %v6492_v61, 0.0 }
 0x2af   :  { %v7510_v4 = vmax.f32 %v6496_v62, 0.0  ;;  %v558_v5 = vpop.f32.mrb[12].mxu1 }
 0x2b0   :  { %v560_v10 = vpop.f32.mrb[13].mxu1  ;;  %v6512_v29 = vpack.c.bf16 %v7509_v2, %v7511_v7  ;;  %v6519_v18 = vadd.f32 %v558_v5, %v6424_v38  ;;  %v1076_v7 = vld [vmem:[#allocation9 + $0x18] sm:$0xff] }
 0x2b1   :  { %v6506_v13 = vpack.c.bf16 %v7510_v4, %v7512_v3  ;;  %v6515_v39 = vadd.f32 %v560_v10, %v6421_v30  ;;  %v1074_v4 = vld [vmem:[#allocation9 + $0x8] sm:$0xff]  ;;  %v1073_v3 = vld [vmem:[#allocation9] sm:$0xff] }
 0x2b2   :  { %7636 = vst [vmem:[#allocation32_spill] sm:$0xff] %v6519_v18  ;;  %v7517_v1 = vmax.f32 %v6519_v18, 0.0  ;;  %v1099_v18 = vld [vmem:[#allocation9 + $0xd0] sm:$0xff] }
 0x2b3   :  { %7635 = vst [vmem:[#allocation31_spill] sm:$0xff] %v6515_v39  ;;  %v564_v48 = vpop.f32.mrb[14].mxu1  ;;  %4510 = vmatprep.subr.bf16.mxu0 %v6506_v13  ;;  %v7515_v50 = vmax.f32 %v6515_v39, 0.0  ;;  %v1104_v39 = vld [vmem:[#allocation9 + $0xf8] sm:$0xff] }
 0x2b4   :  { %v6522_v26 = vadd.f32 %v564_v48, %v6424_v38  ;;  %v566_v28 = vpop.f32.mrb[15].mxu1  ;;  %4512 = vmatpush1.bf16.msra.mxu0 %v6512_v29 }
 0x2b5   :  { %v6526_v36 = vadd.f32 %v566_v28, %v6421_v30 }
 0x2b6   :  { %7637 = vst [vmem:[#allocation33_spill] sm:$0xff] %v6522_v26  ;;  %v7516_v42 = vmax.f32 %v6522_v26, 0.0  ;;  %v1091_v26 = vld [vmem:[#allocation9 + $0x90] sm:$0xff] }
 0x2b7   :  { %7638 = vst [vmem:[#allocation34_spill] sm:$0xff] %v6526_v36  ;;  %v7514_v53 = vmax.f32 %v6526_v36, 0.0  ;;  %v570_v58 = vpop.f32.mrb[16].mxu1  ;;  %v1096_v36 = vld [vmem:[#allocation9 + $0xb8] sm:$0xff] }
 0x2b8   :  { %v572_v5 = vpop.f32.mrb[17].mxu1  ;;  %v6542_v48 = vpack.c.bf16 %v7516_v42, %v7517_v1  ;;  %v6549_v44 = vadd.f32 %v570_v58, %v6424_v38  ;;  %v4565_v42 = vpack.c.bf16 %v1076_v7, %v1074_v4  ;;  %v1075_v1 = vld [vmem:[#allocation9 + $0x10] sm:$0xff]  ;;  %v4571_v7 = vpack.c.bf16 %v1079_v27, %v1077_v24  ;;  %v1088_v58 = vld [vmem:[#allocation9 + $0x78] sm:$0xff] }
 0x2b9   :  { %v6536_v10 = vpack.c.bf16 %v7514_v53, %v7515_v50  ;;  %v6545_v28 = vadd.f32 %v572_v5, %v6421_v30  ;;  %v1080_v5 = vld [vmem:[#allocation9 + $0x38] sm:$0xff]  ;;  %v4567_v46 = vpack.c.bf16 %v1075_v1, %v1073_v3  ;;  %v1083_v1 = vld [vmem:[#allocation9 + $0x50] sm:$0xff] }
 0x2ba   :  { %7640 = vst [vmem:[#allocation36_spill] sm:$0xff] %v6549_v44  ;;  %v4569_v22 = vpack.c.bf16 %v1080_v5, %v1078_v49  ;;  %4566 = vmatprep.subr.bf16.mxu1 %v4565_v42  ;;  %v7533_v11 = vmax.f32 %v6549_v44, 0.0  ;;  %v1081_v49 = vld [vmem:[#allocation9 + $0x40] sm:$0xff]  ;;  %v1086_v5 = vld [vmem:[#allocation9 + $0x68] sm:$0xff]  ;;  %v1092_v44 = vld [vmem:[#allocation9 + $0x98] sm:$0xff] }
 0x2bb   :  { %7639 = vst [vmem:[#allocation35_spill] sm:$0xff] %v6545_v28  ;;  %v576_v2 = vpop.f32.mrb[18].mxu1  ;;  %4514 = vmatprep.subr.bf16.mxu0 %v6536_v10  ;;  %v7532_v6 = vmax.f32 %v6545_v28, 0.0  ;;  %4568 = vmatpush1.bf16.msra.mxu1 %v4567_v46 }
 0x2bc   :  { %v6552_v53 = vadd.f32 %v576_v2, %v6424_v38  ;;  %v578_v50 = vpop.f32.mrb[19].mxu1  ;;  %4516 = vmatpush1.bf16.msra.mxu0 %v6542_v48  ;;  %v1084_v2 = vld [vmem:[#allocation9 + $0x58] sm:$0xff]  ;;  %4570 = vmatprep.subr.bf16.mxu1 %v4569_v22 }
 0x2bd   :  { %v6556_v52 = vadd.f32 %v578_v50, %v6421_v30  ;;  %v4573_v3 = vpack.c.bf16 %v1084_v2, %v1082_v23  ;;  %v4575_v23 = vpack.c.bf16 %v1083_v1, %v1081_v49 }
 0x2be   :  { %7641 = vst [vmem:[#allocation37_spill] sm:$0xff] %v6552_v53  ;;  %v7643_v46 = vmax.f32 %v6552_v53, 0.0  ;;  %v1087_v53 = vld [vmem:[#allocation9 + $0x70] sm:$0xff] }
 0x2bf   :  { %7642 = vst [vmem:[#allocation38_spill] sm:$0xff] %v6556_v52  ;;  %v7531_v14 = vmax.f32 %v6556_v52, 0.0  ;;  %v582_v4 = vpop.f32.mrb[20].mxu1  ;;  %4572 = vmatpush1.bf16.msra.mxu1 %v4571_v7  ;;  %v1090_v52 = vld [vmem:[#allocation9 + $0x88] sm:$0xff] }
 0x2c0   :  { %v584_v50 = vpop.f32.mrb[21].mxu1  ;;  %v6572_v24 = vpack.c.bf16 %v7643_v46, %v7533_v11  ;;  %v6579_v2 = vadd.f32 %v582_v4, %v6424_v38  ;;  %4574 = vmatprep.subr.bf16.mxu1 %v4573_v3  ;;  %v4577_v46 = vpack.c.bf16 %v1088_v58, %v1086_v5  ;;  %v1085_v11 = vld [vmem:[#allocation9 + $0x60] sm:$0xff]  ;;  %v4581_v58 = vpack.c.bf16 %v1092_v44, %v1090_v52  ;;  %v1094_v7 = vld [vmem:[#allocation9 + $0xa8] sm:$0xff] }
 0x2c1   :  { %v6566_v42 = vpack.c.bf16 %v7531_v14, %v7532_v6  ;;  %v6575_v27 = vadd.f32 %v584_v50, %v6421_v30  ;;  %v1089_v5 = vld [vmem:[#allocation9 + $0x80] sm:$0xff] }
 0x2c2   :  { %7645 = vst [vmem:[#allocation40_spill] sm:$0xff] %v6579_v2  ;;  %v7542_v28 = vmax.f32 %v6579_v2, 0.0  ;;  %v4583_v52 = vpack.c.bf16 %v1091_v26, %v1089_v5  ;;  %v1100_v2 = vld [vmem:[#allocation9 + $0xd8] sm:$0xff]  ;;  %v1102_v26 = vld [vmem:[#allocation9 + $0xe8] sm:$0xff] }
 0x2c3   :  { %7644 = vst [vmem:[#allocation39_spill] sm:$0xff] %v6575_v27  ;;  %v588_v22 = vpop.f32.mrb[22].mxu1  ;;  %4518 = vmatprep.subr.bf16.mxu0 %v6566_v42  ;;  %v7541_v4 = vmax.f32 %v6575_v27, 0.0  ;;  %4576 = vmatpush1.bf16.msra.mxu1 %v4575_v23 }
 0x2c4   :  { %v6582_v14 = vadd.f32 %v588_v22, %v6424_v38  ;;  %v590_v6 = vpop.f32.mrb[23].mxu1  ;;  %4520 = vmatpush1.bf16.msra.mxu0 %v6572_v24  ;;  %v4579_v22 = vpack.c.bf16 %v1087_v53, %v1085_v11  ;;  %4578 = vmatprep.subr.bf16.mxu1 %v4577_v46 }
 0x2c5   :  { %v6586_v50 = vadd.f32 %v590_v6, %v6421_v30 }
 0x2c6   :  { %7646 = vst [vmem:[#allocation41_spill] sm:$0xff] %v6582_v14  ;;  %v7648_v23 = vmax.f32 %v6582_v14, 0.0  ;;  %v1095_v14 = vld [vmem:[#allocation9 + $0xb0] sm:$0xff] }
 0x2c7   :  { %7647 = vst [vmem:[#allocation42_spill] sm:$0xff] %v6586_v50  ;;  %v7540_v49 = vmax.f32 %v6586_v50, 0.0  ;;  %v594_v1 = vpop.f32.mrb[24].mxu1  ;;  %4580 = vmatpush1.bf16.msra.mxu1 %v4579_v22  ;;  %v1098_v50 = vld [vmem:[#allocation9 + $0xc8] sm:$0xff] }
 0x2c8   :  { %v596_v3 = vpop.f32.mrb[25].mxu1  ;;  %v6602_v11 = vpack.c.bf16 %v7648_v23, %v7542_v28  ;;  %v6609_v46 = vadd.f32 %v594_v1, %v6424_v38  ;;  %4582 = vmatprep.subr.bf16.mxu1 %v4581_v58  ;;  %v4585_v23 = vpack.c.bf16 %v1096_v36, %v1094_v7  ;;  %v1093_v28 = vld [vmem:[#allocation9 + $0xa0] sm:$0xff]  ;;  %v4589_v36 = vpack.c.bf16 %v1100_v2, %v1098_v50 }
 0x2c9   :  { %v6596_v6 = vpack.c.bf16 %v7540_v49, %v7541_v4  ;;  %v6605_v53 = vadd.f32 %v596_v3, %v6421_v30  ;;  %v1097_v7 = vld [vmem:[#allocation9 + $0xc0] sm:$0xff] }
 0x2ca   :  { %v641_v27 = vmax.f32 %v6609_v46, 0.0  ;;  %v4591_v2 = vpack.c.bf16 %v1099_v18, %v1097_v7  ;;  %v1123_v7 = vld [vmem:[#allocation9 + $0x190] sm:$0xff]  ;;  %v7694_v46 = vld [vmem:[#allocation28_spill] sm:$0xff] }
 0x2cb   :  { %v600_v44 = vpop.f32.mrb[26].mxu1  ;;  %4522 = vmatprep.subr.bf16.mxu0 %v6596_v6  ;;  %v7551_v1 = vmax.f32 %v6605_v53, 0.0  ;;  %4584 = vmatpush1.bf16.msra.mxu1 %v4583_v52 }
 0x2cc   :  { %v6612_v49 = vadd.f32 %v600_v44, %v6424_v38  ;;  %v602_v4 = vpop.f32.mrb[27].mxu1  ;;  %4524 = vmatpush1.bf16.msra.mxu0 %v6602_v11  ;;  %v4587_v44 = vpack.c.bf16 %v1095_v14, %v1093_v28  ;;  %4586 = vmatprep.subr.bf16.mxu1 %v4585_v23 }
 0x2cd   :  { %v6616_v3 = vadd.f32 %v602_v4, %v6421_v30 }
 0x2ce   :  { %7649 = vst [vmem:[#allocation43_spill] sm:$0xff] %v6612_v49  ;;  %v7650_v61 = vmax.f32 %v6612_v49, 0.0 }
 0x2cf   :  { %v7550_v22 = vmax.f32 %v6616_v3, 0.0  ;;  %v606_v5 = vpop.f32.mrb[28].mxu1  ;;  %4588 = vmatpush1.bf16.msra.mxu1 %v4587_v44 }
 0x2d0   :  { %v608_v58 = vpop.f32.mrb[29].mxu1  ;;  %v4527_v52 = vpack.c.bf16 %v7650_v61, %v641_v27  ;;  %v6634_v50 = vadd.f32 %v606_v5, %v6424_v38  ;;  %4590 = vmatprep.subr.bf16.mxu1 %v4589_v36  ;;  %v1121_v36 = vld [vmem:[#allocation9 + $0x180] sm:$0xff] }
 0x2d1   :  { %v4525_v4 = vpack.c.bf16 %v7550_v22, %v7551_v1  ;;  %v6631_v14 = vadd.f32 %v608_v58, %v6421_v30  ;;  %v4593_v1 = vpack.c.bf16 %v1104_v39, %v1102_v26  ;;  %v218_v39 = vld [vmem:[%s7651_s0] sm:$0xff]  ;;  %v7652_v26 = vmov 0.0  }
 0x2d2   :  { %v645_v18 = vmax.f32 %v6634_v50, 0.0 }
 0x2d3   :  { %v612_v28 = vpop.f32.mrb[30].mxu1  ;;  %4526 = vmatprep.subr.bf16.mxu0 %v4525_v4  ;;  %v646_v58 = vmax.f32 %v6631_v14, 0.0  ;;  %4592 = vmatpush1.bf16.msra.mxu1 %v4591_v2  ;;  %v1125_v2 = vld [vmem:[#allocation9 + $0x1a0] sm:$0xff]  ;;  %v7695_v14 = vld [vmem:[#allocation29_spill] sm:$0xff] }
 0x2d4   :  { %v6637_v23 = vadd.f32 %v612_v28, %v6424_v38  ;;  %v614_v22 = vpop.f32.mrb[31].mxu1  ;;  %4528 = vmatpush1.bf16.msra.mxu0 %v4527_v52  ;;  %4594 = vmatprep.subr.bf16.mxu1 %v4593_v1  ;;  %v1122_v1 = vld [vmem:[#allocation9 + $0x188] sm:$0xff]  ;;  %v4615_v28 = vpack.c.bf16 %v1123_v7, %v1121_v36 }
 0x2d5   :  { %v6640_v49 = vadd.f32 %v614_v22, %v6421_v30  ;;  %v1124_v22 = vld [vmem:[#allocation9 + $0x198] sm:$0xff] }
 0x2d6   :  { %v647_v61 = vmax.f32 %v6637_v23, 0.0  ;;  %v4613_v5 = vpack.c.bf16 %v1124_v22, %v1122_v1  ;;  %v1146_v1 = vld [vmem:[#allocation9 + $0x248] sm:$0xff]  ;;  %v1148_v22 = vld [vmem:[#allocation9 + $0x258] sm:$0xff] }
 0x2d7   :  { %v648_v44 = vmax.f32 %v6640_v49, 0.0  ;;  %v4637_v7 = vpack.c.bf16 %v1148_v22, %v1146_v1  ;;  %v1161_v1 = vld [vmem:[#allocation9 + $0x2c0] sm:$0xff]  ;;  %v1163_v22 = vld [vmem:[#allocation9 + $0x2d0] sm:$0xff] }
 0x2d8   :  { %v4531_v30 = vpack.c.bf16 %v647_v61, %v645_v18 }
 0x2d9   :  { %v4529_v38 = vpack.c.bf16 %v648_v44, %v646_v58 }
 0x2db   :  { %4530 = vmatprep.subr.bf16.mxu0 %v4529_v38 }
 0x2dc   :  { %4532 = vmatpush1.bf16.msra.mxu0 %v4531_v30 }
 0x2dd   :  { %4534 = vmatprep.subr.bf16.mxu0 %v6446_v32 }
 0x2df   :  { %714 = vmatmul.mubr.f32.vlgmr.msra.gmra.mrb[16].mxu0 %v218_v39  ;;  %v1132_v39 = vld [vmem:[#allocation9 + $0x1d8] sm:$0xff] }
 0x2e0   :  { %4536 = vmatpush1.bf16.msra.mxu0 %v6452_v33  ;;  %848 = vmatprep.mubr.f32.mxu0 %v7652_v26  ;;  %v1114_v33 = vld [vmem:[#allocation9 + $0x148] sm:$0xff] }
 0x2e1   :  { %4538 = vmatprep.subr.bf16.mxu0 %v6476_v54  ;;  %v1116_v54 = vld [vmem:[#allocation9 + $0x158] sm:$0xff] }
 0x2e4   :  { %4540 = vmatpush1.bf16.msra.mxu0 %v6482_v56 }
 0x2e5   :  { %4542 = vmatprep.subr.bf16.mxu0 %v6506_v13  ;;  %v1113_v13 = vld [vmem:[#allocation9 + $0x140] sm:$0xff] }
 0x2e8   :  { %4544 = vmatpush1.bf16.msra.mxu0 %v6512_v29  ;;  %v1115_v29 = vld [vmem:[#allocation9 + $0x150] sm:$0xff] }
 0x2e9   :  { %4546 = vmatprep.subr.bf16.mxu0 %v6536_v10  ;;  %v1118_v10 = vld [vmem:[#allocation9 + $0x168] sm:$0xff] }
 0x2ec   :  { %4548 = vmatpush1.bf16.msra.mxu0 %v6542_v48  ;;  %v1120_v48 = vld [vmem:[#allocation9 + $0x178] sm:$0xff] }
 0x2ed   :  { %4550 = vmatprep.subr.bf16.mxu0 %v6566_v42  ;;  %v4607_v42 = vpack.c.bf16 %v1115_v29, %v1113_v13  ;;  %v1142_v13 = vld [vmem:[#allocation9 + $0x228] sm:$0xff]  ;;  %v1144_v29 = vld [vmem:[#allocation9 + $0x238] sm:$0xff] }
 0x2f0   :  { %4552 = vmatpush1.bf16.msra.mxu0 %v6572_v24  ;;  %v4609_v24 = vpack.c.bf16 %v1120_v48, %v1118_v10 }
 0x2f1   :  { %4554 = vmatprep.subr.bf16.mxu0 %v6596_v6  ;;  %v1117_v6 = vld [vmem:[#allocation9 + $0x160] sm:$0xff] }
 0x2f4   :  { %4556 = vmatpush1.bf16.msra.mxu0 %v6602_v11  ;;  %v1119_v11 = vld [vmem:[#allocation9 + $0x170] sm:$0xff] }
 0x2f5   :  { %4558 = vmatprep.subr.bf16.mxu0 %v4525_v4  ;;  %v1126_v4 = vld [vmem:[#allocation9 + $0x1a8] sm:$0xff] }
 0x2f8   :  { %4560 = vmatpush1.bf16.msra.mxu0 %v4527_v52  ;;  %v1128_v52 = vld [vmem:[#allocation9 + $0x1b8] sm:$0xff] }
 0x2f9   :  { %4562 = vmatprep.subr.bf16.mxu0 %v4529_v38  ;;  %v1127_v38 = vld [vmem:[#allocation9 + $0x1b0] sm:$0xff] }
 0x2fc   :  { %4564 = vmatpush1.bf16.msra.mxu0 %v4531_v30  ;;  %v1130_v30 = vld [vmem:[#allocation9 + $0x1c8] sm:$0xff] }
 0x2ff   :  { %849 = vmatmul.mubr.f32.vlgmr.msra.gmra.mrb[18].mxu0 %v6319_v9  ;;  %v1101_v9 = vld [vmem:[#allocation9 + $0xe0] sm:$0xff] }
 0x300   :  { %854 = vmatprep.mubr.f32.mxu0 %v7652_v26 }
 0x303   :  { %855 = vmatmul.mubr.f32.gmra.mrb[20].mxu0 %v6352_v63  ;;  %v1103_v63 = vld [vmem:[#allocation9 + $0xf0] sm:$0xff] }
 0x304   :  { %860 = vmatprep.mubr.f32.mxu0 %v7652_v26 }
 0x307   :  { %861 = vmatmul.mubr.f32.gmra.mrb[22].mxu0 %v6354_v8  ;;  %v4595_v8 = vpack.c.bf16 %v1103_v63, %v1101_v9  ;;  %v4619_v9 = vpack.c.bf16 %v1127_v38, %v1125_v2  ;;  %v4621_v63 = vpack.c.bf16 %v1132_v39, %v1130_v30 }
 0x308   :  { %866 = vmatprep.mubr.f32.mxu0 %v7652_v26 }
 0x309   :  { %4596 = vmatpush1.bf16.msra.mxu1 %v4595_v8  ;;  %v1129_v8 = vld [vmem:[#allocation9 + $0x1c0] sm:$0xff] }
 0x30b   :  { %867 = vmatmul.mubr.f32.gmra.mrb[24].mxu0 %v6358_v17  ;;  %v1106_v17 = vld [vmem:[#allocation9 + $0x108] sm:$0xff] }
 0x30c   :  { %872 = vmatprep.mubr.f32.mxu0 %v7652_v26 }
 0x30f   :  { %873 = vmatmul.mubr.f32.gmra.mrb[26].mxu0 %v6360_v21  ;;  %v1108_v21 = vld [vmem:[#allocation9 + $0x118] sm:$0xff] }
 0x310   :  { %878 = vmatprep.mubr.f32.mxu0 %v7652_v26 }
 0x313   :  { %879 = vmatmul.mubr.f32.gmra.mrb[28].mxu0 %v6364_v25  ;;  %v4597_v25 = vpack.c.bf16 %v1108_v21, %v1106_v17  ;;  %v1131_v17 = vld [vmem:[#allocation9 + $0x1d0] sm:$0xff]  ;;  %v1134_v21 = vld [vmem:[#allocation9 + $0x1e8] sm:$0xff] }
 0x314   :  { %884 = vmatprep.mubr.f32.mxu0 %v7652_v26 }
 0x315   :  { %4598 = vmatprep.subr.bf16.mxu1 %v4597_v25  ;;  %v1136_v25 = vld [vmem:[#allocation9 + $0x1f8] sm:$0xff] }
 0x317   :  { %885 = vmatmul.mubr.f32.gmra.mrb[30].mxu0 %v6366_v31  ;;  %v1105_v31 = vld [vmem:[#allocation9 + $0x100] sm:$0xff] }
 0x318   :  { %890 = vmatprep.mubr.f32.mxu0 %v7652_v26 }
 0x31b   :  { %891 = vmatmul.mubr.f32.gmra.mrb[32].mxu0 %v6370_v35  ;;  %v1107_v35 = vld [vmem:[#allocation9 + $0x110] sm:$0xff] }
 0x31c   :  { %896 = vmatprep.mubr.f32.mxu0 %v7652_v26 }
 0x31f   :  { %897 = vmatmul.mubr.f32.gmra.mrb[34].mxu0 %v6372_v41  ;;  %v1110_v41 = vld [vmem:[#allocation9 + $0x128] sm:$0xff] }
 0x320   :  { %902 = vmatprep.mubr.f32.mxu0 %v7652_v26 }
 0x323   :  { %903 = vmatmul.mubr.f32.gmra.mrb[36].mxu0 %v6376_v45  ;;  %v4599_v45 = vpack.c.bf16 %v1107_v35, %v1105_v31  ;;  %v4623_v31 = vpack.c.bf16 %v1131_v17, %v1129_v8  ;;  %v4625_v35 = vpack.c.bf16 %v1136_v25, %v1134_v21  ;;  %v1154_v8 = vld [vmem:[#allocation9 + $0x288] sm:$0xff]  ;;  %v1156_v17 = vld [vmem:[#allocation9 + $0x298] sm:$0xff] }
 0x324   :  { %908 = vmatprep.mubr.f32.mxu0 %v7652_v26 }
 0x325   :  { %4600 = vmatpush1.bf16.msra.mxu1 %v4599_v45  ;;  %v1135_v45 = vld [vmem:[#allocation9 + $0x1f0] sm:$0xff] }
 0x327   :  { %909 = vmatmul.mubr.f32.gmra.mrb[38].mxu0 %v6378_v51  ;;  %v1112_v51 = vld [vmem:[#allocation9 + $0x138] sm:$0xff] }
 0x328   :  { %914 = vmatprep.mubr.f32.mxu0 %v7652_v26  ;;  %v4601_v32 = vpack.c.bf16 %v1112_v51, %v1110_v41  ;;  %v1133_v41 = vld [vmem:[#allocation9 + $0x1e0] sm:$0xff] }
 0x329   :  { %v4627_v51 = vpack.c.bf16 %v1135_v45, %v1133_v41  ;;  %v1153_v41 = vld [vmem:[#allocation9 + $0x280] sm:$0xff]  ;;  %v1155_v45 = vld [vmem:[#allocation9 + $0x290] sm:$0xff] }
 0x32a   :  { %4602 = vmatprep.subr.bf16.mxu1 %v4601_v32 }
 0x32b   :  { %915 = vmatmul.mubr.f32.gmra.mrb[40].mxu0 %v6382_v55  ;;  %v1109_v55 = vld [vmem:[#allocation9 + $0x120] sm:$0xff] }
 0x32c   :  { %920 = vmatprep.mubr.f32.mxu0 %v7652_v26 }
 0x32f   :  { %921 = vmatmul.mubr.f32.gmra.mrb[42].mxu0 %v6384_v59  ;;  %v1111_v59 = vld [vmem:[#allocation9 + $0x130] sm:$0xff] }
 0x330   :  { %926 = vmatprep.mubr.f32.mxu0 %v7652_v26  ;;  %v4603_v56 = vpack.c.bf16 %v1111_v59, %v1109_v55  ;;  %v1138_v55 = vld [vmem:[#allocation9 + $0x208] sm:$0xff]  ;;  %v1140_v59 = vld [vmem:[#allocation9 + $0x218] sm:$0xff] }
 0x331   :  { %v4629_v32 = vpack.c.bf16 %v1140_v59, %v1138_v55  ;;  %v1160_v55 = vld [vmem:[#allocation9 + $0x2b8] sm:$0xff] }
 0x332   :  { %4604 = vmatpush1.bf16.msra.mxu1 %v4603_v56  ;;  %v1137_v56 = vld [vmem:[#allocation9 + $0x200] sm:$0xff] }
 0x333   :  { %927 = vmatmul.mubr.f32.gmra.mrb[44].mxu0 %v6388_v0  ;;  %v4605_v0 = vpack.c.bf16 %v1116_v54, %v1114_v33 }
 0x334   :  { %932 = vmatprep.mubr.f32.mxu0 %v7652_v26 }
 0x335   :  { %4606 = vmatprep.subr.bf16.mxu1 %v4605_v0  ;;  %v1139_v0 = vld [vmem:[#allocation9 + $0x210] sm:$0xff] }
 0x336   :  { %4608 = vmatpush1.bf16.msra.mxu1 %v4607_v42  ;;  %v4631_v48 = vpack.c.bf16 %v1139_v0, %v1137_v56 }
 0x337   :  { %933 = vmatmul.mubr.f32.gmra.mrb[46].mxu0 %v6390_v15  ;;  %v4611_v15 = vpack.c.bf16 %v1119_v11, %v1117_v6  ;;  %4610 = vmatprep.subr.bf16.mxu1 %v4609_v24  ;;  %v4633_v24 = vpack.c.bf16 %v1144_v29, %v1142_v13  ;;  %v1141_v6 = vld [vmem:[#allocation9 + $0x220] sm:$0xff]  ;;  %v1143_v11 = vld [vmem:[#allocation9 + $0x230] sm:$0xff] }
 0x338   :  { %938 = vmatprep.mubr.f32.mxu0 %v7652_v26  ;;  %v1157_v13 = vld [vmem:[#allocation9 + $0x2a0] sm:$0xff]  ;;  %v1159_v29 = vld [vmem:[#allocation9 + $0x2b0] sm:$0xff] }
 0x33a   :  { %4612 = vmatpush1.bf16.msra.mxu1 %v4611_v15 }
 0x33b   :  { %939 = vmatmul.mubr.f32.gmra.mrb[48].mxu0 %v6394_v20  ;;  %4614 = vmatprep.subr.bf16.mxu1 %v4613_v5  ;;  %v4617_v20 = vpack.c.bf16 %v1128_v52, %v1126_v4  ;;  %v4635_v5 = vpack.c.bf16 %v1143_v11, %v1141_v6  ;;  %v1145_v4 = vld [vmem:[#allocation9 + $0x240] sm:$0xff]  ;;  %v1147_v52 = vld [vmem:[#allocation9 + $0x250] sm:$0xff] }
 0x33c   :  { %1631 = vmatprep.mubr.f32.mxu0 %v7652_v26  ;;  %v4639_v38 = vpack.c.bf16 %v1147_v52, %v1145_v4 }
 0x33e   :  { %4616 = vmatpush1.bf16.msra.mxu1 %v4615_v28  ;;  %v1150_v28 = vld [vmem:[#allocation9 + $0x268] sm:$0xff] }
 0x33f   :  { %4618 = vmatprep.subr.bf16.mxu1 %v4617_v20  ;;  %v1152_v20 = vld [vmem:[#allocation9 + $0x278] sm:$0xff] }
 0x340   :  { %v4641_v39 = vpack.c.bf16 %v1152_v20, %v1150_v28  ;;  %v1165_v28 = vld [vmem:[#allocation9 + $0x2e0] sm:$0xff]  ;;  %v1167_v20 = vld [vmem:[#allocation9 + $0x2f0] sm:$0xff] }
 0x342   :  { %4620 = vmatpush1.bf16.msra.mxu1 %v4619_v9  ;;  %v1149_v9 = vld [vmem:[#allocation9 + $0x260] sm:$0xff] }
 0x343   :  { %4622 = vmatprep.subr.bf16.mxu1 %v4621_v63  ;;  %v1151_v63 = vld [vmem:[#allocation9 + $0x270] sm:$0xff] }
 0x344   :  { %v4643_v25 = vpack.c.bf16 %v1151_v63, %v1149_v9 }
 0x346   :  { %4624 = vmatpush1.bf16.msra.mxu1 %v4623_v31 }
 0x347   :  { %4626 = vmatprep.subr.bf16.mxu1 %v4625_v35  ;;  %v4645_v35 = vpack.c.bf16 %v1156_v17, %v1154_v8  ;;  %v1169_v8 = vld [vmem:[#allocation9 + $0x300] sm:$0xff]  ;;  %v1171_v17 = vld [vmem:[#allocation9 + $0x310] sm:$0xff] }
 0x34a   :  { %4628 = vmatpush1.bf16.msra.mxu1 %v4627_v51  ;;  %v1158_v51 = vld [vmem:[#allocation9 + $0x2a8] sm:$0xff] }
 0x34b   :  { %4630 = vmatprep.subr.bf16.mxu1 %v4629_v32  ;;  %v4647_v32 = vpack.c.bf16 %v1155_v45, %v1153_v41  ;;  %v4649_v0 = vpack.c.bf16 %v1160_v55, %v1158_v51  ;;  %v1173_v51 = vld [vmem:[#allocation9 + $0x320] sm:$0xff]  ;;  %v1175_v55 = vld [vmem:[#allocation9 + $0x330] sm:$0xff] }
 0x3b2   :  { %v6702_v33 = vpop.f32.mrb[16].mxu0 }
 0x3b3   :  { %v6704_v54 = vpop.f32.mrb[17].mxu0 }
 0x3d2   :  { %v850_v10 = vpop.f32.mrb[18].mxu0 }
 0x3d3   :  { %v852_v42 = vpop.f32.mrb[19].mxu0 }
 0x3d4   :  { %1277 = vmatprep.mubr.f32.mxu1 %v852_v42 }
 0x3d5   :  { %1278 = vmatmul.mubr.f32.vlgmr.msra.gmra.mrb[32].mxu1 %v850_v10  ;;  %v1162_v10 = vld [vmem:[#allocation9 + $0x2c8] sm:$0xff] }
 0x3d6   :  { %v856_v15 = vpop.f32.mrb[20].mxu0  ;;  %4632 = vmatpush1.bf16.msra.mxu1 %v4631_v48  ;;  %v1164_v48 = vld [vmem:[#allocation9 + $0x2d8] sm:$0xff] }
 0x3d7   :  { %v858_v36 = vpop.f32.mrb[21].mxu0  ;;  %4634 = vmatprep.subr.bf16.mxu1 %v4633_v24  ;;  %v4651_v24 = vpack.c.bf16 %v1159_v29, %v1157_v13  ;;  %v4653_v11 = vpack.c.bf16 %v1164_v48, %v1162_v10  ;;  %v1177_v10 = vld [vmem:[#allocation9 + $0x340] sm:$0xff]  ;;  %v1179_v48 = vld [vmem:[#allocation9 + $0x350] sm:$0xff] }
 0x3d8   :  { %1283 = vmatprep.mubr.f32.mxu1 %v858_v36 }
 0x3d9   :  { %1284 = vmatmul.mubr.f32.gmra.mrb[34].mxu1 %v856_v15  ;;  %v1166_v15 = vld [vmem:[#allocation9 + $0x2e8] sm:$0xff] }
 0x3da   :  { %v862_v2 = vpop.f32.mrb[22].mxu0  ;;  %4636 = vmatpush1.bf16.msra.mxu1 %v4635_v5  ;;  %v1168_v5 = vld [vmem:[#allocation9 + $0x2f8] sm:$0xff] }
 0x3db   :  { %v864_v30 = vpop.f32.mrb[23].mxu0  ;;  %4638 = vmatprep.subr.bf16.mxu1 %v4637_v7  ;;  %v4655_v7 = vpack.c.bf16 %v1163_v22, %v1161_v1  ;;  %v4657_v52 = vpack.c.bf16 %v1168_v5, %v1166_v15  ;;  %v1181_v15 = vld [vmem:[#allocation9 + $0x360] sm:$0xff]  ;;  %v1183_v5 = vld [vmem:[#allocation9 + $0x370] sm:$0xff] }
 0x3dc   :  { %1289 = vmatprep.mubr.f32.mxu1 %v864_v30 }
 0x3dd   :  { %1290 = vmatmul.mubr.f32.gmra.mrb[36].mxu1 %v862_v2  ;;  %v1170_v2 = vld [vmem:[#allocation9 + $0x308] sm:$0xff] }
 0x3de   :  { %v868_v21 = vpop.f32.mrb[24].mxu0  ;;  %4640 = vmatpush1.bf16.msra.mxu1 %v4639_v38  ;;  %v1172_v38 = vld [vmem:[#allocation9 + $0x318] sm:$0xff] }
 0x3df   :  { %v870_v31 = vpop.f32.mrb[25].mxu0  ;;  %4642 = vmatprep.subr.bf16.mxu1 %v4641_v39  ;;  %v4659_v39 = vpack.c.bf16 %v1167_v20, %v1165_v28  ;;  %v4661_v63 = vpack.c.bf16 %v1172_v38, %v1170_v2  ;;  %v1185_v2 = vld [vmem:[#allocation9 + $0x380] sm:$0xff]  ;;  %v1187_v38 = vld [vmem:[#allocation9 + $0x390] sm:$0xff] }
 0x3e0   :  { %1295 = vmatprep.mubr.f32.mxu1 %v870_v31 }
 0x3e1   :  { %1296 = vmatmul.mubr.f32.gmra.mrb[38].mxu1 %v868_v21  ;;  %v1174_v21 = vld [vmem:[#allocation9 + $0x328] sm:$0xff] }
 0x3e2   :  { %v874_v59 = vpop.f32.mrb[26].mxu0  ;;  %4644 = vmatpush1.bf16.msra.mxu1 %v4643_v25  ;;  %v1176_v25 = vld [vmem:[#allocation9 + $0x338] sm:$0xff] }
 0x3e3   :  { %v876_v56 = vpop.f32.mrb[27].mxu0  ;;  %4646 = vmatprep.subr.bf16.mxu1 %v4645_v35  ;;  %v4663_v35 = vpack.c.bf16 %v1171_v17, %v1169_v8  ;;  %v4665_v45 = vpack.c.bf16 %v1176_v25, %v1174_v21  ;;  %v1189_v21 = vld [vmem:[#allocation9 + $0x3a0] sm:$0xff]  ;;  %v1191_v25 = vld [vmem:[#allocation9 + $0x3b0] sm:$0xff] }
 0x3e4   :  { %1301 = vmatprep.mubr.f32.mxu1 %v876_v56 }
 0x3e5   :  { %1302 = vmatmul.mubr.f32.gmra.mrb[40].mxu1 %v874_v59  ;;  %v1178_v59 = vld [vmem:[#allocation9 + $0x348] sm:$0xff] }
 0x3e6   :  { %v880_v42 = vpop.f32.mrb[28].mxu0  ;;  %4648 = vmatpush1.bf16.msra.mxu1 %v4647_v32  ;;  %v1180_v32 = vld [vmem:[#allocation9 + $0x358] sm:$0xff] }
 0x3e7   :  { %v882_v6 = vpop.f32.mrb[29].mxu0  ;;  %4650 = vmatprep.subr.bf16.mxu1 %v4649_v0  ;;  %v4667_v0 = vpack.c.bf16 %v1175_v55, %v1173_v51  ;;  %v4669_v29 = vpack.c.bf16 %v1180_v32, %v1178_v59  ;;  %v1193_v59 = vld [vmem:[#allocation9 + $0x3c0] sm:$0xff]  ;;  %v1195_v32 = vld [vmem:[#allocation9 + $0x3d0] sm:$0xff] }
 0x3e8   :  { %1307 = vmatprep.mubr.f32.mxu1 %v882_v6 }
 0x3e9   :  { %1308 = vmatmul.mubr.f32.gmra.mrb[42].mxu1 %v880_v42  ;;  %v1182_v42 = vld [vmem:[#allocation9 + $0x368] sm:$0xff] }
 0x3ea   :  { %v886_v36 = vpop.f32.mrb[30].mxu0  ;;  %4652 = vmatpush1.bf16.msra.mxu1 %v4651_v24  ;;  %v1184_v24 = vld [vmem:[#allocation9 + $0x378] sm:$0xff] }
 0x3eb   :  { %v888_v4 = vpop.f32.mrb[31].mxu0  ;;  %4654 = vmatprep.subr.bf16.mxu1 %v4653_v11  ;;  %v4671_v11 = vpack.c.bf16 %v1179_v48, %v1177_v10  ;;  %v4673_v22 = vpack.c.bf16 %v1184_v24, %v1182_v42  ;;  %v1197_v42 = vld [vmem:[#allocation9 + $0x3e0] sm:$0xff]  ;;  %v1199_v24 = vld [vmem:[#allocation9 + $0x3f0] sm:$0xff] }
 0x3ec   :  { %1313 = vmatprep.mubr.f32.mxu1 %v888_v4 }
 0x3ed   :  { %1314 = vmatmul.mubr.f32.gmra.mrb[44].mxu1 %v886_v36  ;;  %v1186_v36 = vld [vmem:[#allocation9 + $0x388] sm:$0xff] }
 0x3ee   :  { %v892_v30 = vpop.f32.mrb[32].mxu0  ;;  %4656 = vmatpush1.bf16.msra.mxu1 %v4655_v7  ;;  %v1188_v7 = vld [vmem:[#allocation9 + $0x398] sm:$0xff] }
 0x3ef   :  { %v894_v9 = vpop.f32.mrb[33].mxu0  ;;  %4658 = vmatprep.subr.bf16.mxu1 %v4657_v52  ;;  %v4675_v52 = vpack.c.bf16 %v1183_v5, %v1181_v15  ;;  %v4677_v20 = vpack.c.bf16 %v1188_v7, %v1186_v36  ;;  %v7654_v15 = vmax.f32 %v6430_v12, 0.0  ;;  %v7655_v5 = vmax.f32 %v6436_v19, 0.0 }
 0x3f0   :  { %1319 = vmatprep.mubr.f32.mxu1 %v894_v9  ;;  %v7656_v36 = vmax.f32 %v6433_v16, 0.0  ;;  %v7657_v7 = vmax.f32 %v6455_v34, 0.0  ;;  %v7661_v12 = vmax.f32 %v6485_v57, 0.0  ;;  %v7662_v19 = vmax.f32 %v6489_v60, 0.0  ;;  %v7664_v34 = vld [vmem:[#allocation30_spill] sm:$0xff]  ;;  %v7672_v57 = vld [vmem:[#allocation33_spill] sm:$0xff] }
 0x3f1   :  { %1320 = vmatmul.mubr.f32.gmra.mrb[46].mxu1 %v892_v30  ;;  %v1190_v30 = vld [vmem:[#allocation9 + $0x3a8] sm:$0xff]  ;;  %v7663_v16 = vmax.f32 %v6496_v62, 0.0  ;;  %v7674_v60 = vld [vmem:[#allocation35_spill] sm:$0xff] }
 0x3f2   :  { %v898_v31 = vpop.f32.mrb[34].mxu0  ;;  %4660 = vmatpush1.bf16.msra.mxu1 %v4659_v39  ;;  %v1192_v39 = vld [vmem:[#allocation9 + $0x3b8] sm:$0xff]  ;;  %v7676_v62 = vld [vmem:[#allocation36_spill] sm:$0xff] }
 0x3f3   :  { %v900_v41 = vpop.f32.mrb[35].mxu0  ;;  %4662 = vmatprep.subr.bf16.mxu1 %v4661_v63  ;;  %v4679_v63 = vpack.c.bf16 %v1187_v38, %v1185_v2  ;;  %v4681_v17 = vpack.c.bf16 %v1192_v39, %v1190_v30  ;;  %v7673_v30 = vmax.f32 %v7672_v57, 0.0  ;;  %v7675_v39 = vmax.f32 %v7674_v60, 0.0 }
 0x3f4   :  { %1325 = vmatprep.mubr.f32.mxu1 %v900_v41 }
 0x3f5   :  { %1326 = vmatmul.mubr.f32.gmra.mrb[48].mxu1 %v898_v31  ;;  %v1194_v31 = vld [vmem:[#allocation9 + $0x3c8] sm:$0xff] }
 0x3f6   :  { %v904_v56 = vpop.f32.mrb[36].mxu0  ;;  %4664 = vmatpush1.bf16.msra.mxu1 %v4663_v35  ;;  %v1196_v35 = vld [vmem:[#allocation9 + $0x3d8] sm:$0xff] }
 0x3f7   :  { %v906_v13 = vpop.f32.mrb[37].mxu0  ;;  %4666 = vmatprep.subr.bf16.mxu1 %v4665_v45  ;;  %v4683_v45 = vpack.c.bf16 %v1191_v25, %v1189_v21  ;;  %v4685_v55 = vpack.c.bf16 %v1196_v35, %v1194_v31  ;;  %v7682_v25 = vld [vmem:[#allocation39_spill] sm:$0xff]  ;;  %v7684_v35 = vld [vmem:[#allocation40_spill] sm:$0xff] }
 0x3f8   :  { %1331 = vmatprep.mubr.f32.mxu1 %v906_v13  ;;  %v7683_v31 = vmax.f32 %v7682_v25, 0.0 }
 0x3f9   :  { %1332 = vmatmul.mubr.f32.gmra.mrb[50].mxu1 %v904_v56  ;;  %v1198_v56 = vld [vmem:[#allocation9 + $0x3e8] sm:$0xff] }
 0x3fa   :  { %v910_v6 = vpop.f32.mrb[38].mxu0  ;;  %4668 = vmatpush1.bf16.msra.mxu1 %v4667_v0  ;;  %v1200_v0 = vld [vmem:[#allocation9 + $0x3f8] sm:$0xff] }
 0x3fb   :  { %v912_v1 = vpop.f32.mrb[39].mxu0  ;;  %4670 = vmatprep.subr.bf16.mxu1 %v4669_v29  ;;  %v4687_v29 = vpack.c.bf16 %v1195_v32, %v1193_v59  ;;  %v4689_v48 = vpack.c.bf16 %v1200_v0, %v1198_v56  ;;  %v7690_v32 = vmax.f32 %v6605_v53, 0.0  ;;  %v7691_v56 = vmax.f32 %v6616_v3, 0.0  ;;  %v7692_v0 = vld [vmem:[#allocation43_spill] sm:$0xff] }
 0x3fc   :  { %1337 = vmatprep.mubr.f32.mxu1 %v912_v1 }
 0x3fd   :  { %1338 = vmatmul.mubr.f32.gmra.mrb[52].mxu1 %v910_v6 }
 0x3fe   :  { %v916_v4 = vpop.f32.mrb[40].mxu0  ;;  %4672 = vmatpush1.bf16.msra.mxu1 %v4671_v11  ;;  %v4691_v11 = vpack.c.bf16 %v1199_v24, %v1197_v42 }
 0x3ff   :  { %v918_v28 = vpop.f32.mrb[41].mxu0  ;;  %4674 = vmatprep.subr.bf16.mxu1 %v4673_v22  ;;  %v7653_v22 = vmax.f32 %v6427_v47, 0.0  ;;  %v7660_v47 = vmax.f32 %v6462_v40, 0.0  ;;  %v7670_v40 = vld [vmem:[#allocation34_spill] sm:$0xff] }
 0x400   :  { %1343 = vmatprep.mubr.f32.mxu1 %v918_v28  ;;  %v7665_v28 = vmax.f32 %v7664_v34, 0.0  ;;  %v7671_v38 = vmax.f32 %v7670_v40, 0.0 }
 0x401   :  { %1344 = vmatmul.mubr.f32.gmra.mrb[54].mxu1 %v916_v4  ;;  %v7658_v4 = vmax.f32 %v6459_v37, 0.0  ;;  %v7666_v37 = vld [vmem:[#allocation31_spill] sm:$0xff] }
 0x402   :  { %v922_v9 = vpop.f32.mrb[42].mxu0  ;;  %4676 = vmatpush1.bf16.msra.mxu1 %v4675_v52  ;;  %v7659_v52 = vmax.f32 %v6466_v43, 0.0  ;;  %v7668_v43 = vld [vmem:[#allocation32_spill] sm:$0xff] }
 0x403   :  { %v924_v8 = vpop.f32.mrb[43].mxu0  ;;  %4678 = vmatprep.subr.bf16.mxu1 %v4677_v20  ;;  %v7667_v20 = vmax.f32 %v7666_v37, 0.0  ;;  %v7669_v2 = vmax.f32 %v7668_v43, 0.0 }
 0x404   :  { %1349 = vmatprep.mubr.f32.mxu1 %v924_v8 }
 0x405   :  { %1350 = vmatmul.mubr.f32.gmra.mrb[56].mxu1 %v922_v9  ;;  %v7677_v9 = vmax.f32 %v7676_v62, 0.0 }
 0x406   :  { %v928_v41 = vpop.f32.mrb[44].mxu0  ;;  %4680 = vmatpush1.bf16.msra.mxu1 %v4679_v63  ;;  %v7678_v63 = vld [vmem:[#allocation38_spill] sm:$0xff] }
 0x407   :  { %v930_v51 = vpop.f32.mrb[45].mxu0  ;;  %4682 = vmatprep.subr.bf16.mxu1 %v4681_v17  ;;  %v7679_v8 = vmax.f32 %v7678_v63, 0.0  ;;  %v7680_v17 = vld [vmem:[#allocation37_spill] sm:$0xff] }
 0x408   :  { %1355 = vmatprep.mubr.f32.mxu1 %v930_v51  ;;  %v7681_v21 = vmax.f32 %v7680_v17, 0.0 }
 0x409   :  { %1356 = vmatmul.mubr.f32.gmra.mrb[58].mxu1 %v928_v41  ;;  %v7685_v41 = vmax.f32 %v7684_v35, 0.0 }
 0x40a   :  { %v934_v13 = vpop.f32.mrb[46].mxu0  ;;  %4684 = vmatpush1.bf16.msra.mxu1 %v4683_v45  ;;  %v7686_v45 = vld [vmem:[#allocation42_spill] sm:$0xff] }
 0x40b   :  { %v936_v10 = vpop.f32.mrb[47].mxu0  ;;  %4686 = vmatprep.subr.bf16.mxu1 %v4685_v55  ;;  %v7687_v51 = vmax.f32 %v7686_v45, 0.0  ;;  %v7688_v55 = vld [vmem:[#allocation41_spill] sm:$0xff] }
 0x40c   :  { %1361 = vmatprep.mubr.f32.mxu1 %v936_v10  ;;  %v7689_v59 = vmax.f32 %v7688_v55, 0.0 }
 0x40d   :  { %1362 = vmatmul.mubr.f32.gmra.mrb[60].mxu1 %v934_v13  ;;  %v7693_v13 = vmax.f32 %v7692_v0, 0.0 }
 0x40e   :  { %v940_v6 = vpop.f32.mrb[48].mxu0  ;;  %4688 = vmatpush1.bf16.msra.mxu1 %v4687_v29 }
 0x40f   :  { %v942_v1 = vpop.f32.mrb[49].mxu0  ;;  %4690 = vmatprep.subr.bf16.mxu1 %v4689_v48 }
 0x410   :  { %1367 = vmatprep.mubr.f32.mxu1 %v942_v1 }
 0x411   :  { %1368 = vmatmul.mubr.f32.gmra.mrb[62].mxu1 %v940_v6 }
 0x412   :  { %4692 = vmatpush1.bf16.msra.mxu1 %v4691_v11  ;;  %1438 = vmatprep.mubr.f32.mxu1 %v7653_v22 }
 0x415   :  { %1439 = vmatmul.mubr.f32.vlgmr.msra.gmra.mrb[32].mxu1 %v7654_v15 }
 0x416   :  { %1444 = vmatprep.mubr.f32.mxu1 %v7655_v5 }
 0x419   :  { %1445 = vmatmul.mubr.f32.gmra.mrb[34].mxu1 %v7656_v36 }
 0x41a   :  { %1450 = vmatprep.mubr.f32.mxu1 %v7657_v7 }
 0x41d   :  { %1451 = vmatmul.mubr.f32.gmra.mrb[36].mxu1 %v7658_v4 }
 0x41e   :  { %1456 = vmatprep.mubr.f32.mxu1 %v7659_v52 }
 0x421   :  { %1457 = vmatmul.mubr.f32.gmra.mrb[38].mxu1 %v7660_v47 }
 0x422   :  { %1462 = vmatprep.mubr.f32.mxu1 %v7661_v12 }
 0x425   :  { %1463 = vmatmul.mubr.f32.gmra.mrb[40].mxu1 %v7662_v19 }
 0x426   :  { %1468 = vmatprep.mubr.f32.mxu1 %v7663_v16 }
 0x429   :  { %1469 = vmatmul.mubr.f32.gmra.mrb[42].mxu1 %v7665_v28 }
 0x42a   :  { %1474 = vmatprep.mubr.f32.mxu1 %v7667_v20 }
 0x42d   :  { %1475 = vmatmul.mubr.f32.gmra.mrb[44].mxu1 %v7669_v2 }
 0x42e   :  { %1480 = vmatprep.mubr.f32.mxu1 %v7671_v38 }
 0x431   :  { %1481 = vmatmul.mubr.f32.gmra.mrb[46].mxu1 %v7673_v30 }
 0x432   :  { %1486 = vmatprep.mubr.f32.mxu1 %v7675_v39 }
 0x435   :  { %1487 = vmatmul.mubr.f32.gmra.mrb[48].mxu1 %v7677_v9 }
 0x436   :  { %1492 = vmatprep.mubr.f32.mxu1 %v7679_v8 }
 0x439   :  { %1493 = vmatmul.mubr.f32.gmra.mrb[50].mxu1 %v7681_v21 }
 0x43a   :  { %1498 = vmatprep.mubr.f32.mxu1 %v7683_v31 }
 0x43d   :  { %1499 = vmatmul.mubr.f32.gmra.mrb[52].mxu1 %v7685_v41 }
 0x43e   :  { %1504 = vmatprep.mubr.f32.mxu1 %v7687_v51 }
 0x441   :  { %1505 = vmatmul.mubr.f32.gmra.mrb[54].mxu1 %v7689_v59 }
 0x442   :  { %1510 = vmatprep.mubr.f32.mxu1 %v7690_v32 }
 0x445   :  { %1511 = vmatmul.mubr.f32.gmra.mrb[56].mxu1 %v641_v27  ;;  %v1201_v27 = vld [vmem:[%s7490_s7] sm:$0x3] }
 0x446   :  { %1516 = vmatprep.mubr.f32.mxu1 %v7691_v56  ;;  %v6775_v3 = vrot.slane %v1201_v27, %v7694_v46 }
 0x449   :  { %1517 = vmatmul.mubr.f32.gmra.mrb[58].mxu1 %v7693_v13 }
 0x44a   :  { %1522 = vmatprep.mubr.f32.mxu1 %v646_v58  ;;  %v6778_v58 = vrot.slane %v1201_v27, %v7695_v14 }
 0x44d   :  { %1523 = vmatmul.mubr.f32.gmra.mrb[60].mxu1 %v645_v18 }
 0x44e   :  { %1528 = vmatprep.mubr.f32.mxu1 %v648_v44 }
 0x451   :  { %1529 = vmatmul.mubr.f32.gmra.mrb[62].mxu1 %v647_v61 }
 0x452   :  { %1909 = vmatprep.mubr.f32.mxu1 %v7652_v26 }
 0x4e8   :  { %v1440_v53 = vpop.f32.mrb[32].mxu1 }
 0x4e9   :  { %v1442_v50 = vpop.f32.mrb[33].mxu1  ;;  %v6784_v23 = vadd.f32 %v1440_v53, %v6778_v58 }
 0x4ea   :  { %v6781_v49 = vadd.f32 %v1442_v50, %v6775_v3 }
 0x4eb   :  { %v1535_v6 = vmax.f32 %v6784_v23, 0.0 }
 0x4ec   :  { %v1446_v44 = vpop.f32.mrb[34].mxu1  ;;  %v1536_v48 = vmax.f32 %v6781_v49, 0.0 }
 0x4ed   :  { %v6787_v61 = vadd.f32 %v1446_v44, %v6778_v58  ;;  %v1448_v18 = vpop.f32.mrb[35].mxu1 }
 0x4ee   :  { %v6790_v29 = vadd.f32 %v1448_v18, %v6775_v3 }
 0x4ef   :  { %v7581_v10 = vmax.f32 %v6787_v61, 0.0 }
 0x4f0   :  { %v7582_v42 = vmax.f32 %v6790_v29, 0.0  ;;  %v1452_v24 = vpop.f32.mrb[36].mxu1 }
 0x4f1   :  { %v1454_v11 = vpop.f32.mrb[37].mxu1  ;;  %v4695_v22 = vpack.c.bf16 %v7581_v10, %v1535_v6  ;;  %v6808_v36 = vadd.f32 %v1452_v24, %v6778_v58  ;;  %v5743_v10 = vld [vmem:[#allocation3 + $0x8] sm:$0xff] }
 0x4f2   :  { %v4693_v1 = vpack.c.bf16 %v7582_v42, %v1536_v48  ;;  %v6805_v15 = vadd.f32 %v1454_v11, %v6775_v3  ;;  %v2149_v42 = vld [vmem:[#allocation11 + $0x78] sm:$0xff] }
 0x4f3   :  { %v7577_v34 = vmax.f32 %v6808_v36, 0.0  ;;  %v7699_v49 = vmax.f32 %v6808_v36, 0.0 }
 0x4f4   :  { %v1458_v5 = vpop.f32.mrb[38].mxu1  ;;  %4694 = vmatprep.subr.bf16.mxu0 %v4693_v1  ;;  %4854 = vmatprep.subr.bf16.mxu1 %v4693_v1  ;;  %v7580_v12 = vmax.f32 %v6805_v15, 0.0 }
 0x4f5   :  { %v6811_v7 = vadd.f32 %v1458_v5, %v6778_v58  ;;  %v1460_v4 = vpop.f32.mrb[39].mxu1  ;;  %4696 = vmatpush1.bf16.msra.mxu0 %v4695_v22  ;;  %4856 = vmatpush1.bf16.msra.mxu1 %v4695_v22 }
 0x4f6   :  { %v6814_v52 = vadd.f32 %v1460_v4, %v6775_v3 }
 0x4f7   :  { %v7573_v47 = vmax.f32 %v6811_v7, 0.0 }
 0x4f8   :  { %v7576_v19 = vmax.f32 %v6814_v52, 0.0  ;;  %v1464_v16 = vpop.f32.mrb[40].mxu1 }
 0x4f9   :  { %v1466_v28 = vpop.f32.mrb[41].mxu1  ;;  %v4699_v20 = vpack.c.bf16 %v7573_v47, %v7577_v34  ;;  %v6832_v40 = vadd.f32 %v1464_v16, %v6778_v58  ;;  %v2141_v47 = vld [vmem:[#allocation11 + $0x38] sm:$0xff]  ;;  %v2140_v34 = vld [vmem:[#allocation11 + $0x30] sm:$0xff] }
 0x4fa   :  { %v4697_v37 = vpack.c.bf16 %v7576_v19, %v7580_v12  ;;  %v6829_v43 = vadd.f32 %v1466_v28, %v6775_v3  ;;  %v5742_v12 = vld [vmem:[#allocation3] sm:$0xff] }
 0x4fb   :  { %v7571_v63 = vmax.f32 %v6832_v40, 0.0 }
 0x4fc   :  { %v1470_v2 = vpop.f32.mrb[42].mxu1  ;;  %4698 = vmatprep.subr.bf16.mxu0 %v4697_v37  ;;  %4858 = vmatprep.subr.bf16.mxu1 %v4697_v37  ;;  %v7572_v39 = vmax.f32 %v6829_v43, 0.0  ;;  %v7702_v23 = vmax.f32 %v6829_v43, 0.0 }
 0x4fd   :  { %v6835_v38 = vadd.f32 %v1470_v2, %v6778_v58  ;;  %v1472_v57 = vpop.f32.mrb[43].mxu1  ;;  %4700 = vmatpush1.bf16.msra.mxu0 %v4699_v20  ;;  %4860 = vmatpush1.bf16.msra.mxu1 %v4699_v20 }
 0x4fe   :  { %v6838_v30 = vadd.f32 %v1472_v57, %v6775_v3 }
 0x4ff   :  { %v7569_v60 = vmax.f32 %v6835_v38, 0.0 }
 0x500   :  { %v7570_v62 = vmax.f32 %v6838_v30, 0.0  ;;  %v1476_v9 = vpop.f32.mrb[44].mxu1 }
 0x501   :  { %v1478_v8 = vpop.f32.mrb[45].mxu1  ;;  %v4703_v21 = vpack.c.bf16 %v7569_v60, %v7571_v63  ;;  %v6856_v35 = vadd.f32 %v1476_v9, %v6778_v58  ;;  %v2136_v60 = vld [vmem:[#allocation11 + $0x10] sm:$0xff]  ;;  %v1646_v63 = vld [vmem:[#allocation14 + $0x238] sm:$0xff] }
 0x502   :  { %v4701_v17 = vpack.c.bf16 %v7570_v62, %v7572_v39  ;;  %v6853_v25 = vadd.f32 %v1478_v8, %v6775_v3  ;;  %v1644_v62 = vld [vmem:[#allocation14 + $0x228] sm:$0xff] }
 0x503   :  { %v7567_v0 = vmax.f32 %v6856_v35, 0.0  ;;  %v2139_v39 = vld [vmem:[#allocation11 + $0x28] sm:$0xff]  ;;  %v7707_v36 = vmax.f32 %v6856_v35, 0.0 }
 0x504   :  { %v1482_v31 = vpop.f32.mrb[46].mxu1  ;;  %4702 = vmatprep.subr.bf16.mxu0 %v4701_v17  ;;  %4862 = vmatprep.subr.bf16.mxu1 %v4701_v17  ;;  %v7568_v59 = vmax.f32 %v6853_v25, 0.0  ;;  %v4889_v19 = vpack.c.bf16 %v2141_v47, %v2139_v39  ;;  %v1647_v39 = vld [vmem:[#allocation14 + $0x240] sm:$0xff] }
 0x505   :  { %v6859_v41 = vadd.f32 %v1482_v31, %v6778_v58  ;;  %v1484_v45 = vpop.f32.mrb[47].mxu1  ;;  %4704 = vmatpush1.bf16.msra.mxu0 %v4703_v21  ;;  %4864 = vmatpush1.bf16.msra.mxu1 %v4703_v21 }
 0x506   :  { %v6862_v51 = vadd.f32 %v1484_v45, %v6775_v3 }
 0x507   :  { %v7565_v55 = vmax.f32 %v6859_v41, 0.0 }
 0x508   :  { %v7566_v32 = vmax.f32 %v6862_v51, 0.0  ;;  %v1488_v56 = vpop.f32.mrb[48].mxu1 }
 0x509   :  { %v1490_v13 = vpop.f32.mrb[49].mxu1  ;;  %v4707_v53 = vpack.c.bf16 %v7565_v55, %v7567_v0  ;;  %v6880_v18 = vadd.f32 %v1488_v56, %v6778_v58  ;;  %v2137_v55 = vld [vmem:[#allocation11 + $0x18] sm:$0xff]  ;;  %v2134_v0 = vld [vmem:[#allocation11] sm:$0xff] }
 0x50a   :  { %v4705_v27 = vpack.c.bf16 %v7566_v32, %v7568_v59  ;;  %v6877_v50 = vadd.f32 %v1490_v13, %v6775_v3 }
 0x50b   :  { %v7559_v28 = vmax.f32 %v6880_v18, 0.0 }
 0x50c   :  { %v1494_v44 = vpop.f32.mrb[50].mxu1  ;;  %4706 = vmatprep.subr.bf16.mxu0 %v4705_v27  ;;  %4866 = vmatprep.subr.bf16.mxu1 %v4705_v27  ;;  %v7560_v5 = vmax.f32 %v6877_v50, 0.0  ;;  %v7710_v43 = vmax.f32 %v6877_v50, 0.0 }
 0x50d   :  { %v6883_v24 = vadd.f32 %v1494_v44, %v6778_v58  ;;  %v1496_v11 = vpop.f32.mrb[51].mxu1  ;;  %4708 = vmatpush1.bf16.msra.mxu0 %v4707_v53  ;;  %4868 = vmatpush1.bf16.msra.mxu1 %v4707_v53 }
 0x50e   :  { %v6886_v1 = vadd.f32 %v1496_v11, %v6775_v3 }
 0x50f   :  { %v7557_v22 = vmax.f32 %v6883_v24, 0.0 }
 0x510   :  { %v7558_v4 = vmax.f32 %v6886_v1, 0.0  ;;  %v1500_v16 = vpop.f32.mrb[52].mxu1 }
 0x511   :  { %v1502_v37 = vpop.f32.mrb[53].mxu1  ;;  %v4711_v2 = vpack.c.bf16 %v7557_v22, %v7559_v28  ;;  %v6904_v8 = vadd.f32 %v1500_v16, %v6778_v58 }
 0x512   :  { %v4709_v20 = vpack.c.bf16 %v7558_v4, %v7560_v5  ;;  %v6901_v57 = vadd.f32 %v1502_v37, %v6775_v3 }
 0x513   :  { %v7555_v53 = vmax.f32 %v6904_v8, 0.0  ;;  %v7715_v35 = vmax.f32 %v6904_v8, 0.0 }
 0x514   :  { %v1506_v9 = vpop.f32.mrb[54].mxu1  ;;  %4710 = vmatprep.subr.bf16.mxu0 %v4709_v20  ;;  %4870 = vmatprep.subr.bf16.mxu1 %v4709_v20  ;;  %v7556_v56 = vmax.f32 %v6901_v57, 0.0 }
 0x515   :  { %v6907_v17 = vadd.f32 %v1506_v9, %v6778_v58  ;;  %v1508_v21 = vpop.f32.mrb[55].mxu1  ;;  %4712 = vmatpush1.bf16.msra.mxu0 %v4711_v2  ;;  %4872 = vmatpush1.bf16.msra.mxu1 %v4711_v2 }
 0x516   :  { %v6910_v31 = vadd.f32 %v1508_v21, %v6775_v3 }
 0x517   :  { %v7554_v45 = vmax.f32 %v6907_v17, 0.0 }
 0x518   :  { %v7553_v13 = vmax.f32 %v6910_v31, 0.0  ;;  %v1512_v27 = vpop.f32.mrb[56].mxu1 }
 0x519   :  { %v1514_v44 = vpop.f32.mrb[57].mxu1  ;;  %v4715_v16 = vpack.c.bf16 %v7554_v45, %v7555_v53  ;;  %v6928_v2 = vadd.f32 %v1512_v27, %v6778_v58 }
 0x51a   :  { %v4713_v11 = vpack.c.bf16 %v7553_v13, %v7556_v56  ;;  %v6925_v37 = vadd.f32 %v1514_v44, %v6775_v3 }
 0x51c   :  { %v1518_v20 = vpop.f32.mrb[58].mxu1  ;;  %4714 = vmatprep.subr.bf16.mxu0 %v4713_v11  ;;  %4874 = vmatprep.subr.bf16.mxu1 %v4713_v11  ;;  %v7562_v44 = vmax.f32 %v6925_v37, 0.0  ;;  %v7564_v11 = vmax.f32 %v6928_v2, 0.0  ;;  %v7718_v50 = vmax.f32 %v6925_v37, 0.0 }
 0x51d   :  { %v6931_v9 = vadd.f32 %v1518_v20, %v6778_v58  ;;  %v1520_v21 = vpop.f32.mrb[59].mxu1  ;;  %4716 = vmatpush1.bf16.msra.mxu0 %v4715_v16  ;;  %4876 = vmatpush1.bf16.msra.mxu1 %v4715_v16 }
 0x51e   :  { %v6934_v13 = vadd.f32 %v1520_v21, %v6775_v3 }
 0x51f   :  { %v7563_v45 = vmax.f32 %v6931_v9, 0.0 }
 0x520   :  { %v7561_v53 = vmax.f32 %v6934_v13, 0.0  ;;  %v1524_v56 = vpop.f32.mrb[60].mxu1 }
 0x521   :  { %v1526_v27 = vpop.f32.mrb[61].mxu1  ;;  %v4719_v16 = vpack.c.bf16 %v7563_v45, %v7564_v11  ;;  %v6952_v4 = vadd.f32 %v1524_v56, %v6778_v58  ;;  %v2135_v11 = vld [vmem:[#allocation11 + $0x8] sm:$0xff] }
 0x522   :  { %v4717_v20 = vpack.c.bf16 %v7561_v53, %v7562_v44  ;;  %v6949_v21 = vadd.f32 %v1526_v27, %v6775_v3  ;;  %v1640_v44 = vld [vmem:[#allocation14 + $0x208] sm:$0xff]  ;;  %v1642_v27 = vld [vmem:[#allocation14 + $0x218] sm:$0xff] }
 0x523   :  { %v7579_v32 = vmax.f32 %v6952_v4, 0.0  ;;  %v7723_v8 = vmax.f32 %v6952_v4, 0.0 }
 0x524   :  { %v1530_v22 = vpop.f32.mrb[62].mxu1  ;;  %4718 = vmatprep.subr.bf16.mxu0 %v4717_v20  ;;  %4878 = vmatprep.subr.bf16.mxu1 %v4717_v20  ;;  %v7575_v20 = vmax.f32 %v6949_v21, 0.0 }
 0x525   :  { %v6955_v28 = vadd.f32 %v1530_v22, %v6778_v58  ;;  %v1532_v5 = vpop.f32.mrb[63].mxu1  ;;  %4720 = vmatpush1.bf16.msra.mxu0 %v4719_v16  ;;  %4880 = vmatpush1.bf16.msra.mxu1 %v4719_v16  ;;  %v4725_v22 = vpack.c.bf16 %v1642_v27, %v1640_v44  ;;  %v4885_v16 = vpack.c.bf16 %v2137_v55, %v2135_v11  ;;  %v1643_v11 = vld [vmem:[#allocation14 + $0x220] sm:$0xff]  ;;  %v1645_v27 = vld [vmem:[#allocation14 + $0x230] sm:$0xff] }
 0x526   :  { %v6958_v53 = vadd.f32 %v1532_v5, %v6775_v3  ;;  %v1639_v3 = vld [vmem:[#allocation14 + $0x200] sm:$0xff]  ;;  %v1641_v5 = vld [vmem:[#allocation14 + $0x210] sm:$0xff]  ;;  %v4887_v44 = vpack.c.bf16 %v2136_v60, %v2134_v0  ;;  %v4729_v55 = vpack.c.bf16 %v1646_v63, %v1644_v62  ;;  %v4731_v60 = vpack.c.bf16 %v1645_v27, %v1643_v11  ;;  %v1656_v11 = vld [vmem:[#allocation14 + $0x288] sm:$0xff] }
 0x527   :  { %v7578_v45 = vmax.f32 %v6955_v28, 0.0  ;;  %v1649_v63 = vld [vmem:[#allocation14 + $0x250] sm:$0xff]  ;;  %v2142_v0 = vld [vmem:[#allocation11 + $0x40] sm:$0xff]  ;;  %v1658_v27 = vld [vmem:[#allocation14 + $0x298] sm:$0xff] }
 0x528   :  { %v7574_v56 = vmax.f32 %v6958_v53, 0.0 }
 0x529   :  { %v4723_v59 = vpack.c.bf16 %v7578_v45, %v7579_v32  ;;  %v1648_v45 = vld [vmem:[#allocation14 + $0x248] sm:$0xff]  ;;  %v1650_v32 = vld [vmem:[#allocation14 + $0x258] sm:$0xff] }
 0x52a   :  { %v4721_v58 = vpack.c.bf16 %v7574_v56, %v7575_v20  ;;  %v4727_v56 = vpack.c.bf16 %v1641_v5, %v1639_v3  ;;  %v2138_v20 = vld [vmem:[#allocation11 + $0x20] sm:$0xff]  ;;  %v2145_v3 = vld [vmem:[#allocation11 + $0x58] sm:$0xff]  ;;  %v4733_v47 = vpack.c.bf16 %v1650_v32, %v1648_v45  ;;  %v2144_v5 = vld [vmem:[#allocation11 + $0x50] sm:$0xff] }
 0x52b   :  { %v4891_v62 = vpack.c.bf16 %v2140_v34, %v2138_v20  ;;  %v4895_v34 = vpack.c.bf16 %v2144_v5, %v2142_v0  ;;  %v1651_v45 = vld [vmem:[#allocation14 + $0x260] sm:$0xff]  ;;  %v1653_v20 = vld [vmem:[#allocation14 + $0x270] sm:$0xff]  ;;  %v1660_v5 = vld [vmem:[#allocation14 + $0x2a8] sm:$0xff] }
 0x52c   :  { %4722 = vmatprep.subr.bf16.mxu0 %v4721_v58  ;;  %4882 = vmatprep.subr.bf16.mxu1 %v4721_v58  ;;  %v5741_v58 = vld [vmem:[%s7651_s0] sm:$0xff] }
 0x52d   :  { %4724 = vmatpush1.bf16.msra.mxu0 %v4723_v59  ;;  %4884 = vmatpush1.bf16.msra.mxu1 %v4723_v59  ;;  %v2143_v59 = vld [vmem:[#allocation11 + $0x48] sm:$0xff]  ;;  %v2150_v0 = vld [vmem:[#allocation11 + $0x80] sm:$0xff] }
 0x52e   :  { %4726 = vmatprep.subr.bf16.mxu0 %v4725_v22  ;;  %4886 = vmatprep.subr.bf16.mxu1 %v4885_v16  ;;  %v4893_v22 = vpack.c.bf16 %v2145_v3, %v2143_v59  ;;  %v1652_v16 = vld [vmem:[#allocation14 + $0x268] sm:$0xff]  ;;  %v5744_v59 = vld [vmem:[#allocation3 + $0x10] sm:$0xff]  ;;  %v2153_v3 = vld [vmem:[#allocation11 + $0x98] sm:$0xff] }
 0x530   :  { %1632 = vmatmul.mubr.f32.vlgmr.msra.gmra.mrb[50].mxu0 %v5741_v58  ;;  %1910 = vmatmul.mubr.f32.vlgmr.msra.gmra.mrb[64].mxu1 %v5742_v12  ;;  %v1654_v58 = vld [vmem:[#allocation14 + $0x278] sm:$0xff]  ;;  %v2147_v12 = vld [vmem:[#allocation11 + $0x68] sm:$0xff] }
 0x531   :  { %1915 = vmatprep.mubr.f32.mxu1 %v7652_v26  ;;  %4728 = vmatpush1.bf16.msra.mxu0 %v4727_v56  ;;  %v4735_v56 = vpack.c.bf16 %v1649_v63, %v1647_v39  ;;  %v4737_v32 = vpack.c.bf16 %v1654_v58, %v1652_v16  ;;  %v1655_v39 = vld [vmem:[#allocation14 + $0x280] sm:$0xff]  ;;  %v1657_v63 = vld [vmem:[#allocation14 + $0x290] sm:$0xff]  ;;  %v1662_v16 = vld [vmem:[#allocation14 + $0x2b8] sm:$0xff] }
 0x532   :  { %4888 = vmatpush1.bf16.msra.mxu1 %v4887_v44  ;;  %4730 = vmatprep.subr.bf16.mxu0 %v4729_v55  ;;  %v2146_v44 = vld [vmem:[#allocation11 + $0x60] sm:$0xff]  ;;  %v2148_v55 = vld [vmem:[#allocation11 + $0x70] sm:$0xff]  ;;  %v5745_v58 = vld [vmem:[#allocation3 + $0x18] sm:$0xff] }
 0x533   :  { %4890 = vmatprep.subr.bf16.mxu1 %v4889_v19  ;;  %v4897_v19 = vpack.c.bf16 %v2149_v42, %v2147_v12  ;;  %v2155_v12 = vld [vmem:[#allocation11 + $0xa8] sm:$0xff] }
 0x534   :  { %1916 = vmatmul.mubr.f32.gmra.mrb[66].mxu1 %v5743_v10  ;;  %v2151_v10 = vld [vmem:[#allocation11 + $0x88] sm:$0xff] }
 0x535   :  { %1921 = vmatprep.mubr.f32.mxu1 %v7652_v26  ;;  %4732 = vmatpush1.bf16.msra.mxu0 %v4731_v60  ;;  %v4739_v60 = vpack.c.bf16 %v1653_v20, %v1651_v45  ;;  %v4901_v42 = vpack.c.bf16 %v2153_v3, %v2151_v10  ;;  %v1659_v45 = vld [vmem:[#allocation14 + $0x2a0] sm:$0xff]  ;;  %v1661_v20 = vld [vmem:[#allocation14 + $0x2b0] sm:$0xff]  ;;  %v2159_v3 = vld [vmem:[#allocation11 + $0xc8] sm:$0xff] }
 0x536   :  { %4892 = vmatpush1.bf16.msra.mxu1 %v4891_v62  ;;  %4734 = vmatprep.subr.bf16.mxu0 %v4733_v47  ;;  %v4899_v62 = vpack.c.bf16 %v2148_v55, %v2146_v44  ;;  %v4741_v47 = vpack.c.bf16 %v1658_v27, %v1656_v11  ;;  %v2154_v44 = vld [vmem:[#allocation11 + $0xa0] sm:$0xff]  ;;  %v2156_v55 = vld [vmem:[#allocation11 + $0xb0] sm:$0xff]  ;;  %v1664_v11 = vld [vmem:[#allocation14 + $0x2c8] sm:$0xff] }
 0x537   :  { %4894 = vmatprep.subr.bf16.mxu1 %v4893_v22  ;;  %v2152_v22 = vld [vmem:[#allocation11 + $0x90] sm:$0xff]  ;;  %v1666_v27 = vld [vmem:[#allocation14 + $0x2d8] sm:$0xff]  ;;  %v5746_v10 = vld [vmem:[#allocation3 + $0x20] sm:$0xff] }
 0x538   :  { %1922 = vmatmul.mubr.f32.gmra.mrb[68].mxu1 %v5744_v59  ;;  %v2157_v59 = vld [vmem:[#allocation11 + $0xb8] sm:$0xff] }
 0x539   :  { %1927 = vmatprep.mubr.f32.mxu1 %v7652_v26  ;;  %4736 = vmatpush1.bf16.msra.mxu0 %v4735_v56  ;;  %v4743_v56 = vpack.c.bf16 %v1657_v63, %v1655_v39  ;;  %v1663_v39 = vld [vmem:[#allocation14 + $0x2c0] sm:$0xff]  ;;  %v1665_v63 = vld [vmem:[#allocation14 + $0x2d0] sm:$0xff] }
 0x53a   :  { %4896 = vmatpush1.bf16.msra.mxu1 %v4895_v34  ;;  %4738 = vmatprep.subr.bf16.mxu0 %v4737_v32  ;;  %v4903_v34 = vpack.c.bf16 %v2152_v22, %v2150_v0  ;;  %v4745_v32 = vpack.c.bf16 %v1662_v16, %v1660_v5  ;;  %v2158_v0 = vld [vmem:[#allocation11 + $0xc0] sm:$0xff]  ;;  %v2160_v22 = vld [vmem:[#allocation11 + $0xd0] sm:$0xff]  ;;  %v1668_v5 = vld [vmem:[#allocation14 + $0x2e8] sm:$0xff] }
 0x53b   :  { %4898 = vmatprep.subr.bf16.mxu1 %v4897_v19  ;;  %v4905_v19 = vpack.c.bf16 %v2157_v59, %v2155_v12  ;;  %v1670_v16 = vld [vmem:[#allocation14 + $0x2f8] sm:$0xff]  ;;  %v5747_v12 = vld [vmem:[#allocation3 + $0x28] sm:$0xff] }
 0x53c   :  { %1928 = vmatmul.mubr.f32.gmra.mrb[70].mxu1 %v5745_v58  ;;  %v2161_v58 = vld [vmem:[#allocation11 + $0xd8] sm:$0xff]  ;;  %v2163_v59 = vld [vmem:[#allocation11 + $0xe8] sm:$0xff] }
 0x53d   :  { %1933 = vmatprep.mubr.f32.mxu1 %v7652_v26  ;;  %4740 = vmatpush1.bf16.msra.mxu0 %v4739_v60  ;;  %v4747_v60 = vpack.c.bf16 %v1661_v20, %v1659_v45  ;;  %v1667_v45 = vld [vmem:[#allocation14 + $0x2e0] sm:$0xff]  ;;  %v1669_v20 = vld [vmem:[#allocation14 + $0x2f0] sm:$0xff] }
 0x53e   :  { %4900 = vmatpush1.bf16.msra.mxu1 %v4899_v62  ;;  %4742 = vmatprep.subr.bf16.mxu0 %v4741_v47  ;;  %v4907_v62 = vpack.c.bf16 %v2156_v55, %v2154_v44  ;;  %v4749_v47 = vpack.c.bf16 %v1666_v27, %v1664_v11  ;;  %v2162_v44 = vld [vmem:[#allocation11 + $0xe0] sm:$0xff]  ;;  %v2164_v55 = vld [vmem:[#allocation11 + $0xf0] sm:$0xff]  ;;  %v1672_v11 = vld [vmem:[#allocation14 + $0x308] sm:$0xff] }
 0x53f   :  { %4902 = vmatprep.subr.bf16.mxu1 %v4901_v42  ;;  %v4909_v42 = vpack.c.bf16 %v2161_v58, %v2159_v3  ;;  %v1674_v27 = vld [vmem:[#allocation14 + $0x318] sm:$0xff]  ;;  %v5748_v3 = vld [vmem:[#allocation3 + $0x30] sm:$0xff]  ;;  %v2167_v58 = vld [vmem:[#allocation11 + $0x108] sm:$0xff] }
 0x540   :  { %1934 = vmatmul.mubr.f32.gmra.mrb[72].mxu1 %v5746_v10  ;;  %v2165_v10 = vld [vmem:[#allocation11 + $0xf8] sm:$0xff] }
 0x541   :  { %1939 = vmatprep.mubr.f32.mxu1 %v7652_v26  ;;  %4744 = vmatpush1.bf16.msra.mxu0 %v4743_v56  ;;  %v4751_v56 = vpack.c.bf16 %v1665_v63, %v1663_v39  ;;  %v1671_v39 = vld [vmem:[#allocation14 + $0x300] sm:$0xff]  ;;  %v1673_v63 = vld [vmem:[#allocation14 + $0x310] sm:$0xff] }
 0x542   :  { %4904 = vmatpush1.bf16.msra.mxu1 %v4903_v34  ;;  %4746 = vmatprep.subr.bf16.mxu0 %v4745_v32  ;;  %v4911_v34 = vpack.c.bf16 %v2160_v22, %v2158_v0  ;;  %v4753_v32 = vpack.c.bf16 %v1670_v16, %v1668_v5  ;;  %v2166_v0 = vld [vmem:[#allocation11 + $0x100] sm:$0xff]  ;;  %v2168_v22 = vld [vmem:[#allocation11 + $0x110] sm:$0xff]  ;;  %v1676_v5 = vld [vmem:[#allocation14 + $0x328] sm:$0xff] }
 0x543   :  { %4906 = vmatprep.subr.bf16.mxu1 %v4905_v19  ;;  %v4913_v19 = vpack.c.bf16 %v2165_v10, %v2163_v59  ;;  %v1678_v16 = vld [vmem:[#allocation14 + $0x338] sm:$0xff]  ;;  %v2171_v10 = vld [vmem:[#allocation11 + $0x128] sm:$0xff] }
 0x544   :  { %1940 = vmatmul.mubr.f32.gmra.mrb[74].mxu1 %v5747_v12  ;;  %v2169_v12 = vld [vmem:[#allocation11 + $0x118] sm:$0xff] }
 0x545   :  { %1945 = vmatprep.mubr.f32.mxu1 %v7652_v26  ;;  %4748 = vmatpush1.bf16.msra.mxu0 %v4747_v60  ;;  %v4755_v60 = vpack.c.bf16 %v1669_v20, %v1667_v45  ;;  %v5749_v59 = vld [vmem:[#allocation3 + $0x38] sm:$0xff]  ;;  %v1675_v45 = vld [vmem:[#allocation14 + $0x320] sm:$0xff]  ;;  %v1677_v20 = vld [vmem:[#allocation14 + $0x330] sm:$0xff] }
 0x546   :  { %4908 = vmatpush1.bf16.msra.mxu1 %v4907_v62  ;;  %4750 = vmatprep.subr.bf16.mxu0 %v4749_v47  ;;  %v4915_v62 = vpack.c.bf16 %v2164_v55, %v2162_v44  ;;  %v4757_v47 = vpack.c.bf16 %v1674_v27, %v1672_v11  ;;  %v2170_v44 = vld [vmem:[#allocation11 + $0x120] sm:$0xff]  ;;  %v2172_v55 = vld [vmem:[#allocation11 + $0x130] sm:$0xff]  ;;  %v1680_v11 = vld [vmem:[#allocation14 + $0x348] sm:$0xff] }
 0x547   :  { %4910 = vmatprep.subr.bf16.mxu1 %v4909_v42  ;;  %v4917_v42 = vpack.c.bf16 %v2169_v12, %v2167_v58  ;;  %v1682_v27 = vld [vmem:[#allocation14 + $0x358] sm:$0xff]  ;;  %v5750_v58 = vld [vmem:[#allocation3 + $0x40] sm:$0xff]  ;;  %v2175_v12 = vld [vmem:[#allocation11 + $0x148] sm:$0xff] }
 0x548   :  { %1946 = vmatmul.mubr.f32.gmra.mrb[76].mxu1 %v5748_v3  ;;  %v2173_v3 = vld [vmem:[#allocation11 + $0x138] sm:$0xff] }
 0x549   :  { %1951 = vmatprep.mubr.f32.mxu1 %v7652_v26  ;;  %4752 = vmatpush1.bf16.msra.mxu0 %v4751_v56  ;;  %v4759_v56 = vpack.c.bf16 %v1673_v63, %v1671_v39  ;;  %v1679_v39 = vld [vmem:[#allocation14 + $0x340] sm:$0xff]  ;;  %v1681_v63 = vld [vmem:[#allocation14 + $0x350] sm:$0xff] }
 0x54a   :  { %4912 = vmatpush1.bf16.msra.mxu1 %v4911_v34  ;;  %4754 = vmatprep.subr.bf16.mxu0 %v4753_v32  ;;  %v4919_v34 = vpack.c.bf16 %v2168_v22, %v2166_v0  ;;  %v4761_v32 = vpack.c.bf16 %v1678_v16, %v1676_v5  ;;  %v2174_v0 = vld [vmem:[#allocation11 + $0x140] sm:$0xff]  ;;  %v2176_v22 = vld [vmem:[#allocation11 + $0x150] sm:$0xff]  ;;  %v1684_v5 = vld [vmem:[#allocation14 + $0x368] sm:$0xff] }
 0x54b   :  { %4914 = vmatprep.subr.bf16.mxu1 %v4913_v19  ;;  %v4921_v19 = vpack.c.bf16 %v2173_v3, %v2171_v10  ;;  %v1686_v16 = vld [vmem:[#allocation14 + $0x378] sm:$0xff]  ;;  %v5751_v10 = vld [vmem:[#allocation3 + $0x48] sm:$0xff] }
 0x54c   :  { %1952 = vmatmul.mubr.f32.gmra.mrb[78].mxu1 %v5749_v59  ;;  %v2177_v59 = vld [vmem:[#allocation11 + $0x158] sm:$0xff]  ;;  %v2179_v3 = vld [vmem:[#allocation11 + $0x168] sm:$0xff] }
 0x54d   :  { %1957 = vmatprep.mubr.f32.mxu1 %v7652_v26  ;;  %4756 = vmatpush1.bf16.msra.mxu0 %v4755_v60  ;;  %v4763_v60 = vpack.c.bf16 %v1677_v20, %v1675_v45  ;;  %v1683_v45 = vld [vmem:[#allocation14 + $0x360] sm:$0xff]  ;;  %v1685_v20 = vld [vmem:[#allocation14 + $0x370] sm:$0xff] }
 0x54e   :  { %4916 = vmatpush1.bf16.msra.mxu1 %v4915_v62  ;;  %4758 = vmatprep.subr.bf16.mxu0 %v4757_v47  ;;  %v4923_v62 = vpack.c.bf16 %v2172_v55, %v2170_v44  ;;  %v4765_v47 = vpack.c.bf16 %v1682_v27, %v1680_v11  ;;  %v2178_v44 = vld [vmem:[#allocation11 + $0x160] sm:$0xff]  ;;  %v2180_v55 = vld [vmem:[#allocation11 + $0x170] sm:$0xff]  ;;  %v1688_v11 = vld [vmem:[#allocation14 + $0x388] sm:$0xff] }
 0x54f   :  { %4918 = vmatprep.subr.bf16.mxu1 %v4917_v42  ;;  %v4925_v42 = vpack.c.bf16 %v2177_v59, %v2175_v12  ;;  %v1690_v27 = vld [vmem:[#allocation14 + $0x398] sm:$0xff]  ;;  %v5752_v12 = vld [vmem:[#allocation3 + $0x50] sm:$0xff]  ;;  %v2183_v59 = vld [vmem:[#allocation11 + $0x188] sm:$0xff] }
 0x550   :  { %1958 = vmatmul.mubr.f32.gmra.mrb[80].mxu1 %v5750_v58  ;;  %v2181_v58 = vld [vmem:[#allocation11 + $0x178] sm:$0xff] }
 0x551   :  { %1963 = vmatprep.mubr.f32.mxu1 %v7652_v26  ;;  %4760 = vmatpush1.bf16.msra.mxu0 %v4759_v56  ;;  %v4767_v56 = vpack.c.bf16 %v1681_v63, %v1679_v39  ;;  %v1687_v39 = vld [vmem:[#allocation14 + $0x380] sm:$0xff]  ;;  %v1689_v63 = vld [vmem:[#allocation14 + $0x390] sm:$0xff] }
 0x552   :  { %4920 = vmatpush1.bf16.msra.mxu1 %v4919_v34  ;;  %4762 = vmatprep.subr.bf16.mxu0 %v4761_v32  ;;  %v4927_v34 = vpack.c.bf16 %v2176_v22, %v2174_v0  ;;  %v4769_v32 = vpack.c.bf16 %v1686_v16, %v1684_v5  ;;  %v2182_v0 = vld [vmem:[#allocation11 + $0x180] sm:$0xff]  ;;  %v2184_v22 = vld [vmem:[#allocation11 + $0x190] sm:$0xff]  ;;  %v1692_v5 = vld [vmem:[#allocation14 + $0x3a8] sm:$0xff] }
 0x553   :  { %4922 = vmatprep.subr.bf16.mxu1 %v4921_v19  ;;  %v4929_v19 = vpack.c.bf16 %v2181_v58, %v2179_v3  ;;  %v1694_v16 = vld [vmem:[#allocation14 + $0x3b8] sm:$0xff]  ;;  %v2187_v58 = vld [vmem:[#allocation11 + $0x1a8] sm:$0xff] }
 0x554   :  { %1964 = vmatmul.mubr.f32.gmra.mrb[82].mxu1 %v5751_v10  ;;  %v2185_v10 = vld [vmem:[#allocation11 + $0x198] sm:$0xff] }
 0x555   :  { %1969 = vmatprep.mubr.f32.mxu1 %v7652_v26  ;;  %4764 = vmatpush1.bf16.msra.mxu0 %v4763_v60  ;;  %v4771_v60 = vpack.c.bf16 %v1685_v20, %v1683_v45  ;;  %v5753_v3 = vld [vmem:[#allocation3 + $0x58] sm:$0xff]  ;;  %v1691_v45 = vld [vmem:[#allocation14 + $0x3a0] sm:$0xff]  ;;  %v1693_v20 = vld [vmem:[#allocation14 + $0x3b0] sm:$0xff] }
 0x556   :  { %4924 = vmatpush1.bf16.msra.mxu1 %v4923_v62  ;;  %4766 = vmatprep.subr.bf16.mxu0 %v4765_v47  ;;  %v4931_v62 = vpack.c.bf16 %v2180_v55, %v2178_v44  ;;  %v4773_v47 = vpack.c.bf16 %v1690_v27, %v1688_v11  ;;  %v2186_v44 = vld [vmem:[#allocation11 + $0x1a0] sm:$0xff]  ;;  %v2188_v55 = vld [vmem:[#allocation11 + $0x1b0] sm:$0xff]  ;;  %v1696_v11 = vld [vmem:[#allocation14 + $0x3c8] sm:$0xff] }
 0x557   :  { %4926 = vmatprep.subr.bf16.mxu1 %v4925_v42  ;;  %v4933_v42 = vpack.c.bf16 %v2185_v10, %v2183_v59  ;;  %v1698_v27 = vld [vmem:[#allocation14 + $0x3d8] sm:$0xff]  ;;  %v5754_v59 = vld [vmem:[#allocation3 + $0x60] sm:$0xff]  ;;  %v2191_v10 = vld [vmem:[#allocation11 + $0x1c8] sm:$0xff] }
 0x558   :  { %1970 = vmatmul.mubr.f32.gmra.mrb[84].mxu1 %v5752_v12  ;;  %v2189_v12 = vld [vmem:[#allocation11 + $0x1b8] sm:$0xff] }
 0x559   :  { %1975 = vmatprep.mubr.f32.mxu1 %v7652_v26  ;;  %4768 = vmatpush1.bf16.msra.mxu0 %v4767_v56  ;;  %v4775_v56 = vpack.c.bf16 %v1689_v63, %v1687_v39  ;;  %v1695_v39 = vld [vmem:[#allocation14 + $0x3c0] sm:$0xff]  ;;  %v1697_v63 = vld [vmem:[#allocation14 + $0x3d0] sm:$0xff] }
 0x55a   :  { %4928 = vmatpush1.bf16.msra.mxu1 %v4927_v34  ;;  %4770 = vmatprep.subr.bf16.mxu0 %v4769_v32  ;;  %v4935_v34 = vpack.c.bf16 %v2184_v22, %v2182_v0  ;;  %v4777_v32 = vpack.c.bf16 %v1694_v16, %v1692_v5  ;;  %v2190_v0 = vld [vmem:[#allocation11 + $0x1c0] sm:$0xff]  ;;  %v2192_v22 = vld [vmem:[#allocation11 + $0x1d0] sm:$0xff]  ;;  %v1700_v5 = vld [vmem:[#allocation14 + $0x3e8] sm:$0xff] }
 0x55b   :  { %4930 = vmatprep.subr.bf16.mxu1 %v4929_v19  ;;  %v4937_v19 = vpack.c.bf16 %v2189_v12, %v2187_v58  ;;  %v1702_v16 = vld [vmem:[#allocation14 + $0x3f8] sm:$0xff]  ;;  %v5755_v58 = vld [vmem:[#allocation3 + $0x68] sm:$0xff] }
 0x55c   :  { %1976 = vmatmul.mubr.f32.gmra.mrb[86].mxu1 %v5753_v3  ;;  %v2193_v3 = vld [vmem:[#allocation11 + $0x1d8] sm:$0xff]  ;;  %v2195_v12 = vld [vmem:[#allocation11 + $0x1e8] sm:$0xff] }
 0x55d   :  { %1981 = vmatprep.mubr.f32.mxu1 %v7652_v26  ;;  %4772 = vmatpush1.bf16.msra.mxu0 %v4771_v60  ;;  %v4779_v60 = vpack.c.bf16 %v1693_v20, %v1691_v45  ;;  %v1699_v45 = vld [vmem:[#allocation14 + $0x3e0] sm:$0xff]  ;;  %v1701_v20 = vld [vmem:[#allocation14 + $0x3f0] sm:$0xff] }
 0x55e   :  { %4932 = vmatpush1.bf16.msra.mxu1 %v4931_v62  ;;  %4774 = vmatprep.subr.bf16.mxu0 %v4773_v47  ;;  %v4939_v62 = vpack.c.bf16 %v2188_v55, %v2186_v44  ;;  %v4781_v47 = vpack.c.bf16 %v1698_v27, %v1696_v11  ;;  %v4787_v55 = vpack.c.bf16 %v1701_v20, %v1699_v45  ;;  %v5757_v11 = vld [vmem:[#allocation3 + $0x78] sm:$0xff]  ;;  %v2194_v27 = vld [vmem:[#allocation11 + $0x1e0] sm:$0xff] }
 0x55f   :  { %4934 = vmatprep.subr.bf16.mxu1 %v4933_v42  ;;  %v4941_v42 = vpack.c.bf16 %v2193_v3, %v2191_v10  ;;  %v2196_v10 = vld [vmem:[#allocation11 + $0x1f0] sm:$0xff] }
 0x560   :  { %1982 = vmatmul.mubr.f32.gmra.mrb[88].mxu1 %v5754_v59  ;;  %v2197_v59 = vld [vmem:[#allocation11 + $0x1f8] sm:$0xff]  ;;  %v4947_v3 = vpack.c.bf16 %v2196_v10, %v2194_v27  ;;  %v726_v27 = vld [vmem:[#allocation14 + $0x30] sm:$0xff]  ;;  %v2202_v10 = vld [vmem:[#allocation11 + $0x220] sm:$0xff] }
 0x561   :  { %1987 = vmatprep.mubr.f32.mxu1 %v7652_v26  ;;  %4776 = vmatpush1.bf16.msra.mxu0 %v4775_v56  ;;  %v4783_v56 = vpack.c.bf16 %v1697_v63, %v1695_v39  ;;  %v4945_v44 = vpack.c.bf16 %v2197_v59, %v2195_v12  ;;  %v2199_v39 = vld [vmem:[#allocation11 + $0x208] sm:$0xff]  ;;  %v2201_v63 = vld [vmem:[#allocation11 + $0x218] sm:$0xff] }
 0x562   :  { %4936 = vmatpush1.bf16.msra.mxu1 %v4935_v34  ;;  %4778 = vmatprep.subr.bf16.mxu0 %v4777_v32  ;;  %v4943_v34 = vpack.c.bf16 %v2192_v22, %v2190_v0  ;;  %v4785_v32 = vpack.c.bf16 %v1702_v16, %v1700_v5  ;;  %v4949_v0 = vpack.c.bf16 %v2201_v63, %v2199_v39  ;;  %v722_v22 = vld [vmem:[#allocation14 + $0x10] sm:$0xff]  ;;  %v2198_v5 = vld [vmem:[#allocation11 + $0x200] sm:$0xff]  ;;  %v727_v12 = vld [vmem:[#allocation14 + $0x38] sm:$0xff] }
 0x563   :  { %4938 = vmatprep.subr.bf16.mxu1 %v4937_v19  ;;  %v5756_v19 = vld [vmem:[#allocation3 + $0x70] sm:$0xff]  ;;  %v2203_v59 = vld [vmem:[#allocation11 + $0x228] sm:$0xff]  ;;  %v2209_v63 = vld [vmem:[#allocation11 + $0x258] sm:$0xff] }
 0x564   :  { %1988 = vmatmul.mubr.f32.gmra.mrb[90].mxu1 %v5755_v58  ;;  %v2200_v16 = vld [vmem:[#allocation11 + $0x210] sm:$0xff]  ;;  %v725_v58 = vld [vmem:[#allocation14 + $0x28] sm:$0xff] }
 0x565   :  { %1993 = vmatprep.mubr.f32.mxu1 %v7652_v26  ;;  %4780 = vmatpush1.bf16.msra.mxu0 %v4779_v60  ;;  %v721_v60 = vld [vmem:[#allocation14 + $0x8] sm:$0xff] }
 0x566   :  { %4940 = vmatpush1.bf16.msra.mxu1 %v4939_v62  ;;  %4782 = vmatprep.subr.bf16.mxu0 %v4781_v47  ;;  %v723_v62 = vld [vmem:[#allocation14 + $0x18] sm:$0xff]  ;;  %v2207_v39 = vld [vmem:[#allocation11 + $0x248] sm:$0xff] }
 0x567   :  { %4942 = vmatprep.subr.bf16.mxu1 %v4941_v42  ;;  %v4789_v47 = vpack.c.bf16 %v723_v62, %v721_v60  ;;  %v720_v42 = vld [vmem:[#allocation14] sm:$0xff]  ;;  %v2204_v60 = vld [vmem:[#allocation11 + $0x230] sm:$0xff]  ;;  %v729_v62 = vld [vmem:[#allocation14 + $0x48] sm:$0xff] }
 0x568   :  { %1994 = vmatmul.mubr.f32.gmra.mrb[92].mxu1 %v5756_v19  ;;  %v4791_v45 = vpack.c.bf16 %v722_v22, %v720_v42  ;;  %v4951_v19 = vpack.c.bf16 %v2200_v16, %v2198_v5  ;;  %v4955_v5 = vpack.c.bf16 %v2204_v60, %v2202_v10  ;;  %v732_v10 = vld [vmem:[#allocation14 + $0x60] sm:$0xff]  ;;  %v734_v60 = vld [vmem:[#allocation14 + $0x70] sm:$0xff] }
 0x569   :  { %1999 = vmatprep.mubr.f32.mxu1 %v7652_v26  ;;  %4784 = vmatpush1.bf16.msra.mxu0 %v4783_v56  ;;  %v2205_v56 = vld [vmem:[#allocation11 + $0x238] sm:$0xff] }
 0x56a   :  { %4944 = vmatpush1.bf16.msra.mxu1 %v4943_v34  ;;  %4786 = vmatprep.subr.bf16.mxu0 %v4785_v32 }
 0x56b   :  { %4946 = vmatprep.subr.bf16.mxu1 %v4945_v44 }
 0x56c   :  { %2000 = vmatmul.mubr.f32.gmra.mrb[94].mxu1 %v5757_v11  ;;  %v724_v11 = vld [vmem:[#allocation14 + $0x20] sm:$0xff] }
 0x56d   :  { %4788 = vmatpush1.bf16.msra.mxu0 %v4787_v55  ;;  %v4793_v55 = vpack.c.bf16 %v727_v12, %v725_v58  ;;  %v4795_v42 = vpack.c.bf16 %v726_v27, %v724_v11  ;;  %v728_v58 = vld [vmem:[#allocation14 + $0x40] sm:$0xff]  ;;  %v730_v12 = vld [vmem:[#allocation14 + $0x50] sm:$0xff] }
 0x56e   :  { %4948 = vmatpush1.bf16.msra.mxu1 %v4947_v3  ;;  %4790 = vmatprep.subr.bf16.mxu0 %v4789_v47  ;;  %v4953_v3 = vpack.c.bf16 %v2205_v56, %v2203_v59  ;;  %v731_v47 = vld [vmem:[#allocation14 + $0x58] sm:$0xff]  ;;  %v2206_v59 = vld [vmem:[#allocation11 + $0x240] sm:$0xff]  ;;  %v4957_v56 = vpack.c.bf16 %v2209_v63, %v2207_v39  ;;  %v4799_v11 = vpack.c.bf16 %v730_v12, %v728_v58  ;;  %v737_v39 = vld [vmem:[#allocation14 + $0x88] sm:$0xff] }
 0x56f   :  { %4950 = vmatprep.subr.bf16.mxu1 %v4949_v0  ;;  %v4797_v16 = vpack.c.bf16 %v731_v47, %v729_v62  ;;  %v2210_v62 = vld [vmem:[#allocation11 + $0x260] sm:$0xff]  ;;  %v2212_v47 = vld [vmem:[#allocation11 + $0x270] sm:$0xff]  ;;  %v739_v63 = vld [vmem:[#allocation14 + $0x98] sm:$0xff]  ;;  %v4803_v58 = vpack.c.bf16 %v734_v60, %v732_v10 }
 0x570   :  { %v4805_v12 = vpack.c.bf16 %v739_v63, %v737_v39  ;;  %v2218_v39 = vld [vmem:[#allocation11 + $0x2a0] sm:$0xff]  ;;  %v2220_v63 = vld [vmem:[#allocation11 + $0x2b0] sm:$0xff] }
 0x603   :  { %v1633_v34 = vpop.f32.mrb[50].mxu0  ;;  %v1911_v32 = vpop.f32.mrb[64].mxu1 }
 0x604   :  { %v1635_v20 = vpop.f32.mrb[51].mxu0  ;;  %v1913_v44 = vpop.f32.mrb[65].mxu1 }
 0x605   :  { %1767 = vmatprep.mubr.f32.mxu0 %v1635_v20  ;;  %2338 = vmatprep.mubr.f32.mxu1 %v1913_v44  ;;  %v735_v20 = vld [vmem:[#allocation14 + $0x78] sm:$0xff] }
 0x606   :  { %1768 = vmatmul.mubr.f32.vlgmr.msra.gmra.mrb[52].mxu0 %v1633_v34  ;;  %2339 = vmatmul.mubr.f32.vlgmr.msra.gmra.mrb[96].mxu1 %v1911_v32  ;;  %v2208_v34 = vld [vmem:[#allocation11 + $0x250] sm:$0xff]  ;;  %v733_v32 = vld [vmem:[#allocation14 + $0x68] sm:$0xff]  ;;  %v2213_v44 = vld [vmem:[#allocation11 + $0x278] sm:$0xff] }
 0x607   :  { %4792 = vmatpush1.bf16.msra.mxu0 %v4791_v45  ;;  %1838 = vmatprep.mubr.f32.mxu0 %v6704_v54  ;;  %v1917_v0 = vpop.f32.mrb[66].mxu1  ;;  %v2211_v45 = vld [vmem:[#allocation11 + $0x268] sm:$0xff]  ;;  %v4801_v27 = vpack.c.bf16 %v735_v20, %v733_v32  ;;  %v2214_v32 = vld [vmem:[#allocation11 + $0x280] sm:$0xff]  ;;  %v2216_v20 = vld [vmem:[#allocation11 + $0x290] sm:$0xff] }
 0x608   :  { %4952 = vmatpush1.bf16.msra.mxu1 %v4951_v19  ;;  %v1919_v22 = vpop.f32.mrb[67].mxu1  ;;  %4794 = vmatprep.subr.bf16.mxu0 %v4793_v55  ;;  %v4959_v55 = vpack.c.bf16 %v2208_v34, %v2206_v59  ;;  %v736_v59 = vld [vmem:[#allocation14 + $0x80] sm:$0xff]  ;;  %v738_v34 = vld [vmem:[#allocation14 + $0x90] sm:$0xff] }
 0x609   :  { %2344 = vmatprep.mubr.f32.mxu1 %v1919_v22  ;;  %4954 = vmatprep.subr.bf16.mxu1 %v4953_v3  ;;  %v4961_v3 = vpack.c.bf16 %v2213_v44, %v2211_v45  ;;  %v2217_v22 = vld [vmem:[#allocation11 + $0x298] sm:$0xff]  ;;  %v741_v45 = vld [vmem:[#allocation14 + $0xa8] sm:$0xff]  ;;  %v4807_v10 = vpack.c.bf16 %v738_v34, %v736_v59 }
 0x60a   :  { %2345 = vmatmul.mubr.f32.gmra.mrb[98].mxu1 %v1917_v0  ;;  %v2215_v0 = vld [vmem:[#allocation11 + $0x288] sm:$0xff]  ;;  %v743_v44 = vld [vmem:[#allocation14 + $0xb8] sm:$0xff] }
 0x60b   :  { %4796 = vmatpush1.bf16.msra.mxu0 %v4795_v42  ;;  %v1923_v54 = vpop.f32.mrb[68].mxu1  ;;  %v4809_v60 = vpack.c.bf16 %v743_v44, %v741_v45  ;;  %v2222_v45 = vld [vmem:[#allocation11 + $0x2c0] sm:$0xff]  ;;  %v2224_v44 = vld [vmem:[#allocation11 + $0x2d0] sm:$0xff] }
 0x60c   :  { %4956 = vmatpush1.bf16.msra.mxu1 %v4955_v5  ;;  %v1925_v19 = vpop.f32.mrb[69].mxu1  ;;  %4798 = vmatprep.subr.bf16.mxu0 %v4797_v16  ;;  %v4963_v16 = vpack.c.bf16 %v2212_v47, %v2210_v62  ;;  %v740_v62 = vld [vmem:[#allocation14 + $0xa0] sm:$0xff]  ;;  %v742_v47 = vld [vmem:[#allocation14 + $0xb0] sm:$0xff] }
 0x60d   :  { %2350 = vmatprep.mubr.f32.mxu1 %v1925_v19  ;;  %4958 = vmatprep.subr.bf16.mxu1 %v4957_v56  ;;  %v4965_v56 = vpack.c.bf16 %v2217_v22, %v2215_v0  ;;  %v2221_v19 = vld [vmem:[#allocation11 + $0x2b8] sm:$0xff]  ;;  %v745_v0 = vld [vmem:[#allocation14 + $0xc8] sm:$0xff]  ;;  %v4811_v59 = vpack.c.bf16 %v742_v47, %v740_v62 }
 0x60e   :  { %2351 = vmatmul.mubr.f32.gmra.mrb[100].mxu1 %v1923_v54  ;;  %v2219_v54 = vld [vmem:[#allocation11 + $0x2a8] sm:$0xff]  ;;  %v747_v22 = vld [vmem:[#allocation14 + $0xd8] sm:$0xff] }
 0x60f   :  { %4800 = vmatpush1.bf16.msra.mxu0 %v4799_v11  ;;  %v1929_v42 = vpop.f32.mrb[70].mxu1  ;;  %v4813_v34 = vpack.c.bf16 %v747_v22, %v745_v0  ;;  %v2226_v0 = vld [vmem:[#allocation11 + $0x2e0] sm:$0xff]  ;;  %v2228_v22 = vld [vmem:[#allocation11 + $0x2f0] sm:$0xff] }
 0x610   :  { %4960 = vmatpush1.bf16.msra.mxu1 %v4959_v55  ;;  %v1931_v5 = vpop.f32.mrb[71].mxu1  ;;  %4802 = vmatprep.subr.bf16.mxu0 %v4801_v27  ;;  %v4967_v27 = vpack.c.bf16 %v2216_v20, %v2214_v32  ;;  %v744_v32 = vld [vmem:[#allocation14 + $0xc0] sm:$0xff]  ;;  %v746_v20 = vld [vmem:[#allocation14 + $0xd0] sm:$0xff] }
 0x611   :  { %2356 = vmatprep.mubr.f32.mxu1 %v1931_v5  ;;  %4962 = vmatprep.subr.bf16.mxu1 %v4961_v3  ;;  %v4969_v3 = vpack.c.bf16 %v2221_v19, %v2219_v54  ;;  %v2225_v5 = vld [vmem:[#allocation11 + $0x2d8] sm:$0xff]  ;;  %v749_v54 = vld [vmem:[#allocation14 + $0xe8] sm:$0xff]  ;;  %v4815_v62 = vpack.c.bf16 %v746_v20, %v744_v32 }
 0x612   :  { %2357 = vmatmul.mubr.f32.gmra.mrb[102].mxu1 %v1929_v42  ;;  %v2223_v42 = vld [vmem:[#allocation11 + $0x2c8] sm:$0xff]  ;;  %v751_v19 = vld [vmem:[#allocation14 + $0xf8] sm:$0xff] }
 0x613   :  { %4804 = vmatpush1.bf16.msra.mxu0 %v4803_v58  ;;  %v1935_v11 = vpop.f32.mrb[72].mxu1  ;;  %v4817_v47 = vpack.c.bf16 %v751_v19, %v749_v54  ;;  %v2230_v54 = vld [vmem:[#allocation11 + $0x300] sm:$0xff]  ;;  %v2232_v19 = vld [vmem:[#allocation11 + $0x310] sm:$0xff] }
 0x614   :  { %4964 = vmatpush1.bf16.msra.mxu1 %v4963_v16  ;;  %v1937_v55 = vpop.f32.mrb[73].mxu1  ;;  %4806 = vmatprep.subr.bf16.mxu0 %v4805_v12  ;;  %v4971_v12 = vpack.c.bf16 %v2220_v63, %v2218_v39  ;;  %v748_v39 = vld [vmem:[#allocation14 + $0xe0] sm:$0xff]  ;;  %v750_v63 = vld [vmem:[#allocation14 + $0xf0] sm:$0xff] }
 0x615   :  { %2362 = vmatprep.mubr.f32.mxu1 %v1937_v55  ;;  %4966 = vmatprep.subr.bf16.mxu1 %v4965_v56  ;;  %v4973_v56 = vpack.c.bf16 %v2225_v5, %v2223_v42  ;;  %v2229_v55 = vld [vmem:[#allocation11 + $0x2f8] sm:$0xff]  ;;  %v753_v42 = vld [vmem:[#allocation14 + $0x108] sm:$0xff]  ;;  %v4819_v32 = vpack.c.bf16 %v750_v63, %v748_v39 }
 0x616   :  { %2363 = vmatmul.mubr.f32.gmra.mrb[104].mxu1 %v1935_v11  ;;  %v2227_v11 = vld [vmem:[#allocation11 + $0x2e8] sm:$0xff]  ;;  %v755_v5 = vld [vmem:[#allocation14 + $0x118] sm:$0xff] }
 0x617   :  { %4808 = vmatpush1.bf16.msra.mxu0 %v4807_v10  ;;  %v1941_v58 = vpop.f32.mrb[74].mxu1  ;;  %v4821_v20 = vpack.c.bf16 %v755_v5, %v753_v42  ;;  %v2234_v42 = vld [vmem:[#allocation11 + $0x320] sm:$0xff]  ;;  %v2236_v5 = vld [vmem:[#allocation11 + $0x330] sm:$0xff] }
 0x618   :  { %4968 = vmatpush1.bf16.msra.mxu1 %v4967_v27  ;;  %v1943_v16 = vpop.f32.mrb[75].mxu1  ;;  %4810 = vmatprep.subr.bf16.mxu0 %v4809_v60  ;;  %v4975_v60 = vpack.c.bf16 %v2224_v44, %v2222_v45  ;;  %v752_v45 = vld [vmem:[#allocation14 + $0x100] sm:$0xff]  ;;  %v754_v44 = vld [vmem:[#allocation14 + $0x110] sm:$0xff] }
 0x619   :  { %2368 = vmatprep.mubr.f32.mxu1 %v1943_v16  ;;  %4970 = vmatprep.subr.bf16.mxu1 %v4969_v3  ;;  %v4977_v3 = vpack.c.bf16 %v2229_v55, %v2227_v11  ;;  %v2233_v16 = vld [vmem:[#allocation11 + $0x318] sm:$0xff]  ;;  %v757_v11 = vld [vmem:[#allocation14 + $0x128] sm:$0xff]  ;;  %v4823_v39 = vpack.c.bf16 %v754_v44, %v752_v45 }
 0x61a   :  { %2369 = vmatmul.mubr.f32.gmra.mrb[106].mxu1 %v1941_v58  ;;  %v2231_v58 = vld [vmem:[#allocation11 + $0x308] sm:$0xff]  ;;  %v759_v55 = vld [vmem:[#allocation14 + $0x138] sm:$0xff] }
 0x61b   :  { %4812 = vmatpush1.bf16.msra.mxu0 %v4811_v59  ;;  %v1947_v10 = vpop.f32.mrb[76].mxu1  ;;  %v4825_v63 = vpack.c.bf16 %v759_v55, %v757_v11  ;;  %v2238_v11 = vld [vmem:[#allocation11 + $0x340] sm:$0xff]  ;;  %v2240_v55 = vld [vmem:[#allocation11 + $0x350] sm:$0xff] }
 0x61c   :  { %4972 = vmatpush1.bf16.msra.mxu1 %v4971_v12  ;;  %v1949_v27 = vpop.f32.mrb[77].mxu1  ;;  %4814 = vmatprep.subr.bf16.mxu0 %v4813_v34  ;;  %v4979_v34 = vpack.c.bf16 %v2228_v22, %v2226_v0  ;;  %v756_v0 = vld [vmem:[#allocation14 + $0x120] sm:$0xff]  ;;  %v758_v22 = vld [vmem:[#allocation14 + $0x130] sm:$0xff] }
 0x61d   :  { %2374 = vmatprep.mubr.f32.mxu1 %v1949_v27  ;;  %4974 = vmatprep.subr.bf16.mxu1 %v4973_v56  ;;  %v4981_v56 = vpack.c.bf16 %v2233_v16, %v2231_v58  ;;  %v2237_v27 = vld [vmem:[#allocation11 + $0x338] sm:$0xff]  ;;  %v761_v58 = vld [vmem:[#allocation14 + $0x148] sm:$0xff]  ;;  %v4827_v45 = vpack.c.bf16 %v758_v22, %v756_v0 }
 0x61e   :  { %2375 = vmatmul.mubr.f32.gmra.mrb[108].mxu1 %v1947_v10  ;;  %v2235_v10 = vld [vmem:[#allocation11 + $0x328] sm:$0xff]  ;;  %v763_v16 = vld [vmem:[#allocation14 + $0x158] sm:$0xff] }
 0x61f   :  { %4816 = vmatpush1.bf16.msra.mxu0 %v4815_v62  ;;  %v1953_v59 = vpop.f32.mrb[78].mxu1  ;;  %v4829_v44 = vpack.c.bf16 %v763_v16, %v761_v58  ;;  %v2242_v58 = vld [vmem:[#allocation11 + $0x360] sm:$0xff]  ;;  %v2244_v16 = vld [vmem:[#allocation11 + $0x370] sm:$0xff] }
 0x620   :  { %4976 = vmatpush1.bf16.msra.mxu1 %v4975_v60  ;;  %v1955_v12 = vpop.f32.mrb[79].mxu1  ;;  %4818 = vmatprep.subr.bf16.mxu0 %v4817_v47  ;;  %v4983_v47 = vpack.c.bf16 %v2232_v19, %v2230_v54  ;;  %v760_v54 = vld [vmem:[#allocation14 + $0x140] sm:$0xff]  ;;  %v762_v19 = vld [vmem:[#allocation14 + $0x150] sm:$0xff] }
 0x621   :  { %2380 = vmatprep.mubr.f32.mxu1 %v1955_v12  ;;  %4978 = vmatprep.subr.bf16.mxu1 %v4977_v3  ;;  %v4985_v3 = vpack.c.bf16 %v2237_v27, %v2235_v10  ;;  %v2241_v12 = vld [vmem:[#allocation11 + $0x358] sm:$0xff]  ;;  %v765_v10 = vld [vmem:[#allocation14 + $0x168] sm:$0xff]  ;;  %v4831_v0 = vpack.c.bf16 %v762_v19, %v760_v54 }
 0x622   :  { %2381 = vmatmul.mubr.f32.gmra.mrb[110].mxu1 %v1953_v59  ;;  %v2239_v59 = vld [vmem:[#allocation11 + $0x348] sm:$0xff]  ;;  %v767_v27 = vld [vmem:[#allocation14 + $0x178] sm:$0xff] }
 0x623   :  { %4820 = vmatpush1.bf16.msra.mxu0 %v4819_v32  ;;  %v1959_v62 = vpop.f32.mrb[80].mxu1  ;;  %v4833_v22 = vpack.c.bf16 %v767_v27, %v765_v10  ;;  %v2246_v10 = vld [vmem:[#allocation11 + $0x380] sm:$0xff]  ;;  %v2248_v27 = vld [vmem:[#allocation11 + $0x390] sm:$0xff] }
 0x624   :  { %4980 = vmatpush1.bf16.msra.mxu1 %v4979_v34  ;;  %v1961_v60 = vpop.f32.mrb[81].mxu1  ;;  %4822 = vmatprep.subr.bf16.mxu0 %v4821_v20  ;;  %v4987_v20 = vpack.c.bf16 %v2236_v5, %v2234_v42  ;;  %v764_v42 = vld [vmem:[#allocation14 + $0x160] sm:$0xff]  ;;  %v766_v5 = vld [vmem:[#allocation14 + $0x170] sm:$0xff] }
 0x625   :  { %2386 = vmatprep.mubr.f32.mxu1 %v1961_v60  ;;  %4982 = vmatprep.subr.bf16.mxu1 %v4981_v56  ;;  %v4989_v56 = vpack.c.bf16 %v2241_v12, %v2239_v59  ;;  %v2245_v60 = vld [vmem:[#allocation11 + $0x378] sm:$0xff]  ;;  %v769_v59 = vld [vmem:[#allocation14 + $0x188] sm:$0xff]  ;;  %v4835_v54 = vpack.c.bf16 %v766_v5, %v764_v42 }
 0x626   :  { %2387 = vmatmul.mubr.f32.gmra.mrb[112].mxu1 %v1959_v62  ;;  %v2243_v62 = vld [vmem:[#allocation11 + $0x368] sm:$0xff]  ;;  %v771_v12 = vld [vmem:[#allocation14 + $0x198] sm:$0xff] }
 0x627   :  { %4824 = vmatpush1.bf16.msra.mxu0 %v4823_v39  ;;  %v1965_v32 = vpop.f32.mrb[82].mxu1  ;;  %v4837_v19 = vpack.c.bf16 %v771_v12, %v769_v59  ;;  %v2250_v59 = vld [vmem:[#allocation11 + $0x3a0] sm:$0xff]  ;;  %v2252_v12 = vld [vmem:[#allocation11 + $0x3b0] sm:$0xff] }
 0x628   :  { %4984 = vmatpush1.bf16.msra.mxu1 %v4983_v47  ;;  %v1967_v34 = vpop.f32.mrb[83].mxu1  ;;  %4826 = vmatprep.subr.bf16.mxu0 %v4825_v63  ;;  %v4991_v63 = vpack.c.bf16 %v2240_v55, %v2238_v11  ;;  %v768_v11 = vld [vmem:[#allocation14 + $0x180] sm:$0xff]  ;;  %v770_v55 = vld [vmem:[#allocation14 + $0x190] sm:$0xff] }
 0x629   :  { %2392 = vmatprep.mubr.f32.mxu1 %v1967_v34  ;;  %4986 = vmatprep.subr.bf16.mxu1 %v4985_v3  ;;  %v4993_v3 = vpack.c.bf16 %v2245_v60, %v2243_v62  ;;  %v2249_v34 = vld [vmem:[#allocation11 + $0x398] sm:$0xff]  ;;  %v773_v62 = vld [vmem:[#allocation14 + $0x1a8] sm:$0xff]  ;;  %v4839_v42 = vpack.c.bf16 %v770_v55, %v768_v11 }
 0x62a   :  { %2393 = vmatmul.mubr.f32.gmra.mrb[114].mxu1 %v1965_v32  ;;  %v2247_v32 = vld [vmem:[#allocation11 + $0x388] sm:$0xff]  ;;  %v775_v60 = vld [vmem:[#allocation14 + $0x1b8] sm:$0xff] }
 0x62b   :  { %4828 = vmatpush1.bf16.msra.mxu0 %v4827_v45  ;;  %v1971_v39 = vpop.f32.mrb[84].mxu1  ;;  %v4841_v5 = vpack.c.bf16 %v775_v60, %v773_v62  ;;  %v2254_v62 = vld [vmem:[#allocation11 + $0x3c0] sm:$0xff]  ;;  %v2256_v60 = vld [vmem:[#allocation11 + $0x3d0] sm:$0xff] }
 0x62c   :  { %4988 = vmatpush1.bf16.msra.mxu1 %v4987_v20  ;;  %v1973_v47 = vpop.f32.mrb[85].mxu1  ;;  %4830 = vmatprep.subr.bf16.mxu0 %v4829_v44  ;;  %v4995_v44 = vpack.c.bf16 %v2244_v16, %v2242_v58  ;;  %v772_v58 = vld [vmem:[#allocation14 + $0x1a0] sm:$0xff]  ;;  %v774_v16 = vld [vmem:[#allocation14 + $0x1b0] sm:$0xff] }
 0x62d   :  { %2398 = vmatprep.mubr.f32.mxu1 %v1973_v47  ;;  %4990 = vmatprep.subr.bf16.mxu1 %v4989_v56  ;;  %v4997_v56 = vpack.c.bf16 %v2249_v34, %v2247_v32  ;;  %v2253_v47 = vld [vmem:[#allocation11 + $0x3b8] sm:$0xff]  ;;  %v777_v32 = vld [vmem:[#allocation14 + $0x1c8] sm:$0xff]  ;;  %v4843_v11 = vpack.c.bf16 %v774_v16, %v772_v58 }
 0x62e   :  { %2399 = vmatmul.mubr.f32.gmra.mrb[116].mxu1 %v1971_v39  ;;  %v2251_v39 = vld [vmem:[#allocation11 + $0x3a8] sm:$0xff]  ;;  %v779_v34 = vld [vmem:[#allocation14 + $0x1d8] sm:$0xff] }
 0x62f   :  { %4832 = vmatpush1.bf16.msra.mxu0 %v4831_v0  ;;  %v1977_v45 = vpop.f32.mrb[86].mxu1  ;;  %v4845_v55 = vpack.c.bf16 %v779_v34, %v777_v32  ;;  %v2258_v32 = vld [vmem:[#allocation11 + $0x3e0] sm:$0xff]  ;;  %v2260_v34 = vld [vmem:[#allocation11 + $0x3f0] sm:$0xff] }
 0x630   :  { %4992 = vmatpush1.bf16.msra.mxu1 %v4991_v63  ;;  %v1979_v20 = vpop.f32.mrb[87].mxu1  ;;  %4834 = vmatprep.subr.bf16.mxu0 %v4833_v22  ;;  %v4999_v22 = vpack.c.bf16 %v2248_v27, %v2246_v10  ;;  %v776_v10 = vld [vmem:[#allocation14 + $0x1c0] sm:$0xff]  ;;  %v778_v27 = vld [vmem:[#allocation14 + $0x1d0] sm:$0xff] }
 0x631   :  { %2404 = vmatprep.mubr.f32.mxu1 %v1979_v20  ;;  %4994 = vmatprep.subr.bf16.mxu1 %v4993_v3  ;;  %v5001_v3 = vpack.c.bf16 %v2253_v47, %v2251_v39  ;;  %v2257_v20 = vld [vmem:[#allocation11 + $0x3d8] sm:$0xff]  ;;  %v781_v39 = vld [vmem:[#allocation14 + $0x1e8] sm:$0xff]  ;;  %v4847_v58 = vpack.c.bf16 %v778_v27, %v776_v10 }
 0x632   :  { %2405 = vmatmul.mubr.f32.gmra.mrb[118].mxu1 %v1977_v45  ;;  %v2255_v45 = vld [vmem:[#allocation11 + $0x3c8] sm:$0xff]  ;;  %v783_v47 = vld [vmem:[#allocation14 + $0x1f8] sm:$0xff] }
 0x633   :  { %4836 = vmatpush1.bf16.msra.mxu0 %v4835_v54  ;;  %v1983_v0 = vpop.f32.mrb[88].mxu1  ;;  %v4849_v16 = vpack.c.bf16 %v783_v47, %v781_v39 }
 0x634   :  { %4996 = vmatpush1.bf16.msra.mxu1 %v4995_v44  ;;  %v1985_v63 = vpop.f32.mrb[89].mxu1  ;;  %4838 = vmatprep.subr.bf16.mxu0 %v4837_v19  ;;  %v5003_v19 = vpack.c.bf16 %v2252_v12, %v2250_v59  ;;  %v780_v59 = vld [vmem:[#allocation14 + $0x1e0] sm:$0xff]  ;;  %v782_v12 = vld [vmem:[#allocation14 + $0x1f0] sm:$0xff] }
 0x635   :  { %2410 = vmatprep.mubr.f32.mxu1 %v1985_v63  ;;  %4998 = vmatprep.subr.bf16.mxu1 %v4997_v56  ;;  %v5005_v56 = vpack.c.bf16 %v2257_v20, %v2255_v45  ;;  %v2261_v63 = vld [vmem:[#allocation11 + $0x3f8] sm:$0xff]  ;;  %v4851_v20 = vpack.c.bf16 %v782_v12, %v780_v59 }
 0x636   :  { %2411 = vmatmul.mubr.f32.gmra.mrb[120].mxu1 %v1983_v0  ;;  %v2259_v0 = vld [vmem:[#allocation11 + $0x3e8] sm:$0xff] }
 0x637   :  { %4840 = vmatpush1.bf16.msra.mxu0 %v4839_v42  ;;  %v1989_v54 = vpop.f32.mrb[90].mxu1 }
 0x638   :  { %5000 = vmatpush1.bf16.msra.mxu1 %v4999_v22  ;;  %v1991_v44 = vpop.f32.mrb[91].mxu1  ;;  %4842 = vmatprep.subr.bf16.mxu0 %v4841_v5  ;;  %v5007_v5 = vpack.c.bf16 %v2256_v60, %v2254_v62 }
 0x639   :  { %2416 = vmatprep.mubr.f32.mxu1 %v1991_v44  ;;  %5002 = vmatprep.subr.bf16.mxu1 %v5001_v3  ;;  %v5009_v3 = vpack.c.bf16 %v2261_v63, %v2259_v0  ;;  %v7696_v44 = vmax.f32 %v6790_v29, 0.0  ;;  %v7703_v29 = vmax.f32 %v6832_v40, 0.0  ;;  %v7711_v40 = vmax.f32 %v6880_v18, 0.0 }
 0x63a   :  { %2417 = vmatmul.mubr.f32.gmra.mrb[122].mxu1 %v1989_v54  ;;  %v7719_v18 = vmax.f32 %v6928_v2, 0.0 }
 0x63b   :  { %4844 = vmatpush1.bf16.msra.mxu0 %v4843_v11  ;;  %v1995_v42 = vpop.f32.mrb[92].mxu1  ;;  %v5011_v11 = vpack.c.bf16 %v2260_v34, %v2258_v32 }
 0x63c   :  { %5004 = vmatpush1.bf16.msra.mxu1 %v5003_v19  ;;  %v1997_v22 = vpop.f32.mrb[93].mxu1  ;;  %4846 = vmatprep.subr.bf16.mxu0 %v4845_v55  ;;  %v7697_v19 = vmax.f32 %v6787_v61, 0.0  ;;  %v7698_v55 = vmax.f32 %v6805_v15, 0.0  ;;  %v7704_v61 = vmax.f32 %v6838_v30, 0.0  ;;  %v7706_v15 = vmax.f32 %v6853_v25, 0.0 }
 0x63d   :  { %2422 = vmatprep.mubr.f32.mxu1 %v1997_v22  ;;  %5006 = vmatprep.subr.bf16.mxu1 %v5005_v56  ;;  %v7713_v30 = vmax.f32 %v6883_v24, 0.0  ;;  %v7714_v25 = vmax.f32 %v6901_v57, 0.0  ;;  %v7720_v24 = vmax.f32 %v6934_v13, 0.0  ;;  %v7722_v57 = vmax.f32 %v6949_v21, 0.0  ;;  %v2262_v13 = vld [vmem:[%s7492_s9] sm:$0x3] }
 0x63e   :  { %2423 = vmatmul.mubr.f32.gmra.mrb[124].mxu1 %v1995_v42  ;;  %v7061_v2 = vrot.slane %v2262_v13, %v7694_v46  ;;  %v5758_v46 = vld [vmem:[%s7651_s0] sm:$0xff] }
 0x63f   :  { %4848 = vmatpush1.bf16.msra.mxu0 %v4847_v58  ;;  %v2001_v45 = vpop.f32.mrb[94].mxu1 }
 0x640   :  { %5008 = vmatpush1.bf16.msra.mxu1 %v5007_v5  ;;  %v2003_v54 = vpop.f32.mrb[95].mxu1  ;;  %4850 = vmatprep.subr.bf16.mxu0 %v4849_v16 }
 0x641   :  { %2428 = vmatprep.mubr.f32.mxu1 %v2003_v54  ;;  %5010 = vmatprep.subr.bf16.mxu1 %v5009_v3 }
 0x642   :  { %2429 = vmatmul.mubr.f32.gmra.mrb[126].mxu1 %v2001_v45 }
 0x643   :  { %4852 = vmatpush1.bf16.msra.mxu0 %v4851_v20  ;;  %2499 = vmatprep.mubr.f32.mxu1 %v1536_v48  ;;  %v7700_v48 = vmax.f32 %v6814_v52, 0.0  ;;  %v7709_v52 = vmax.f32 %v6859_v41, 0.0  ;;  %v7716_v41 = vmax.f32 %v6910_v31, 0.0  ;;  %v7725_v31 = vmax.f32 %v6955_v28, 0.0 }
 0x644   :  { %5012 = vmatpush1.bf16.msra.mxu1 %v5011_v11 }
 0x646   :  { %1839 = vmatmul.mubr.f32.vlgmr.msra.gmra.mrb[52].mxu0 %v6702_v33  ;;  %v7701_v33 = vmax.f32 %v6811_v7, 0.0  ;;  %v7708_v7 = vmax.f32 %v6862_v51, 0.0  ;;  %v7717_v51 = vmax.f32 %v6907_v17, 0.0  ;;  %v7724_v17 = vmax.f32 %v6958_v53, 0.0 }
 0x647   :  { %2500 = vmatmul.mubr.f32.vlgmr.msra.gmra.mrb[96].mxu1 %v1535_v6  ;;  %2692 = vmatprep.mubr.f32.mxu0 %v7652_v26  ;;  %v7705_v6 = vmax.f32 %v6835_v38, 0.0  ;;  %v7712_v38 = vmax.f32 %v6886_v1, 0.0  ;;  %v7721_v1 = vmax.f32 %v6931_v9, 0.0  ;;  %v7064_v9 = vrot.slane %v2262_v13, %v7695_v14  ;;  %v2708_v14 = vld [vmem:[#allocation14 + $0x440] sm:$0xff] }
 0x648   :  { %2505 = vmatprep.mubr.f32.mxu1 %v7696_v44 }
 0x64b   :  { %2506 = vmatmul.mubr.f32.gmra.mrb[98].mxu1 %v7697_v19 }
 0x64c   :  { %2511 = vmatprep.mubr.f32.mxu1 %v7698_v55 }
 0x64f   :  { %2512 = vmatmul.mubr.f32.gmra.mrb[100].mxu1 %v7699_v49 }
 0x650   :  { %2517 = vmatprep.mubr.f32.mxu1 %v7700_v48 }
 0x653   :  { %2518 = vmatmul.mubr.f32.gmra.mrb[102].mxu1 %v7701_v33 }
 0x654   :  { %2523 = vmatprep.mubr.f32.mxu1 %v7702_v23 }
 0x657   :  { %2524 = vmatmul.mubr.f32.gmra.mrb[104].mxu1 %v7703_v29 }
 0x658   :  { %2529 = vmatprep.mubr.f32.mxu1 %v7704_v61 }
 0x65b   :  { %2530 = vmatmul.mubr.f32.gmra.mrb[106].mxu1 %v7705_v6 }
 0x65c   :  { %2535 = vmatprep.mubr.f32.mxu1 %v7706_v15 }
 0x65f   :  { %2536 = vmatmul.mubr.f32.gmra.mrb[108].mxu1 %v7707_v36 }
 0x660   :  { %2541 = vmatprep.mubr.f32.mxu1 %v7708_v7 }
 0x663   :  { %2542 = vmatmul.mubr.f32.gmra.mrb[110].mxu1 %v7709_v52 }
 0x664   :  { %2547 = vmatprep.mubr.f32.mxu1 %v7710_v43 }
 0x667   :  { %2548 = vmatmul.mubr.f32.gmra.mrb[112].mxu1 %v7711_v40 }
 0x668   :  { %2553 = vmatprep.mubr.f32.mxu1 %v7712_v38 }
 0x66b   :  { %2554 = vmatmul.mubr.f32.gmra.mrb[114].mxu1 %v7713_v30 }
 0x66c   :  { %2559 = vmatprep.mubr.f32.mxu1 %v7714_v25 }
 0x66f   :  { %2560 = vmatmul.mubr.f32.gmra.mrb[116].mxu1 %v7715_v35 }
 0x670   :  { %2565 = vmatprep.mubr.f32.mxu1 %v7716_v41 }
 0x673   :  { %2566 = vmatmul.mubr.f32.gmra.mrb[118].mxu1 %v7717_v51 }
 0x674   :  { %2571 = vmatprep.mubr.f32.mxu1 %v7718_v50 }
 0x677   :  { %2572 = vmatmul.mubr.f32.gmra.mrb[120].mxu1 %v7719_v18 }
 0x678   :  { %2577 = vmatprep.mubr.f32.mxu1 %v7720_v24 }
 0x67b   :  { %2578 = vmatmul.mubr.f32.gmra.mrb[122].mxu1 %v7721_v1 }
 0x67c   :  { %2583 = vmatprep.mubr.f32.mxu1 %v7722_v57 }
 0x67f   :  { %2584 = vmatmul.mubr.f32.gmra.mrb[124].mxu1 %v7723_v8 }
 0x680   :  { %2589 = vmatprep.mubr.f32.mxu1 %v7724_v17 }
 0x683   :  { %2590 = vmatmul.mubr.f32.gmra.mrb[126].mxu1 %v7725_v31 }
 0x71a   :  { %v2501_v37 = vpop.f32.mrb[96].mxu1 }
 0x71b   :  { %v2503_v21 = vpop.f32.mrb[97].mxu1  ;;  %v7070_v10 = vadd.f32 %v2501_v37, %v7064_v9 }
 0x71c   :  { %v7067_v4 = vadd.f32 %v2503_v21, %v7061_v2 }
 0x71d   :  { %v7609_v0 = vmax.f32 %v7070_v10, 0.0 }
 0x71e   :  { %v2507_v53 = vpop.f32.mrb[98].mxu1  ;;  %v7610_v60 = vmax.f32 %v7067_v4, 0.0 }
 0x71f   :  { %v7073_v28 = vadd.f32 %v2507_v53, %v7064_v9  ;;  %v2509_v27 = vpop.f32.mrb[99].mxu1 }
 0x720   :  { %v7076_v62 = vadd.f32 %v2509_v27, %v7061_v2 }
 0x721   :  { %v7607_v56 = vmax.f32 %v7073_v28, 0.0 }
 0x722   :  { %v7608_v39 = vmax.f32 %v7076_v62, 0.0  ;;  %v2513_v47 = vpop.f32.mrb[100].mxu1 }
 0x723   :  { %v2515_v63 = vpop.f32.mrb[101].mxu1  ;;  %v7092_v58 = vpack.c.bf16 %v7607_v56, %v7609_v0  ;;  %v7099_v16 = vadd.f32 %v2513_v47, %v7064_v9  ;;  %v2705_v56 = vld [vmem:[#allocation14 + $0x428] sm:$0xff] }
 0x724   :  { %v7086_v42 = vpack.c.bf16 %v7608_v39, %v7610_v60  ;;  %v7095_v22 = vadd.f32 %v2515_v63, %v7061_v2  ;;  %v2707_v39 = vld [vmem:[#allocation14 + $0x438] sm:$0xff] }
 0x725   :  { %v7605_v54 = vmax.f32 %v7099_v16, 0.0  ;;  %v5049_v60 = vpack.c.bf16 %v2707_v39, %v2705_v56  ;;  %v2712_v39 = vld [vmem:[#allocation14 + $0x460] sm:$0xff] }
 0x726   :  { %v2519_v5 = vpop.f32.mrb[102].mxu1  ;;  %5014 = vmatprep.subr.bf16.mxu0 %v7086_v42  ;;  %v7606_v34 = vmax.f32 %v7095_v22, 0.0 }
 0x727   :  { %v7102_v59 = vadd.f32 %v2519_v5, %v7064_v9  ;;  %v2521_v12 = vpop.f32.mrb[103].mxu1  ;;  %5016 = vmatpush1.bf16.msra.mxu0 %v7092_v58 }
 0x728   :  { %v7106_v3 = vadd.f32 %v2521_v12, %v7061_v2 }
 0x729   :  { %v7599_v32 = vmax.f32 %v7102_v59, 0.0 }
 0x72a   :  { %v7604_v45 = vmax.f32 %v7106_v3, 0.0  ;;  %v2525_v20 = vpop.f32.mrb[104].mxu1 }
 0x72b   :  { %v2527_v11 = vpop.f32.mrb[105].mxu1  ;;  %v7122_v19 = vpack.c.bf16 %v7599_v32, %v7605_v54  ;;  %v7129_v48 = vadd.f32 %v2525_v20, %v7064_v9 }
 0x72c   :  { %v7116_v44 = vpack.c.bf16 %v7604_v45, %v7606_v34  ;;  %v7125_v55 = vadd.f32 %v2527_v11, %v7061_v2  ;;  %v2700_v34 = vld [vmem:[#allocation14 + $0x400] sm:$0xff] }
 0x72d   :  { %v7597_v7 = vmax.f32 %v7129_v48, 0.0 }
 0x72e   :  { %v2531_v49 = vpop.f32.mrb[106].mxu1  ;;  %5018 = vmatprep.subr.bf16.mxu0 %v7116_v44  ;;  %v7598_v6 = vmax.f32 %v7125_v55, 0.0 }
 0x72f   :  { %v7132_v33 = vadd.f32 %v2531_v49, %v7064_v9  ;;  %v2533_v23 = vpop.f32.mrb[107].mxu1  ;;  %5020 = vmatpush1.bf16.msra.mxu0 %v7122_v19 }
 0x730   :  { %v7136_v29 = vadd.f32 %v2533_v23, %v7061_v2 }
 0x731   :  { %v7595_v61 = vmax.f32 %v7132_v33, 0.0 }
 0x732   :  { %v7596_v15 = vmax.f32 %v7136_v29, 0.0  ;;  %v2537_v36 = vpop.f32.mrb[108].mxu1 }
 0x733   :  { %v2539_v52 = vpop.f32.mrb[109].mxu1  ;;  %v7152_v40 = vpack.c.bf16 %v7595_v61, %v7597_v7  ;;  %v7159_v25 = vadd.f32 %v2537_v36, %v7064_v9 }
 0x734   :  { %v7146_v43 = vpack.c.bf16 %v7596_v15, %v7598_v6  ;;  %v7155_v38 = vadd.f32 %v2539_v52, %v7061_v2 }
 0x735   :  { %v7589_v57 = vmax.f32 %v7159_v25, 0.0 }
 0x736   :  { %v2543_v30 = vpop.f32.mrb[110].mxu1  ;;  %5022 = vmatprep.subr.bf16.mxu0 %v7146_v43  ;;  %v7594_v18 = vmax.f32 %v7155_v38, 0.0 }
 0x737   :  { %v7162_v35 = vadd.f32 %v2543_v30, %v7064_v9  ;;  %v2545_v41 = vpop.f32.mrb[111].mxu1  ;;  %5024 = vmatpush1.bf16.msra.mxu0 %v7152_v40 }
 0x738   :  { %v7166_v51 = vadd.f32 %v2545_v41, %v7061_v2 }
 0x739   :  { %v7587_v50 = vmax.f32 %v7162_v35, 0.0 }
 0x73a   :  { %v7588_v24 = vmax.f32 %v7166_v51, 0.0  ;;  %v2549_v1 = vpop.f32.mrb[112].mxu1 }
 0x73b   :  { %v2551_v8 = vpop.f32.mrb[113].mxu1  ;;  %v7182_v31 = vpack.c.bf16 %v7587_v50, %v7589_v57  ;;  %v7189_v21 = vadd.f32 %v2549_v1, %v7064_v9 }
 0x73c   :  { %v7176_v17 = vpack.c.bf16 %v7588_v24, %v7594_v18  ;;  %v7185_v13 = vadd.f32 %v2551_v8, %v7061_v2 }
 0x73d   :  { %v7585_v11 = vmax.f32 %v7189_v21, 0.0 }
 0x73e   :  { %v2555_v37 = vpop.f32.mrb[114].mxu1  ;;  %5026 = vmatprep.subr.bf16.mxu0 %v7176_v17  ;;  %v7586_v5 = vmax.f32 %v7185_v13, 0.0 }
 0x73f   :  { %v7192_v53 = vadd.f32 %v2555_v37, %v7064_v9  ;;  %v2557_v27 = vpop.f32.mrb[115].mxu1  ;;  %5028 = vmatpush1.bf16.msra.mxu0 %v7182_v31 }
 0x740   :  { %v7196_v47 = vadd.f32 %v2557_v27, %v7061_v2 }
 0x741   :  { %v7583_v63 = vmax.f32 %v7192_v53, 0.0 }
 0x742   :  { %v7584_v12 = vmax.f32 %v7196_v47, 0.0  ;;  %v2561_v20 = vpop.f32.mrb[116].mxu1 }
 0x743   :  { %v2563_v49 = vpop.f32.mrb[117].mxu1  ;;  %v7212_v36 = vpack.c.bf16 %v7583_v63, %v7585_v11  ;;  %v7219_v41 = vadd.f32 %v2561_v20, %v7064_v9 }
 0x744   :  { %v7206_v23 = vpack.c.bf16 %v7584_v12, %v7586_v5  ;;  %v7215_v52 = vadd.f32 %v2563_v49, %v7061_v2 }
 0x745   :  { %v7593_v11 = vmax.f32 %v7219_v41, 0.0 }
 0x746   :  { %v2567_v30 = vpop.f32.mrb[118].mxu1  ;;  %5030 = vmatprep.subr.bf16.mxu0 %v7206_v23  ;;  %v7591_v49 = vmax.f32 %v7215_v52, 0.0 }
 0x747   :  { %v7222_v1 = vadd.f32 %v2567_v30, %v7064_v9  ;;  %v2569_v8 = vpop.f32.mrb[119].mxu1  ;;  %5032 = vmatpush1.bf16.msra.mxu0 %v7212_v36 }
 0x748   :  { %v7226_v37 = vadd.f32 %v2569_v8, %v7061_v2 }
 0x749   :  { %v7592_v27 = vmax.f32 %v7222_v1, 0.0 }
 0x74a   :  { %v7590_v63 = vmax.f32 %v7226_v37, 0.0  ;;  %v2573_v12 = vpop.f32.mrb[120].mxu1 }
 0x74b   :  { %v2575_v20 = vpop.f32.mrb[121].mxu1  ;;  %v7242_v8 = vpack.c.bf16 %v7592_v27, %v7593_v11  ;;  %v7249_v24 = vadd.f32 %v2573_v12, %v7064_v9 }
 0x74c   :  { %v7236_v30 = vpack.c.bf16 %v7590_v63, %v7591_v49  ;;  %v7245_v5 = vadd.f32 %v2575_v20, %v7061_v2 }
 0x74d   :  { %v7603_v61 = vmax.f32 %v7249_v24, 0.0 }
 0x74e   :  { %v2579_v50 = vpop.f32.mrb[122].mxu1  ;;  %5034 = vmatprep.subr.bf16.mxu0 %v7236_v30  ;;  %v7601_v20 = vmax.f32 %v7245_v5, 0.0 }
 0x74f   :  { %v7252_v57 = vadd.f32 %v2579_v50, %v7064_v9  ;;  %v2581_v63 = vpop.f32.mrb[123].mxu1  ;;  %5036 = vmatpush1.bf16.msra.mxu0 %v7242_v8 }
 0x750   :  { %v7256_v49 = vadd.f32 %v2581_v63, %v7061_v2 }
 0x751   :  { %7726 = vst [vmem:[#allocation30_spill] sm:$0xff] %v7252_v57  ;;  %v7602_v27 = vmax.f32 %v7252_v57, 0.0 }
 0x752   :  { %v7600_v11 = vmax.f32 %v7256_v49, 0.0  ;;  %v2585_v18 = vpop.f32.mrb[124].mxu1 }
 0x753   :  { %v2587_v12 = vpop.f32.mrb[125].mxu1  ;;  %v7272_v63 = vpack.c.bf16 %v7602_v27, %v7603_v61  ;;  %v7279_v6 = vadd.f32 %v2585_v18, %v7064_v9  ;;  %v2701_v61 = vld [vmem:[#allocation14 + $0x408] sm:$0xff] }
 0x754   :  { %v7266_v50 = vpack.c.bf16 %v7600_v11, %v7601_v20  ;;  %v7275_v15 = vadd.f32 %v2587_v12, %v7061_v2  ;;  %v2703_v12 = vld [vmem:[#allocation14 + $0x418] sm:$0xff] }
 0x755   :  { %7728 = vst [vmem:[#allocation32_spill] sm:$0xff] %v7279_v6  ;;  %v7615_v18 = vmax.f32 %v7279_v6, 0.0  ;;  %v2715_v6 = vld [vmem:[#allocation14 + $0x478] sm:$0xff] }
 0x756   :  { %7727 = vst [vmem:[#allocation31_spill] sm:$0xff] %v7275_v15  ;;  %v2591_v7 = vpop.f32.mrb[126].mxu1  ;;  %5038 = vmatprep.subr.bf16.mxu0 %v7266_v50  ;;  %v7612_v45 = vmax.f32 %v7275_v15, 0.0  ;;  %v2719_v15 = vld [vmem:[#allocation14 + $0x498] sm:$0xff] }
 0x757   :  { %v7282_v32 = vadd.f32 %v2591_v7, %v7064_v9  ;;  %v2593_v11 = vpop.f32.mrb[127].mxu1  ;;  %5040 = vmatpush1.bf16.msra.mxu0 %v7272_v63  ;;  %v5045_v7 = vpack.c.bf16 %v2703_v12, %v2701_v61  ;;  %v2709_v61 = vld [vmem:[#allocation14 + $0x448] sm:$0xff]  ;;  %v2711_v12 = vld [vmem:[#allocation14 + $0x458] sm:$0xff] }
 0x758   :  { %v7286_v20 = vadd.f32 %v2593_v11, %v7061_v2  ;;  %v2702_v2 = vld [vmem:[#allocation14 + $0x410] sm:$0xff] }
 0x759   :  { %7729 = vst [vmem:[#allocation34_spill] sm:$0xff] %v7282_v32  ;;  %v7614_v27 = vmax.f32 %v7282_v32, 0.0  ;;  %v5047_v0 = vpack.c.bf16 %v2702_v2, %v2700_v34  ;;  %v2710_v32 = vld [vmem:[#allocation14 + $0x450] sm:$0xff]  ;;  %v2717_v2 = vld [vmem:[#allocation14 + $0x488] sm:$0xff] }
 0x75a   :  { %7730 = vst [vmem:[#allocation33_spill] sm:$0xff] %v7286_v20  ;;  %v7611_v54 = vmax.f32 %v7286_v20, 0.0  ;;  %v2713_v20 = vld [vmem:[#allocation14 + $0x468] sm:$0xff]  ;;  %v5055_v34 = vpack.c.bf16 %v2710_v32, %v2708_v14  ;;  %v2722_v14 = vld [vmem:[#allocation14 + $0x4b0] sm:$0xff] }
 0x75b   :  { %v7302_v11 = vpack.c.bf16 %v7614_v27, %v7615_v18  ;;  %v5053_v18 = vpack.c.bf16 %v2711_v12, %v2709_v61  ;;  %v5057_v56 = vpack.c.bf16 %v2715_v6, %v2713_v20  ;;  %v2725_v32 = vld [vmem:[#allocation14 + $0x4c8] sm:$0xff]  ;;  %v2727_v6 = vld [vmem:[#allocation14 + $0x4d8] sm:$0xff] }
 0x75c   :  { %v7296_v9 = vpack.c.bf16 %v7611_v54, %v7612_v45  ;;  %v2704_v54 = vld [vmem:[#allocation14 + $0x420] sm:$0xff]  ;;  %v2706_v45 = vld [vmem:[#allocation14 + $0x430] sm:$0xff] }
 0x75d   :  { %v5051_v27 = vpack.c.bf16 %v2706_v45, %v2704_v54  ;;  %v2718_v45 = vld [vmem:[#allocation14 + $0x490] sm:$0xff]  ;;  %v2723_v54 = vld [vmem:[#allocation14 + $0x4b8] sm:$0xff] }
 0x75e   :  { %5042 = vmatprep.subr.bf16.mxu0 %v7296_v9 }
 0x75f   :  { %5044 = vmatpush1.bf16.msra.mxu0 %v7302_v11 }
 0x760   :  { %5046 = vmatprep.subr.bf16.mxu0 %v5045_v7  ;;  %v2714_v7 = vld [vmem:[#allocation14 + $0x470] sm:$0xff] }
 0x761   :  { %v5059_v57 = vpack.c.bf16 %v2714_v7, %v2712_v39  ;;  %v2726_v39 = vld [vmem:[#allocation14 + $0x4d0] sm:$0xff] }
 0x762   :  { %2693 = vmatmul.mubr.f32.vlgmr.msra.gmra.mrb[54].mxu0 %v5758_v46  ;;  %v5061_v46 = vpack.c.bf16 %v2719_v15, %v2717_v2  ;;  %v2731_v15 = vld [vmem:[#allocation14 + $0x4f8] sm:$0xff] }
 0x763   :  { %5048 = vmatpush1.bf16.msra.mxu0 %v5047_v0  ;;  %v2716_v0 = vld [vmem:[#allocation14 + $0x480] sm:$0xff] }
 0x764   :  { %5050 = vmatprep.subr.bf16.mxu0 %v5049_v60  ;;  %v2721_v60 = vld [vmem:[#allocation14 + $0x4a8] sm:$0xff]  ;;  %v5063_v61 = vpack.c.bf16 %v2718_v45, %v2716_v0  ;;  %v2730_v0 = vld [vmem:[#allocation14 + $0x4f0] sm:$0xff]  ;;  %v2735_v45 = vld [vmem:[#allocation14 + $0x518] sm:$0xff] }
 0x765   :  { %v5065_v12 = vpack.c.bf16 %v2723_v54, %v2721_v60 }
 0x767   :  { %5052 = vmatpush1.bf16.msra.mxu0 %v5051_v27  ;;  %v2720_v27 = vld [vmem:[#allocation14 + $0x4a0] sm:$0xff] }
 0x768   :  { %5054 = vmatprep.subr.bf16.mxu0 %v5053_v18  ;;  %v5067_v20 = vpack.c.bf16 %v2722_v14, %v2720_v27  ;;  %v5069_v18 = vpack.c.bf16 %v2727_v6, %v2725_v32  ;;  %v2734_v27 = vld [vmem:[#allocation14 + $0x510] sm:$0xff]  ;;  %v2739_v14 = vld [vmem:[#allocation14 + $0x538] sm:$0xff] }
 0x76b   :  { %5056 = vmatpush1.bf16.msra.mxu0 %v5055_v34  ;;  %v2724_v34 = vld [vmem:[#allocation14 + $0x4c0] sm:$0xff] }
 0x76c   :  { %5058 = vmatprep.subr.bf16.mxu0 %v5057_v56  ;;  %v2729_v56 = vld [vmem:[#allocation14 + $0x4e8] sm:$0xff]  ;;  %v5071_v7 = vpack.c.bf16 %v2726_v39, %v2724_v34  ;;  %v2738_v34 = vld [vmem:[#allocation14 + $0x530] sm:$0xff]  ;;  %v2743_v39 = vld [vmem:[#allocation14 + $0x558] sm:$0xff] }
 0x76d   :  { %v5073_v2 = vpack.c.bf16 %v2731_v15, %v2729_v56 }
 0x76f   :  { %5060 = vmatpush1.bf16.msra.mxu0 %v5059_v57  ;;  %v2728_v57 = vld [vmem:[#allocation14 + $0x4e0] sm:$0xff] }
 0x770   :  { %5062 = vmatprep.subr.bf16.mxu0 %v5061_v46  ;;  %v2733_v46 = vld [vmem:[#allocation14 + $0x508] sm:$0xff]  ;;  %v5075_v60 = vpack.c.bf16 %v2730_v0, %v2728_v57  ;;  %v2742_v57 = vld [vmem:[#allocation14 + $0x550] sm:$0xff]  ;;  %v2747_v0 = vld [vmem:[#allocation14 + $0x578] sm:$0xff] }
 0x771   :  { %v5077_v54 = vpack.c.bf16 %v2735_v45, %v2733_v46 }
 0x773   :  { %5064 = vmatpush1.bf16.msra.mxu0 %v5063_v61  ;;  %v2732_v61 = vld [vmem:[#allocation14 + $0x500] sm:$0xff] }
 0x774   :  { %5066 = vmatprep.subr.bf16.mxu0 %v5065_v12  ;;  %v2737_v12 = vld [vmem:[#allocation14 + $0x528] sm:$0xff]  ;;  %v5079_v32 = vpack.c.bf16 %v2734_v27, %v2732_v61  ;;  %v2746_v61 = vld [vmem:[#allocation14 + $0x570] sm:$0xff]  ;;  %v2751_v27 = vld [vmem:[#allocation14 + $0x598] sm:$0xff] }
 0x775   :  { %v5081_v6 = vpack.c.bf16 %v2739_v14, %v2737_v12 }
 0x777   :  { %5068 = vmatpush1.bf16.msra.mxu0 %v5067_v20  ;;  %v2736_v20 = vld [vmem:[#allocation14 + $0x520] sm:$0xff] }
 0x778   :  { %5070 = vmatprep.subr.bf16.mxu0 %v5069_v18  ;;  %v2741_v18 = vld [vmem:[#allocation14 + $0x548] sm:$0xff]  ;;  %v5083_v56 = vpack.c.bf16 %v2738_v34, %v2736_v20  ;;  %v2750_v20 = vld [vmem:[#allocation14 + $0x590] sm:$0xff]  ;;  %v2755_v34 = vld [vmem:[#allocation14 + $0x5b8] sm:$0xff] }
 0x779   :  { %v5085_v15 = vpack.c.bf16 %v2743_v39, %v2741_v18 }
 0x77b   :  { %5072 = vmatpush1.bf16.msra.mxu0 %v5071_v7  ;;  %v2740_v7 = vld [vmem:[#allocation14 + $0x540] sm:$0xff] }
 0x77c   :  { %5074 = vmatprep.subr.bf16.mxu0 %v5073_v2  ;;  %v2745_v2 = vld [vmem:[#allocation14 + $0x568] sm:$0xff]  ;;  %v5087_v46 = vpack.c.bf16 %v2742_v57, %v2740_v7  ;;  %v2754_v7 = vld [vmem:[#allocation14 + $0x5b0] sm:$0xff]  ;;  %v2759_v57 = vld [vmem:[#allocation14 + $0x5d8] sm:$0xff] }
 0x77d   :  { %v5089_v45 = vpack.c.bf16 %v2747_v0, %v2745_v2 }
 0x77f   :  { %5076 = vmatpush1.bf16.msra.mxu0 %v5075_v60  ;;  %v2744_v60 = vld [vmem:[#allocation14 + $0x560] sm:$0xff] }
 0x780   :  { %5078 = vmatprep.subr.bf16.mxu0 %v5077_v54  ;;  %v2749_v54 = vld [vmem:[#allocation14 + $0x588] sm:$0xff]  ;;  %v5091_v12 = vpack.c.bf16 %v2746_v61, %v2744_v60  ;;  %v2758_v60 = vld [vmem:[#allocation14 + $0x5d0] sm:$0xff]  ;;  %v2763_v61 = vld [vmem:[#allocation14 + $0x5f8] sm:$0xff] }
 0x781   :  { %v5093_v14 = vpack.c.bf16 %v2751_v27, %v2749_v54 }
 0x783   :  { %5080 = vmatpush1.bf16.msra.mxu0 %v5079_v32  ;;  %v2748_v32 = vld [vmem:[#allocation14 + $0x580] sm:$0xff] }
 0x784   :  { %5082 = vmatprep.subr.bf16.mxu0 %v5081_v6  ;;  %v2753_v6 = vld [vmem:[#allocation14 + $0x5a8] sm:$0xff]  ;;  %v5095_v18 = vpack.c.bf16 %v2750_v20, %v2748_v32  ;;  %v2762_v32 = vld [vmem:[#allocation14 + $0x5f0] sm:$0xff] }
 0x785   :  { %v5097_v39 = vpack.c.bf16 %v2755_v34, %v2753_v6  ;;  %v3127_v20 = vld [vmem:[#allocation12 + $0x8] sm:$0xff]  ;;  %v3129_v6 = vld [vmem:[#allocation12 + $0x18] sm:$0xff]  ;;  %v3126_v34 = vld [vmem:[#allocation12] sm:$0xff] }
 0x787   :  { %5084 = vmatpush1.bf16.msra.mxu0 %v5083_v56  ;;  %v2752_v56 = vld [vmem:[#allocation14 + $0x5a0] sm:$0xff] }
 0x788   :  { %5086 = vmatprep.subr.bf16.mxu0 %v5085_v15  ;;  %v2757_v15 = vld [vmem:[#allocation14 + $0x5c8] sm:$0xff]  ;;  %v5099_v2 = vpack.c.bf16 %v2754_v7, %v2752_v56  ;;  %v3133_v7 = vld [vmem:[#allocation12 + $0x38] sm:$0xff] }
 0x789   :  { %v5101_v0 = vpack.c.bf16 %v2759_v57, %v2757_v15  ;;  %v3131_v56 = vld [vmem:[#allocation12 + $0x28] sm:$0xff] }
 0x78a   :  { %v5145_v57 = vpack.c.bf16 %v3133_v7, %v3131_v56  ;;  %v3142_v7 = vld [vmem:[#allocation12 + $0x80] sm:$0xff] }
 0x78b   :  { %5088 = vmatpush1.bf16.msra.mxu0 %v5087_v46  ;;  %v2756_v46 = vld [vmem:[#allocation14 + $0x5c0] sm:$0xff] }
 0x78c   :  { %5090 = vmatprep.subr.bf16.mxu0 %v5089_v45  ;;  %v2761_v45 = vld [vmem:[#allocation14 + $0x5e8] sm:$0xff]  ;;  %v5103_v54 = vpack.c.bf16 %v2758_v60, %v2756_v46  ;;  %v3137_v60 = vld [vmem:[#allocation12 + $0x58] sm:$0xff] }
 0x78d   :  { %v5105_v27 = vpack.c.bf16 %v2763_v61, %v2761_v45  ;;  %v3135_v46 = vld [vmem:[#allocation12 + $0x48] sm:$0xff] }
 0x78e   :  { %v5149_v61 = vpack.c.bf16 %v3137_v60, %v3135_v46  ;;  %v3146_v60 = vld [vmem:[#allocation12 + $0xa0] sm:$0xff] }
 0x78f   :  { %5092 = vmatpush1.bf16.msra.mxu0 %v5091_v12  ;;  %v2760_v12 = vld [vmem:[#allocation14 + $0x5e0] sm:$0xff] }
 0x790   :  { %5094 = vmatprep.subr.bf16.mxu0 %v5093_v14  ;;  %v5107_v14 = vpack.c.bf16 %v2762_v32, %v2760_v12  ;;  %v3141_v12 = vld [vmem:[#allocation12 + $0x78] sm:$0xff] }
 0x793   :  { %5096 = vmatpush1.bf16.msra.mxu0 %v5095_v18  ;;  %v5141_v18 = vpack.c.bf16 %v3129_v6, %v3127_v20  ;;  %v3138_v20 = vld [vmem:[#allocation12 + $0x60] sm:$0xff]  ;;  %v3140_v6 = vld [vmem:[#allocation12 + $0x70] sm:$0xff] }
 0x794   :  { %5098 = vmatprep.subr.bf16.mxu0 %v5097_v39  ;;  %v3128_v39 = vld [vmem:[#allocation12 + $0x10] sm:$0xff]  ;;  %v5155_v56 = vpack.c.bf16 %v3140_v6, %v3138_v20  ;;  %v3157_v20 = vld [vmem:[#allocation12 + $0xf8] sm:$0xff] }
 0x795   :  { %v5143_v15 = vpack.c.bf16 %v3128_v39, %v3126_v34  ;;  %5142 = vmatprep.subr.bf16.mxu1 %v5141_v18  ;;  %v3143_v34 = vld [vmem:[#allocation12 + $0x88] sm:$0xff]  ;;  %v3145_v39 = vld [vmem:[#allocation12 + $0x98] sm:$0xff] }
 0x796   :  { %v5157_v18 = vpack.c.bf16 %v3145_v39, %v3143_v34  ;;  %v3154_v39 = vld [vmem:[#allocation12 + $0xe0] sm:$0xff] }
 0x797   :  { %5100 = vmatpush1.bf16.msra.mxu0 %v5099_v2  ;;  %v3130_v2 = vld [vmem:[#allocation12 + $0x20] sm:$0xff]  ;;  %5144 = vmatpush1.bf16.msra.mxu1 %v5143_v15  ;;  %v3144_v15 = vld [vmem:[#allocation12 + $0x90] sm:$0xff] }
 0x798   :  { %5102 = vmatprep.subr.bf16.mxu0 %v5101_v0  ;;  %v3132_v0 = vld [vmem:[#allocation12 + $0x30] sm:$0xff]  ;;  %5146 = vmatprep.subr.bf16.mxu1 %v5145_v57  ;;  %v3147_v57 = vld [vmem:[#allocation12 + $0xa8] sm:$0xff] }
 0x799   :  { %v5147_v45 = vpack.c.bf16 %v3132_v0, %v3130_v2  ;;  %v3149_v2 = vld [vmem:[#allocation12 + $0xb8] sm:$0xff]  ;;  %v5159_v0 = vpack.c.bf16 %v3144_v15, %v3142_v7 }
 0x79a   :  { %v5161_v46 = vpack.c.bf16 %v3149_v2, %v3147_v57  ;;  %v3161_v7 = vld [vmem:[#allocation12 + $0x118] sm:$0xff]  ;;  %v3158_v2 = vld [vmem:[#allocation12 + $0x100] sm:$0xff] }
 0x79b   :  { %5104 = vmatpush1.bf16.msra.mxu0 %v5103_v54  ;;  %v3134_v54 = vld [vmem:[#allocation12 + $0x40] sm:$0xff]  ;;  %5148 = vmatpush1.bf16.msra.mxu1 %v5147_v45  ;;  %v3148_v45 = vld [vmem:[#allocation12 + $0xb0] sm:$0xff] }
 0x79c   :  { %5106 = vmatprep.subr.bf16.mxu0 %v5105_v27  ;;  %v3139_v27 = vld [vmem:[#allocation12 + $0x68] sm:$0xff]  ;;  %5150 = vmatprep.subr.bf16.mxu1 %v5149_v61 }
 0x79d   :  { %v3151_v61 = vld [vmem:[#allocation12 + $0xc8] sm:$0xff] }
 0x79f   :  { %5108 = vmatpush1.bf16.msra.mxu0 %v5107_v14  ;;  %v5153_v14 = vpack.c.bf16 %v3141_v12, %v3139_v27  ;;  %v3150_v12 = vld [vmem:[#allocation12 + $0xc0] sm:$0xff] }
 0x7a0   :  { %5110 = vmatprep.subr.bf16.mxu0 %v7086_v42  ;;  %v3136_v42 = vld [vmem:[#allocation12 + $0x50] sm:$0xff] }
 0x7a1   :  { %v5151_v32 = vpack.c.bf16 %v3136_v42, %v3134_v54  ;;  %v3153_v54 = vld [vmem:[#allocation12 + $0xd8] sm:$0xff]  ;;  %v5163_v42 = vpack.c.bf16 %v3148_v45, %v3146_v60 }
 0x7a2   :  { %v5165_v27 = vpack.c.bf16 %v3153_v54, %v3151_v61  ;;  %v3165_v60 = vld [vmem:[#allocation12 + $0x138] sm:$0xff]  ;;  %v3162_v54 = vld [vmem:[#allocation12 + $0x120] sm:$0xff] }
 0x7a3   :  { %5152 = vmatpush1.bf16.msra.mxu1 %v5151_v32  ;;  %v3152_v32 = vld [vmem:[#allocation12 + $0xd0] sm:$0xff] }
 0x7a4   :  { %5154 = vmatprep.subr.bf16.mxu1 %v5153_v14  ;;  %v3155_v14 = vld [vmem:[#allocation12 + $0xe8] sm:$0xff]  ;;  %v5167_v6 = vpack.c.bf16 %v3152_v32, %v3150_v12 }
 0x7a5   :  { %v5169_v34 = vpack.c.bf16 %v3157_v20, %v3155_v14  ;;  %v3167_v32 = vld [vmem:[#allocation12 + $0x148] sm:$0xff]  ;;  %v3169_v14 = vld [vmem:[#allocation12 + $0x158] sm:$0xff] }
 0x7a7   :  { %5156 = vmatpush1.bf16.msra.mxu1 %v5155_v56  ;;  %v3156_v56 = vld [vmem:[#allocation12 + $0xf0] sm:$0xff] }
 0x7a8   :  { %5158 = vmatprep.subr.bf16.mxu1 %v5157_v18  ;;  %v3159_v18 = vld [vmem:[#allocation12 + $0x108] sm:$0xff]  ;;  %v5171_v15 = vpack.c.bf16 %v3156_v56, %v3154_v39  ;;  %v3168_v39 = vld [vmem:[#allocation12 + $0x150] sm:$0xff] }
 0x7a9   :  { %v5173_v57 = vpack.c.bf16 %v3161_v7, %v3159_v18  ;;  %v3171_v56 = vld [vmem:[#allocation12 + $0x168] sm:$0xff]  ;;  %v3173_v18 = vld [vmem:[#allocation12 + $0x178] sm:$0xff] }
 0x7ab   :  { %5160 = vmatpush1.bf16.msra.mxu1 %v5159_v0  ;;  %v3160_v0 = vld [vmem:[#allocation12 + $0x110] sm:$0xff] }
 0x7ac   :  { %5162 = vmatprep.subr.bf16.mxu1 %v5161_v46  ;;  %v3163_v46 = vld [vmem:[#allocation12 + $0x128] sm:$0xff]  ;;  %v5175_v45 = vpack.c.bf16 %v3160_v0, %v3158_v2  ;;  %v3172_v2 = vld [vmem:[#allocation12 + $0x170] sm:$0xff]  ;;  %v3177_v0 = vld [vmem:[#allocation12 + $0x198] sm:$0xff] }
 0x7ad   :  { %v5177_v12 = vpack.c.bf16 %v3165_v60, %v3163_v46  ;;  %v3174_v60 = vld [vmem:[#allocation12 + $0x180] sm:$0xff] }
 0x7af   :  { %5164 = vmatpush1.bf16.msra.mxu1 %v5163_v42  ;;  %v3164_v42 = vld [vmem:[#allocation12 + $0x130] sm:$0xff] }
 0x7b0   :  { %5166 = vmatprep.subr.bf16.mxu1 %v5165_v27  ;;  %v5179_v20 = vpack.c.bf16 %v3164_v42, %v3162_v54  ;;  %v3178_v42 = vld [vmem:[#allocation12 + $0x1a0] sm:$0xff] }
 0x7b3   :  { %5168 = vmatpush1.bf16.msra.mxu1 %v5167_v6  ;;  %v5181_v6 = vpack.c.bf16 %v3169_v14, %v3167_v32  ;;  %v3182_v14 = vld [vmem:[#allocation12 + $0x1c0] sm:$0xff] }
 0x7b4   :  { %5170 = vmatprep.subr.bf16.mxu1 %v5169_v34  ;;  %v3166_v34 = vld [vmem:[#allocation12 + $0x140] sm:$0xff] }
 0x7b5   :  { %v5183_v7 = vpack.c.bf16 %v3168_v39, %v3166_v34  ;;  %v5766_v39 = vld [vmem:[#allocation3 + $0x38] sm:$0xff] }
 0x7b7   :  { %5172 = vmatpush1.bf16.msra.mxu1 %v5171_v15  ;;  %v5185_v15 = vpack.c.bf16 %v3173_v18, %v3171_v56  ;;  %v5767_v56 = vld [vmem:[#allocation3 + $0x40] sm:$0xff]  ;;  %v5768_v18 = vld [vmem:[#allocation3 + $0x48] sm:$0xff] }
 0x7b8   :  { %5174 = vmatprep.subr.bf16.mxu1 %v5173_v57  ;;  %v3170_v57 = vld [vmem:[#allocation12 + $0x160] sm:$0xff] }
 0x7b9   :  { %v5187_v46 = vpack.c.bf16 %v3172_v2, %v3170_v57  ;;  %v5771_v57 = vld [vmem:[#allocation3 + $0x60] sm:$0xff]  ;;  %v5772_v2 = vld [vmem:[#allocation3 + $0x68] sm:$0xff] }
 0x7bb   :  { %5176 = vmatpush1.bf16.msra.mxu1 %v5175_v45  ;;  %v3176_v45 = vld [vmem:[#allocation12 + $0x190] sm:$0xff] }
 0x7bc   :  { %5178 = vmatprep.subr.bf16.mxu1 %v5177_v12  ;;  %v5191_v54 = vpack.c.bf16 %v3176_v45, %v3174_v60  ;;  %v3183_v12 = vld [vmem:[#allocation12 + $0x1c8] sm:$0xff] }
 0x7bd   :  { %v3191_v45 = vld [vmem:[#allocation12 + $0x208] sm:$0xff] }
 0x7bf   :  { %5180 = vmatpush1.bf16.msra.mxu1 %v5179_v20  ;;  %v3184_v20 = vld [vmem:[#allocation12 + $0x1d0] sm:$0xff] }
 0x7c0   :  { %5182 = vmatprep.subr.bf16.mxu1 %v5181_v6  ;;  %v3187_v6 = vld [vmem:[#allocation12 + $0x1e8] sm:$0xff]  ;;  %v5199_v34 = vpack.c.bf16 %v3184_v20, %v3182_v14  ;;  %v3194_v14 = vld [vmem:[#allocation12 + $0x220] sm:$0xff]  ;;  %v3196_v20 = vld [vmem:[#allocation12 + $0x230] sm:$0xff] }
 0x7c3   :  { %5184 = vmatpush1.bf16.msra.mxu1 %v5183_v7  ;;  %v5769_v7 = vld [vmem:[#allocation3 + $0x50] sm:$0xff] }
 0x7c4   :  { %5186 = vmatprep.subr.bf16.mxu1 %v5185_v15  ;;  %v5770_v15 = vld [vmem:[#allocation3 + $0x58] sm:$0xff] }
 0x7c7   :  { %5188 = vmatpush1.bf16.msra.mxu1 %v5187_v46  ;;  %v3186_v46 = vld [vmem:[#allocation12 + $0x1e0] sm:$0xff] }
 0x835   :  { %v2694_v61 = vpop.f32.mrb[54].mxu0 }
 0x836   :  { %v2696_v27 = vpop.f32.mrb[55].mxu0 }
 0x837   :  { %2828 = vmatprep.mubr.f32.mxu0 %v2696_v27  ;;  %v3180_v27 = vld [vmem:[#allocation12 + $0x1b0] sm:$0xff] }
 0x838   :  { %2829 = vmatmul.mubr.f32.vlgmr.msra.gmra.mrb[52].mxu0 %v2694_v61  ;;  %v3179_v61 = vld [vmem:[#allocation12 + $0x1a8] sm:$0xff]  ;;  %v5195_v32 = vpack.c.bf16 %v3180_v27, %v3178_v42  ;;  %v3197_v27 = vld [vmem:[#allocation12 + $0x238] sm:$0xff] }
 0x839   :  { %5112 = vmatpush1.bf16.msra.mxu0 %v7092_v58  ;;  %2901 = vmatprep.mubr.f32.mxu0 %v7652_v26  ;;  %v3175_v58 = vld [vmem:[#allocation12 + $0x188] sm:$0xff] }
 0x83a   :  { %5114 = vmatprep.subr.bf16.mxu0 %v7116_v44  ;;  %v5189_v44 = vpack.c.bf16 %v3177_v0, %v3175_v58  ;;  %v5773_v58 = vld [vmem:[#allocation3 + $0x70] sm:$0xff]  ;;  %v5774_v0 = vld [vmem:[#allocation3 + $0x78] sm:$0xff]  ;;  %v3195_v42 = vld [vmem:[#allocation12 + $0x228] sm:$0xff] }
 0x83c   :  { %5190 = vmatprep.subr.bf16.mxu1 %v5189_v44  ;;  %v3188_v44 = vld [vmem:[#allocation12 + $0x1f0] sm:$0xff] }
 0x83d   :  { %5116 = vmatpush1.bf16.msra.mxu0 %v7122_v19  ;;  %v3181_v19 = vld [vmem:[#allocation12 + $0x1b8] sm:$0xff]  ;;  %5192 = vmatpush1.bf16.msra.mxu1 %v5191_v54  ;;  %v5203_v60 = vpack.c.bf16 %v3188_v44, %v3186_v46  ;;  %v3190_v54 = vld [vmem:[#allocation12 + $0x200] sm:$0xff] }
 0x83e   :  { %5118 = vmatprep.subr.bf16.mxu0 %v7146_v43  ;;  %v5193_v43 = vpack.c.bf16 %v3181_v19, %v3179_v61  ;;  %v3193_v61 = vld [vmem:[#allocation12 + $0x218] sm:$0xff]  ;;  %v3206_v44 = vld [vmem:[#allocation12 + $0x280] sm:$0xff] }
 0x83f   :  { %v5205_v19 = vpack.c.bf16 %v3193_v61, %v3191_v45  ;;  %v3211_v45 = vld [vmem:[#allocation12 + $0x2a8] sm:$0xff]  ;;  %v3213_v61 = vld [vmem:[#allocation12 + $0x2b8] sm:$0xff] }
 0x840   :  { %5194 = vmatprep.subr.bf16.mxu1 %v5193_v43  ;;  %v3192_v43 = vld [vmem:[#allocation12 + $0x210] sm:$0xff] }
 0x841   :  { %5120 = vmatpush1.bf16.msra.mxu0 %v7152_v40  ;;  %v3185_v40 = vld [vmem:[#allocation12 + $0x1d8] sm:$0xff]  ;;  %5196 = vmatpush1.bf16.msra.mxu1 %v5195_v32 }
 0x842   :  { %5122 = vmatprep.subr.bf16.mxu0 %v7176_v17  ;;  %v5197_v17 = vpack.c.bf16 %v3185_v40, %v3183_v12  ;;  %v5207_v40 = vpack.c.bf16 %v3192_v43, %v3190_v54 }
 0x844   :  { %5198 = vmatprep.subr.bf16.mxu1 %v5197_v17  ;;  %v5209_v17 = vpack.c.bf16 %v3197_v27, %v3195_v42  ;;  %v5225_v42 = vpack.c.bf16 %v3213_v61, %v3211_v45  ;;  %v3210_v27 = vld [vmem:[#allocation12 + $0x2a0] sm:$0xff] }
 0x845   :  { %5124 = vmatpush1.bf16.msra.mxu0 %v7182_v31  ;;  %v3189_v31 = vld [vmem:[#allocation12 + $0x1f8] sm:$0xff]  ;;  %5200 = vmatpush1.bf16.msra.mxu1 %v5199_v34  ;;  %v5211_v34 = vpack.c.bf16 %v3196_v20, %v3194_v14  ;;  %v3226_v61 = vld [vmem:[#allocation12 + $0x320] sm:$0xff] }
 0x846   :  { %5126 = vmatprep.subr.bf16.mxu0 %v7206_v23  ;;  %v5201_v23 = vpack.c.bf16 %v3189_v31, %v3187_v6  ;;  %v3201_v6 = vld [vmem:[#allocation12 + $0x258] sm:$0xff] }
 0x848   :  { %5202 = vmatprep.subr.bf16.mxu1 %v5201_v23 }
 0x849   :  { %5128 = vmatpush1.bf16.msra.mxu0 %v7212_v36  ;;  %v5759_v36 = vld [vmem:[#allocation3] sm:$0xff]  ;;  %5204 = vmatpush1.bf16.msra.mxu1 %v5203_v60  ;;  %v3208_v60 = vld [vmem:[#allocation12 + $0x290] sm:$0xff] }
 0x84a   :  { %5130 = vmatprep.subr.bf16.mxu0 %v7236_v30  ;;  %v5760_v30 = vld [vmem:[#allocation3 + $0x8] sm:$0xff]  ;;  %5206 = vmatprep.subr.bf16.mxu1 %v5205_v19  ;;  %v5223_v54 = vpack.c.bf16 %v3208_v60, %v3206_v44 }
 0x84d   :  { %5132 = vmatpush1.bf16.msra.mxu0 %v7242_v8  ;;  %v5761_v8 = vld [vmem:[#allocation3 + $0x10] sm:$0xff] }
 0x84e   :  { %5134 = vmatprep.subr.bf16.mxu0 %v7266_v50  ;;  %v5762_v50 = vld [vmem:[#allocation3 + $0x18] sm:$0xff] }
 0x851   :  { %5136 = vmatpush1.bf16.msra.mxu0 %v7272_v63  ;;  %v5763_v63 = vld [vmem:[#allocation3 + $0x20] sm:$0xff] }
 0x852   :  { %5138 = vmatprep.subr.bf16.mxu0 %v7296_v9  ;;  %v5764_v9 = vld [vmem:[#allocation3 + $0x28] sm:$0xff] }
 0x855   :  { %5140 = vmatpush1.bf16.msra.mxu0 %v7302_v11  ;;  %v5765_v11 = vld [vmem:[#allocation3 + $0x30] sm:$0xff] }
 0x858   :  { %2902 = vmatmul.mubr.f32.vlgmr.msra.gmra.mrb[56].mxu0 %v5759_v36 }
 0x859   :  { %2907 = vmatprep.mubr.f32.mxu0 %v7652_v26 }
 0x85c   :  { %2908 = vmatmul.mubr.f32.gmra.mrb[58].mxu0 %v5760_v30  ;;  %v3198_v30 = vld [vmem:[#allocation12 + $0x240] sm:$0xff] }
 0x85d   :  { %2913 = vmatprep.mubr.f32.mxu0 %v7652_v26 }
 0x860   :  { %2914 = vmatmul.mubr.f32.gmra.mrb[60].mxu0 %v5761_v8  ;;  %v3200_v8 = vld [vmem:[#allocation12 + $0x250] sm:$0xff] }
 0x861   :  { %2919 = vmatprep.mubr.f32.mxu0 %v7652_v26 }
 0x864   :  { %2920 = vmatmul.mubr.f32.gmra.mrb[62].mxu0 %v5762_v50  ;;  %v3203_v50 = vld [vmem:[#allocation12 + $0x268] sm:$0xff] }
 0x865   :  { %2925 = vmatprep.mubr.f32.mxu0 %v7652_v26 }
 0x868   :  { %2926 = vmatmul.mubr.f32.gmra.mrb[64].mxu0 %v5763_v63  ;;  %v3205_v63 = vld [vmem:[#allocation12 + $0x278] sm:$0xff] }
 0x869   :  { %2931 = vmatprep.mubr.f32.mxu0 %v7652_v26 }
 0x86c   :  { %2932 = vmatmul.mubr.f32.gmra.mrb[66].mxu0 %v5764_v9 }
 0x86d   :  { %2937 = vmatprep.mubr.f32.mxu0 %v7652_v26 }
 0x870   :  { %2938 = vmatmul.mubr.f32.gmra.mrb[68].mxu0 %v5765_v11  ;;  %v5215_v11 = vpack.c.bf16 %v3200_v8, %v3198_v30 }
 0x871   :  { %2943 = vmatprep.mubr.f32.mxu0 %v7652_v26 }
 0x874   :  { %2944 = vmatmul.mubr.f32.gmra.mrb[70].mxu0 %v5766_v39 }
 0x875   :  { %2949 = vmatprep.mubr.f32.mxu0 %v7652_v26 }
 0x878   :  { %2950 = vmatmul.mubr.f32.gmra.mrb[72].mxu0 %v5767_v56  ;;  %v5217_v56 = vpack.c.bf16 %v3205_v63, %v3203_v50  ;;  %v3218_v63 = vld [vmem:[#allocation12 + $0x2e0] sm:$0xff] }
 0x879   :  { %2955 = vmatprep.mubr.f32.mxu0 %v7652_v26 }
 0x87c   :  { %2956 = vmatmul.mubr.f32.gmra.mrb[74].mxu0 %v5768_v18  ;;  %v3202_v18 = vld [vmem:[#allocation12 + $0x260] sm:$0xff] }
 0x87d   :  { %2961 = vmatprep.mubr.f32.mxu0 %v7652_v26 }
 0x880   :  { %2962 = vmatmul.mubr.f32.gmra.mrb[76].mxu0 %v5769_v7  ;;  %v3204_v7 = vld [vmem:[#allocation12 + $0x270] sm:$0xff] }
 0x881   :  { %2967 = vmatprep.mubr.f32.mxu0 %v7652_v26 }
 0x884   :  { %2968 = vmatmul.mubr.f32.gmra.mrb[78].mxu0 %v5770_v15  ;;  %v3207_v15 = vld [vmem:[#allocation12 + $0x288] sm:$0xff] }
 0x885   :  { %2973 = vmatprep.mubr.f32.mxu0 %v7652_v26 }
 0x888   :  { %2974 = vmatmul.mubr.f32.gmra.mrb[80].mxu0 %v5771_v57  ;;  %v3209_v57 = vld [vmem:[#allocation12 + $0x298] sm:$0xff] }
 0x889   :  { %2979 = vmatprep.mubr.f32.mxu0 %v7652_v26  ;;  %v5221_v46 = vpack.c.bf16 %v3209_v57, %v3207_v15  ;;  %v3222_v57 = vld [vmem:[#allocation12 + $0x300] sm:$0xff] }
 0x88c   :  { %2980 = vmatmul.mubr.f32.gmra.mrb[82].mxu0 %v5772_v2 }
 0x88d   :  { %2985 = vmatprep.mubr.f32.mxu0 %v7652_v26 }
 0x890   :  { %2986 = vmatmul.mubr.f32.gmra.mrb[84].mxu0 %v5773_v58  ;;  %v5219_v58 = vpack.c.bf16 %v3204_v7, %v3202_v18 }
 0x891   :  { %2991 = vmatprep.mubr.f32.mxu0 %v7652_v26 }
 0x894   :  { %2992 = vmatmul.mubr.f32.gmra.mrb[86].mxu0 %v5774_v0 }
 0x895   :  { %3684 = vmatprep.mubr.f32.mxu0 %v7652_v26  ;;  %v3199_v26 = vld [vmem:[#allocation12 + $0x248] sm:$0xff] }
 0x896   :  { %v5213_v36 = vpack.c.bf16 %v3201_v6, %v3199_v26  ;;  %v3214_v6 = vld [vmem:[#allocation12 + $0x2c0] sm:$0xff] }
 0x92b   :  { %v2903_v12 = vpop.f32.mrb[56].mxu0 }
 0x92c   :  { %v2905_v32 = vpop.f32.mrb[57].mxu0 }
 0x92d   :  { %3330 = vmatprep.mubr.f32.mxu1 %v2905_v32  ;;  %v3217_v32 = vld [vmem:[#allocation12 + $0x2d8] sm:$0xff] }
 0x92e   :  { %3331 = vmatmul.mubr.f32.vlgmr.msra.gmra.mrb[128].mxu1 %v2903_v12  ;;  %v3212_v12 = vld [vmem:[#allocation12 + $0x2b0] sm:$0xff] }
 0x92f   :  { %v2909_v31 = vpop.f32.mrb[58].mxu0  ;;  %5208 = vmatpush1.bf16.msra.mxu1 %v5207_v40  ;;  %v3215_v40 = vld [vmem:[#allocation12 + $0x2c8] sm:$0xff]  ;;  %v5227_v14 = vpack.c.bf16 %v3212_v12, %v3210_v27 }
 0x930   :  { %v2911_v23 = vpop.f32.mrb[59].mxu0  ;;  %5210 = vmatprep.subr.bf16.mxu1 %v5209_v17  ;;  %v5229_v26 = vpack.c.bf16 %v3217_v32, %v3215_v40  ;;  %v3230_v32 = vld [vmem:[#allocation12 + $0x340] sm:$0xff] }
 0x931   :  { %3336 = vmatprep.mubr.f32.mxu1 %v2911_v23  ;;  %v3221_v23 = vld [vmem:[#allocation12 + $0x2f8] sm:$0xff] }
 0x932   :  { %3337 = vmatmul.mubr.f32.gmra.mrb[130].mxu1 %v2909_v31  ;;  %v3216_v31 = vld [vmem:[#allocation12 + $0x2d0] sm:$0xff] }
 0x933   :  { %v2915_v9 = vpop.f32.mrb[60].mxu0  ;;  %5212 = vmatpush1.bf16.msra.mxu1 %v5211_v34  ;;  %v3219_v34 = vld [vmem:[#allocation12 + $0x2e8] sm:$0xff]  ;;  %v5231_v30 = vpack.c.bf16 %v3216_v31, %v3214_v6 }
 0x934   :  { %v2917_v39 = vpop.f32.mrb[61].mxu0  ;;  %5214 = vmatprep.subr.bf16.mxu1 %v5213_v36  ;;  %v5233_v50 = vpack.c.bf16 %v3221_v23, %v3219_v34  ;;  %v3234_v23 = vld [vmem:[#allocation12 + $0x360] sm:$0xff] }
 0x935   :  { %3342 = vmatprep.mubr.f32.mxu1 %v2917_v39  ;;  %v3225_v39 = vld [vmem:[#allocation12 + $0x318] sm:$0xff] }
 0x936   :  { %3343 = vmatmul.mubr.f32.gmra.mrb[132].mxu1 %v2915_v9  ;;  %v3220_v9 = vld [vmem:[#allocation12 + $0x2f0] sm:$0xff] }
 0x937   :  { %v2921_v2 = vpop.f32.mrb[62].mxu0  ;;  %5216 = vmatpush1.bf16.msra.mxu1 %v5215_v11  ;;  %v3223_v11 = vld [vmem:[#allocation12 + $0x308] sm:$0xff]  ;;  %v5235_v18 = vpack.c.bf16 %v3220_v9, %v3218_v63 }
 0x938   :  { %v2923_v0 = vpop.f32.mrb[63].mxu0  ;;  %5218 = vmatprep.subr.bf16.mxu1 %v5217_v56  ;;  %v5237_v15 = vpack.c.bf16 %v3225_v39, %v3223_v11  ;;  %v3238_v39 = vld [vmem:[#allocation12 + $0x380] sm:$0xff] }
 0x939   :  { %3348 = vmatprep.mubr.f32.mxu1 %v2923_v0  ;;  %v3229_v0 = vld [vmem:[#allocation12 + $0x338] sm:$0xff] }
 0x93a   :  { %3349 = vmatmul.mubr.f32.gmra.mrb[134].mxu1 %v2921_v2  ;;  %v3224_v2 = vld [vmem:[#allocation12 + $0x310] sm:$0xff] }
 0x93b   :  { %v2927_v19 = vpop.f32.mrb[64].mxu0  ;;  %5220 = vmatpush1.bf16.msra.mxu1 %v5219_v58  ;;  %v3227_v58 = vld [vmem:[#allocation12 + $0x328] sm:$0xff]  ;;  %v5239_v44 = vpack.c.bf16 %v3224_v2, %v3222_v57 }
 0x93c   :  { %v2929_v43 = vpop.f32.mrb[65].mxu0  ;;  %5222 = vmatprep.subr.bf16.mxu1 %v5221_v46  ;;  %v5241_v45 = vpack.c.bf16 %v3229_v0, %v3227_v58  ;;  %v3242_v0 = vld [vmem:[#allocation12 + $0x3a0] sm:$0xff] }
 0x93d   :  { %3354 = vmatprep.mubr.f32.mxu1 %v2929_v43  ;;  %v3233_v43 = vld [vmem:[#allocation12 + $0x358] sm:$0xff] }
 0x93e   :  { %3355 = vmatmul.mubr.f32.gmra.mrb[136].mxu1 %v2927_v19  ;;  %v3228_v19 = vld [vmem:[#allocation12 + $0x330] sm:$0xff] }
 0x93f   :  { %v2933_v17 = vpop.f32.mrb[66].mxu0  ;;  %5224 = vmatpush1.bf16.msra.mxu1 %v5223_v54  ;;  %v3231_v54 = vld [vmem:[#allocation12 + $0x348] sm:$0xff]  ;;  %v5243_v27 = vpack.c.bf16 %v3228_v19, %v3226_v61 }
 0x940   :  { %v2935_v20 = vpop.f32.mrb[67].mxu0  ;;  %5226 = vmatprep.subr.bf16.mxu1 %v5225_v42  ;;  %v5245_v40 = vpack.c.bf16 %v3233_v43, %v3231_v54  ;;  %v3246_v43 = vld [vmem:[#allocation12 + $0x3c0] sm:$0xff] }
 0x941   :  { %3360 = vmatprep.mubr.f32.mxu1 %v2935_v20  ;;  %v3237_v20 = vld [vmem:[#allocation12 + $0x378] sm:$0xff] }
 0x942   :  { %3361 = vmatmul.mubr.f32.gmra.mrb[138].mxu1 %v2933_v17  ;;  %v3232_v17 = vld [vmem:[#allocation12 + $0x350] sm:$0xff] }
 0x943   :  { %v2939_v36 = vpop.f32.mrb[68].mxu0  ;;  %5228 = vmatpush1.bf16.msra.mxu1 %v5227_v14  ;;  %v3235_v14 = vld [vmem:[#allocation12 + $0x368] sm:$0xff]  ;;  %v5247_v6 = vpack.c.bf16 %v3232_v17, %v3230_v32 }
 0x944   :  { %v2941_v8 = vpop.f32.mrb[69].mxu0  ;;  %5230 = vmatprep.subr.bf16.mxu1 %v5229_v26  ;;  %v5249_v34 = vpack.c.bf16 %v3237_v20, %v3235_v14  ;;  %v3250_v20 = vld [vmem:[#allocation12 + $0x3e0] sm:$0xff] }
 0x945   :  { %3366 = vmatprep.mubr.f32.mxu1 %v2941_v8  ;;  %v3241_v8 = vld [vmem:[#allocation12 + $0x398] sm:$0xff] }
 0x946   :  { %3367 = vmatmul.mubr.f32.gmra.mrb[140].mxu1 %v2939_v36  ;;  %v3236_v36 = vld [vmem:[#allocation12 + $0x370] sm:$0xff] }
 0x947   :  { %v2945_v56 = vpop.f32.mrb[70].mxu0  ;;  %5232 = vmatpush1.bf16.msra.mxu1 %v5231_v30  ;;  %v3239_v30 = vld [vmem:[#allocation12 + $0x388] sm:$0xff]  ;;  %v5251_v63 = vpack.c.bf16 %v3236_v36, %v3234_v23  ;;  %v7731_v23 = vmax.f32 %v7067_v4, 0.0  ;;  %v7732_v36 = vmax.f32 %v7070_v10, 0.0  ;;  %v7738_v4 = vmax.f32 %v7102_v59, 0.0 }
 0x948   :  { %v2947_v7 = vpop.f32.mrb[71].mxu0  ;;  %5234 = vmatprep.subr.bf16.mxu1 %v5233_v50  ;;  %v5253_v11 = vpack.c.bf16 %v3241_v8, %v3239_v30  ;;  %v7733_v30 = vmax.f32 %v7076_v62, 0.0  ;;  %v7734_v8 = vmax.f32 %v7073_v28, 0.0  ;;  %v7739_v10 = vmax.f32 %v7125_v55, 0.0 }
 0x949   :  { %3372 = vmatprep.mubr.f32.mxu1 %v2947_v7  ;;  %v3245_v7 = vld [vmem:[#allocation12 + $0x3b8] sm:$0xff]  ;;  %v7740_v62 = vmax.f32 %v7129_v48, 0.0  ;;  %v7741_v28 = vmax.f32 %v7136_v29, 0.0  ;;  %v7745_v59 = vmax.f32 %v7166_v51, 0.0  ;;  %v7746_v55 = vmax.f32 %v7162_v35, 0.0 }
 0x94a   :  { %3373 = vmatmul.mubr.f32.gmra.mrb[142].mxu1 %v2945_v56  ;;  %v3240_v56 = vld [vmem:[#allocation12 + $0x390] sm:$0xff]  ;;  %v7747_v48 = vmax.f32 %v7185_v13, 0.0  ;;  %v7748_v29 = vmax.f32 %v7189_v21, 0.0  ;;  %v7752_v51 = vmax.f32 %v7219_v41, 0.0  ;;  %v7753_v35 = vmax.f32 %v7226_v37, 0.0  ;;  %v7760_v41 = vld [vmem:[#allocation31_spill] sm:$0xff] }
 0x94b   :  { %v2951_v46 = vpop.f32.mrb[72].mxu0  ;;  %5236 = vmatpush1.bf16.msra.mxu1 %v5235_v18  ;;  %v3243_v18 = vld [vmem:[#allocation12 + $0x3a8] sm:$0xff]  ;;  %v5255_v57 = vpack.c.bf16 %v3240_v56, %v3238_v39  ;;  %v7754_v13 = vmax.f32 %v7222_v1, 0.0  ;;  %v7755_v21 = vmax.f32 %v7245_v5, 0.0  ;;  %v7761_v39 = vmax.f32 %v7760_v41, 0.0  ;;  %v7764_v1 = vld [vmem:[#allocation33_spill] sm:$0xff] }
 0x94c   :  { %v2953_v60 = vpop.f32.mrb[73].mxu0  ;;  %5238 = vmatprep.subr.bf16.mxu1 %v5237_v15  ;;  %v5257_v58 = vpack.c.bf16 %v3245_v7, %v3243_v18  ;;  %v7762_v37 = vld [vmem:[#allocation32_spill] sm:$0xff]  ;;  %v7765_v18 = vmax.f32 %v7764_v1, 0.0  ;;  %v7766_v5 = vld [vmem:[#allocation34_spill] sm:$0xff] }
 0x94d   :  { %3378 = vmatprep.mubr.f32.mxu1 %v2953_v60  ;;  %v3249_v60 = vld [vmem:[#allocation12 + $0x3d8] sm:$0xff]  ;;  %v7763_v56 = vmax.f32 %v7762_v37, 0.0  ;;  %v7767_v7 = vmax.f32 %v7766_v5, 0.0 }
 0x94e   :  { %3379 = vmatmul.mubr.f32.gmra.mrb[144].mxu1 %v2951_v46  ;;  %v3244_v46 = vld [vmem:[#allocation12 + $0x3b0] sm:$0xff] }
 0x94f   :  { %v2957_v42 = vpop.f32.mrb[74].mxu0  ;;  %5240 = vmatpush1.bf16.msra.mxu1 %v5239_v44  ;;  %v3247_v44 = vld [vmem:[#allocation12 + $0x3c8] sm:$0xff]  ;;  %v5259_v61 = vpack.c.bf16 %v3244_v46, %v3242_v0 }
 0x950   :  { %v2959_v12 = vpop.f32.mrb[75].mxu0  ;;  %5242 = vmatprep.subr.bf16.mxu1 %v5241_v45  ;;  %v5261_v54 = vpack.c.bf16 %v3249_v60, %v3247_v44 }
 0x951   :  { %3384 = vmatprep.mubr.f32.mxu1 %v2959_v12  ;;  %v3253_v12 = vld [vmem:[#allocation12 + $0x3f8] sm:$0xff] }
 0x952   :  { %3385 = vmatmul.mubr.f32.gmra.mrb[146].mxu1 %v2957_v42  ;;  %v3248_v42 = vld [vmem:[#allocation12 + $0x3d0] sm:$0xff] }
 0x953   :  { %v2963_v26 = vpop.f32.mrb[76].mxu0  ;;  %5244 = vmatpush1.bf16.msra.mxu1 %v5243_v27  ;;  %v3251_v27 = vld [vmem:[#allocation12 + $0x3e8] sm:$0xff]  ;;  %v5263_v32 = vpack.c.bf16 %v3248_v42, %v3246_v43 }
 0x954   :  { %v2965_v31 = vpop.f32.mrb[77].mxu0  ;;  %5246 = vmatprep.subr.bf16.mxu1 %v5245_v40  ;;  %v5265_v14 = vpack.c.bf16 %v3253_v12, %v3251_v27 }
 0x955   :  { %3390 = vmatprep.mubr.f32.mxu1 %v2965_v31 }
 0x956   :  { %3391 = vmatmul.mubr.f32.gmra.mrb[148].mxu1 %v2963_v26  ;;  %v3252_v26 = vld [vmem:[#allocation12 + $0x3f0] sm:$0xff] }
 0x957   :  { %v2969_v50 = vpop.f32.mrb[78].mxu0  ;;  %5248 = vmatpush1.bf16.msra.mxu1 %v5247_v6  ;;  %v5267_v31 = vpack.c.bf16 %v3252_v26, %v3250_v20 }
 0x958   :  { %v2971_v9 = vpop.f32.mrb[79].mxu0  ;;  %5250 = vmatprep.subr.bf16.mxu1 %v5249_v34 }
 0x959   :  { %3396 = vmatprep.mubr.f32.mxu1 %v2971_v9  ;;  %v7737_v9 = vmax.f32 %v7106_v3, 0.0  ;;  %v7744_v3 = vmax.f32 %v7159_v25, 0.0  ;;  %v7751_v25 = vmax.f32 %v7215_v52, 0.0  ;;  %v7758_v52 = vld [vmem:[#allocation30_spill] sm:$0xff] }
 0x95a   :  { %3397 = vmatmul.mubr.f32.gmra.mrb[150].mxu1 %v2969_v50  ;;  %v7735_v50 = vmax.f32 %v7095_v22, 0.0  ;;  %v7742_v22 = vmax.f32 %v7132_v33, 0.0  ;;  %v7749_v33 = vmax.f32 %v7196_v47, 0.0  ;;  %v7756_v47 = vmax.f32 %v7249_v24, 0.0  ;;  %v3254_v24 = vld [vmem:[%s7494_s11] sm:$0x3] }
 0x95b   :  { %v2975_v15 = vpop.f32.mrb[80].mxu0  ;;  %5252 = vmatpush1.bf16.msra.mxu1 %v5251_v63  ;;  %v7736_v63 = vmax.f32 %v7099_v16, 0.0  ;;  %v7743_v16 = vmax.f32 %v7155_v38, 0.0  ;;  %v7750_v38 = vmax.f32 %v7192_v53, 0.0  ;;  %v7757_v53 = vmax.f32 %v7256_v49, 0.0  ;;  %v7768_v49 = vld [vmem:[#allocation29_spill] sm:$0xff] }
 0x95c   :  { %v2977_v2 = vpop.f32.mrb[81].mxu0  ;;  %5254 = vmatprep.subr.bf16.mxu1 %v5253_v11  ;;  %v7759_v11 = vmax.f32 %v7758_v52, 0.0 }
 0x95d   :  { %3402 = vmatprep.mubr.f32.mxu1 %v2977_v2  ;;  %v7769_v2 = vld [vmem:[#allocation28_spill] sm:$0xff] }
 0x95e   :  { %3403 = vmatmul.mubr.f32.gmra.mrb[152].mxu1 %v2975_v15  ;;  %v7410_v15 = vrot.slane %v3254_v24, %v7768_v49 }
 0x95f   :  { %v2981_v45 = vpop.f32.mrb[82].mxu0  ;;  %5256 = vmatpush1.bf16.msra.mxu1 %v5255_v57 }
 0x960   :  { %v2983_v19 = vpop.f32.mrb[83].mxu0  ;;  %5258 = vmatprep.subr.bf16.mxu1 %v5257_v58  ;;  %v7413_v58 = vrot.slane %v3254_v24, %v7769_v2 }
 0x961   :  { %3408 = vmatprep.mubr.f32.mxu1 %v2983_v19 }
 0x962   :  { %3409 = vmatmul.mubr.f32.gmra.mrb[154].mxu1 %v2981_v45 }
 0x963   :  { %v2987_v40 = vpop.f32.mrb[84].mxu0  ;;  %5260 = vmatpush1.bf16.msra.mxu1 %v5259_v61 }
 0x964   :  { %v2989_v17 = vpop.f32.mrb[85].mxu0  ;;  %5262 = vmatprep.subr.bf16.mxu1 %v5261_v54 }
 0x965   :  { %3414 = vmatprep.mubr.f32.mxu1 %v2989_v17 }
 0x966   :  { %3415 = vmatmul.mubr.f32.gmra.mrb[156].mxu1 %v2987_v40 }
 0x967   :  { %v2993_v6 = vpop.f32.mrb[86].mxu0  ;;  %5264 = vmatpush1.bf16.msra.mxu1 %v5263_v32 }
 0x968   :  { %v2995_v34 = vpop.f32.mrb[87].mxu0  ;;  %5266 = vmatprep.subr.bf16.mxu1 %v5265_v14 }
 0x969   :  { %3420 = vmatprep.mubr.f32.mxu1 %v2995_v34 }
 0x96a   :  { %3421 = vmatmul.mubr.f32.gmra.mrb[158].mxu1 %v2993_v6 }
 0x96b   :  { %5268 = vmatpush1.bf16.msra.mxu1 %v5267_v31  ;;  %3491 = vmatprep.mubr.f32.mxu1 %v7731_v23 }
 0x96e   :  { %3492 = vmatmul.mubr.f32.vlgmr.msra.gmra.mrb[128].mxu1 %v7732_v36 }
 0x96f   :  { %3497 = vmatprep.mubr.f32.mxu1 %v7733_v30 }
 0x972   :  { %3498 = vmatmul.mubr.f32.gmra.mrb[130].mxu1 %v7734_v8 }
 0x973   :  { %3503 = vmatprep.mubr.f32.mxu1 %v7735_v50 }
 0x976   :  { %3504 = vmatmul.mubr.f32.gmra.mrb[132].mxu1 %v7736_v63 }
 0x977   :  { %3509 = vmatprep.mubr.f32.mxu1 %v7737_v9 }
 0x97a   :  { %3510 = vmatmul.mubr.f32.gmra.mrb[134].mxu1 %v7738_v4 }
 0x97b   :  { %3515 = vmatprep.mubr.f32.mxu1 %v7739_v10 }
 0x97e   :  { %3516 = vmatmul.mubr.f32.gmra.mrb[136].mxu1 %v7740_v62 }
 0x97f   :  { %3521 = vmatprep.mubr.f32.mxu1 %v7741_v28 }
 0x982   :  { %3522 = vmatmul.mubr.f32.gmra.mrb[138].mxu1 %v7742_v22 }
 0x983   :  { %3527 = vmatprep.mubr.f32.mxu1 %v7743_v16 }
 0x986   :  { %3528 = vmatmul.mubr.f32.gmra.mrb[140].mxu1 %v7744_v3 }
 0x987   :  { %3533 = vmatprep.mubr.f32.mxu1 %v7745_v59 }
 0x98a   :  { %3534 = vmatmul.mubr.f32.gmra.mrb[142].mxu1 %v7746_v55 }
 0x98b   :  { %3539 = vmatprep.mubr.f32.mxu1 %v7747_v48 }
 0x98e   :  { %3540 = vmatmul.mubr.f32.gmra.mrb[144].mxu1 %v7748_v29 }
 0x98f   :  { %3545 = vmatprep.mubr.f32.mxu1 %v7749_v33 }
 0x992   :  { %3546 = vmatmul.mubr.f32.gmra.mrb[146].mxu1 %v7750_v38 }
 0x993   :  { %3551 = vmatprep.mubr.f32.mxu1 %v7751_v25 }
 0x996   :  { %3552 = vmatmul.mubr.f32.gmra.mrb[148].mxu1 %v7752_v51 }
 0x997   :  { %3557 = vmatprep.mubr.f32.mxu1 %v7753_v35 }
 0x99a   :  { %3558 = vmatmul.mubr.f32.gmra.mrb[150].mxu1 %v7754_v13 }
 0x99b   :  { %3563 = vmatprep.mubr.f32.mxu1 %v7755_v21 }
 0x99e   :  { %3564 = vmatmul.mubr.f32.gmra.mrb[152].mxu1 %v7756_v47 }
 0x99f   :  { %3569 = vmatprep.mubr.f32.mxu1 %v7757_v53 }
 0x9a2   :  { %3570 = vmatmul.mubr.f32.gmra.mrb[154].mxu1 %v7759_v11 }
 0x9a3   :  { %3575 = vmatprep.mubr.f32.mxu1 %v7761_v39 }
 0x9a6   :  { %3576 = vmatmul.mubr.f32.gmra.mrb[156].mxu1 %v7763_v56 }
 0x9a7   :  { %3581 = vmatprep.mubr.f32.mxu1 %v7765_v18 }
 0x9aa   :  { %3582 = vmatmul.mubr.f32.gmra.mrb[158].mxu1 %v7767_v7 }
 0xa41   :  { %v3493_v57 = vpop.f32.mrb[128].mxu1 }
 0xa42   :  { %v3495_v0 = vpop.f32.mrb[129].mxu1  ;;  %v5589_v46 = vadd.f32 %v3493_v57, %v7410_v15 }
 0xa43   :  { %v5590_v44 = vadd.f32 %v3495_v0, %v7413_v58 }
 0xa44   :  { %v3588_v54 = vmax.f32 %v5589_v46, 0.0 }
 0xa45   :  { %v3499_v60 = vpop.f32.mrb[130].mxu1  ;;  %v3589_v42 = vmax.f32 %v5590_v44, 0.0 }
 0xa46   :  { %v5591_v45 = vadd.f32 %v3499_v60, %v7410_v15  ;;  %v3501_v61 = vpop.f32.mrb[131].mxu1 }
 0xa47   :  { %v5592_v19 = vadd.f32 %v3501_v61, %v7413_v58 }
 0xa48   :  { %v3590_v43 = vmax.f32 %v5591_v45, 0.0 }
 0xa49   :  { %v3591_v27 = vmax.f32 %v5592_v19, 0.0  ;;  %v3505_v12 = vpop.f32.mrb[132].mxu1 }
 0xa4a   :  { %v5271_v40 = vpack.c.bf16 %v3590_v43, %v3588_v54  ;;  %v3507_v32 = vpop.f32.mrb[133].mxu1  ;;  %v5593_v14 = vadd.f32 %v3505_v12, %v7410_v15 }
 0xa4b   :  { %v5269_v17 = vpack.c.bf16 %v3591_v27, %v3589_v42  ;;  %v5594_v20 = vadd.f32 %v3507_v32, %v7413_v58 }
 0xa4c   :  { %v3592_v23 = vmax.f32 %v5593_v14, 0.0 }
 0xa4d   :  { %v3511_v26 = vpop.f32.mrb[134].mxu1  ;;  %5270 = vmatprep.subr.bf16.mxu0 %v5269_v17  ;;  %v3593_v30 = vmax.f32 %v5594_v20, 0.0 }
 0xa4e   :  { %v5595_v6 = vadd.f32 %v3511_v26, %v7410_v15  ;;  %v3513_v31 = vpop.f32.mrb[135].mxu1  ;;  %5272 = vmatpush1.bf16.msra.mxu0 %v5271_v40 }
 0xa4f   :  { %v5596_v34 = vadd.f32 %v3513_v31, %v7413_v58 }
 0xa50   :  { %v3594_v36 = vmax.f32 %v5595_v6, 0.0 }
 0xa51   :  { %v3595_v8 = vmax.f32 %v5596_v34, 0.0  ;;  %v3517_v50 = vpop.f32.mrb[136].mxu1 }
 0xa52   :  { %v5275_v63 = vpack.c.bf16 %v3594_v36, %v3592_v23  ;;  %v3519_v9 = vpop.f32.mrb[137].mxu1  ;;  %v5597_v10 = vadd.f32 %v3517_v50, %v7410_v15 }
 0xa53   :  { %v5273_v4 = vpack.c.bf16 %v3595_v8, %v3593_v30  ;;  %v5598_v62 = vadd.f32 %v3519_v9, %v7413_v58 }
 0xa54   :  { %v3596_v59 = vmax.f32 %v5597_v10, 0.0 }
 0xa55   :  { %v3523_v28 = vpop.f32.mrb[138].mxu1  ;;  %5274 = vmatprep.subr.bf16.mxu0 %v5273_v4  ;;  %v3597_v48 = vmax.f32 %v5598_v62, 0.0 }
 0xa56   :  { %v5599_v22 = vadd.f32 %v3523_v28, %v7410_v15  ;;  %v3525_v16 = vpop.f32.mrb[139].mxu1  ;;  %5276 = vmatpush1.bf16.msra.mxu0 %v5275_v63 }
 0xa57   :  { %v5600_v3 = vadd.f32 %v3525_v16, %v7413_v58 }
 0xa58   :  { %v3598_v55 = vmax.f32 %v5599_v22, 0.0 }
 0xa59   :  { %v3599_v29 = vmax.f32 %v5600_v3, 0.0  ;;  %v3529_v33 = vpop.f32.mrb[140].mxu1 }
 0xa5a   :  { %v5279_v38 = vpack.c.bf16 %v3598_v55, %v3596_v59  ;;  %v3531_v25 = vpop.f32.mrb[141].mxu1  ;;  %v5601_v35 = vadd.f32 %v3529_v33, %v7410_v15 }
 0xa5b   :  { %v5277_v51 = vpack.c.bf16 %v3599_v29, %v3597_v48  ;;  %v5602_v13 = vadd.f32 %v3531_v25, %v7413_v58 }
 0xa5c   :  { %v3600_v11 = vmax.f32 %v5601_v35, 0.0 }
 0xa5d   :  { %v3535_v21 = vpop.f32.mrb[142].mxu1  ;;  %5278 = vmatprep.subr.bf16.mxu0 %v5277_v51  ;;  %v3601_v39 = vmax.f32 %v5602_v13, 0.0 }
 0xa5e   :  { %v5603_v47 = vadd.f32 %v3535_v21, %v7410_v15  ;;  %v3537_v53 = vpop.f32.mrb[143].mxu1  ;;  %5280 = vmatpush1.bf16.msra.mxu0 %v5279_v38 }
 0xa5f   :  { %v5604_v52 = vadd.f32 %v3537_v53, %v7413_v58  ;;  %v3693_v53 = vld [vmem:[#allocation14 + $0x608] sm:$0xff] }
 0xa60   :  { %v3602_v41 = vmax.f32 %v5603_v47, 0.0 }
 0xa61   :  { %v3603_v37 = vmax.f32 %v5604_v52, 0.0  ;;  %v3541_v56 = vpop.f32.mrb[144].mxu1  ;;  %v3695_v52 = vld [vmem:[#allocation14 + $0x618] sm:$0xff] }
 0xa62   :  { %v5283_v1 = vpack.c.bf16 %v3602_v41, %v3600_v11  ;;  %v3543_v18 = vpop.f32.mrb[145].mxu1  ;;  %v5605_v7 = vadd.f32 %v3541_v56, %v7410_v15  ;;  %v5301_v56 = vpack.c.bf16 %v3695_v52, %v3693_v53  ;;  %v3728_v53 = vld [vmem:[#allocation14 + $0x720] sm:$0xff]  ;;  %v3730_v52 = vld [vmem:[#allocation14 + $0x730] sm:$0xff] }
 0xa63   :  { %v5281_v5 = vpack.c.bf16 %v3603_v37, %v3601_v39  ;;  %v5606_v24 = vadd.f32 %v3543_v18, %v7413_v58  ;;  %v3694_v18 = vld [vmem:[#allocation14 + $0x610] sm:$0xff] }
 0xa64   :  { %v3604_v60 = vmax.f32 %v5605_v7, 0.0  ;;  %v3699_v7 = vld [vmem:[#allocation14 + $0x638] sm:$0xff] }
 0xa65   :  { %v3547_v57 = vpop.f32.mrb[146].mxu1  ;;  %5282 = vmatprep.subr.bf16.mxu0 %v5281_v5  ;;  %v3605_v61 = vmax.f32 %v5606_v24, 0.0  ;;  %v3697_v5 = vld [vmem:[#allocation14 + $0x628] sm:$0xff] }
 0xa66   :  { %v5607_v0 = vadd.f32 %v3547_v57, %v7410_v15  ;;  %v3549_v46 = vpop.f32.mrb[147].mxu1  ;;  %5284 = vmatpush1.bf16.msra.mxu0 %v5283_v1  ;;  %v3692_v1 = vld [vmem:[#allocation14 + $0x600] sm:$0xff]  ;;  %v5305_v24 = vpack.c.bf16 %v3699_v7, %v3697_v5  ;;  %v3739_v5 = vld [vmem:[#allocation14 + $0x778] sm:$0xff] }
 0xa67   :  { %v5608_v44 = vadd.f32 %v3549_v46, %v7413_v58  ;;  %v3696_v57 = vld [vmem:[#allocation14 + $0x620] sm:$0xff]  ;;  %v3703_v46 = vld [vmem:[#allocation14 + $0x658] sm:$0xff] }
 0xa68   :  { %v3606_v45 = vmax.f32 %v5607_v0, 0.0  ;;  %v3701_v0 = vld [vmem:[#allocation14 + $0x648] sm:$0xff] }
 0xa69   :  { %v3607_v19 = vmax.f32 %v5608_v44, 0.0  ;;  %v3553_v54 = vpop.f32.mrb[148].mxu1  ;;  %v5775_v44 = vld [vmem:[%s7651_s0] sm:$0xff] }
 0xa6a   :  { %v5287_v43 = vpack.c.bf16 %v3606_v45, %v3604_v60  ;;  %v3555_v42 = vpop.f32.mrb[149].mxu1  ;;  %v5609_v12 = vadd.f32 %v3553_v54, %v7410_v15  ;;  %v5309_v45 = vpack.c.bf16 %v3703_v46, %v3701_v0  ;;  %v3705_v54 = vld [vmem:[#allocation14 + $0x668] sm:$0xff]  ;;  %v3743_v0 = vld [vmem:[#allocation14 + $0x798] sm:$0xff] }
 0xa6b   :  { %v5285_v27 = vpack.c.bf16 %v3607_v19, %v3605_v61  ;;  %v5610_v40 = vadd.f32 %v3555_v42, %v7413_v58  ;;  %v3700_v61 = vld [vmem:[#allocation14 + $0x640] sm:$0xff]  ;;  %v3702_v19 = vld [vmem:[#allocation14 + $0x650] sm:$0xff] }
 0xa6c   :  { %v3608_v26 = vmax.f32 %v5609_v12, 0.0  ;;  %v5311_v42 = vpack.c.bf16 %v3702_v19, %v3700_v61  ;;  %v3704_v12 = vld [vmem:[#allocation14 + $0x660] sm:$0xff]  ;;  %v3745_v61 = vld [vmem:[#allocation14 + $0x7a8] sm:$0xff]  ;;  %v3747_v19 = vld [vmem:[#allocation14 + $0x7b8] sm:$0xff] }
 0xa6d   :  { %v3559_v32 = vpop.f32.mrb[150].mxu1  ;;  %5286 = vmatprep.subr.bf16.mxu0 %v5285_v27  ;;  %v3609_v31 = vmax.f32 %v5610_v40, 0.0  ;;  %v3706_v40 = vld [vmem:[#allocation14 + $0x670] sm:$0xff] }
 0xa6e   :  { %v5611_v17 = vadd.f32 %v3559_v32, %v7410_v15  ;;  %v3561_v14 = vpop.f32.mrb[151].mxu1  ;;  %5288 = vmatpush1.bf16.msra.mxu0 %v5287_v43  ;;  %v3707_v43 = vld [vmem:[#allocation14 + $0x678] sm:$0xff]  ;;  %v3709_v32 = vld [vmem:[#allocation14 + $0x688] sm:$0xff] }
 0xa6f   :  { %v5612_v20 = vadd.f32 %v3561_v14, %v7413_v58  ;;  %v5313_v27 = vpack.c.bf16 %v3707_v43, %v3705_v54  ;;  %v5315_v14 = vpack.c.bf16 %v3706_v40, %v3704_v12  ;;  %v5353_v43 = vpack.c.bf16 %v3747_v19, %v3745_v61  ;;  %v3749_v12 = vld [vmem:[#allocation14 + $0x7c8] sm:$0xff]  ;;  %v3751_v40 = vld [vmem:[#allocation14 + $0x7d8] sm:$0xff] }
 0xa70   :  { %v3610_v6 = vmax.f32 %v5611_v17, 0.0  ;;  %v3711_v17 = vld [vmem:[#allocation14 + $0x698] sm:$0xff]  ;;  %v3882_v61 = vld [vmem:[#allocation15 + $0xe8] sm:$0xff] }
 0xa71   :  { %v3611_v34 = vmax.f32 %v5612_v20, 0.0  ;;  %v3565_v23 = vpop.f32.mrb[152].mxu1  ;;  %v5317_v20 = vpack.c.bf16 %v3711_v17, %v3709_v32  ;;  %v5357_v17 = vpack.c.bf16 %v3751_v40, %v3749_v12  ;;  %v3884_v19 = vld [vmem:[#allocation15 + $0xf8] sm:$0xff]  ;;  %v3886_v12 = vld [vmem:[#allocation15 + $0x108] sm:$0xff] }
 0xa72   :  { %v5291_v36 = vpack.c.bf16 %v3610_v6, %v3608_v26  ;;  %v3567_v30 = vpop.f32.mrb[153].mxu1  ;;  %v5613_v50 = vadd.f32 %v3565_v23, %v7410_v15  ;;  %v3708_v26 = vld [vmem:[#allocation14 + $0x680] sm:$0xff]  ;;  %v3710_v6 = vld [vmem:[#allocation14 + $0x690] sm:$0xff]  ;;  %v3888_v40 = vld [vmem:[#allocation15 + $0x118] sm:$0xff] }
 0xa73   :  { %v5289_v8 = vpack.c.bf16 %v3611_v34, %v3609_v31  ;;  %v5614_v63 = vadd.f32 %v3567_v30, %v7413_v58  ;;  %v3713_v31 = vld [vmem:[#allocation14 + $0x6a8] sm:$0xff]  ;;  %v3715_v34 = vld [vmem:[#allocation14 + $0x6b8] sm:$0xff]  ;;  %v5319_v23 = vpack.c.bf16 %v3710_v6, %v3708_v26  ;;  %v3712_v30 = vld [vmem:[#allocation14 + $0x6a0] sm:$0xff] }
 0xa74   :  { %v3612_v28 = vmax.f32 %v5613_v50, 0.0  ;;  %v3717_v50 = vld [vmem:[#allocation14 + $0x6c8] sm:$0xff]  ;;  %v3755_v6 = vld [vmem:[#allocation14 + $0x7f8] sm:$0xff] }
 0xa75   :  { %v3571_v9 = vpop.f32.mrb[154].mxu1  ;;  %5290 = vmatprep.subr.bf16.mxu0 %v5289_v8  ;;  %v3613_v16 = vmax.f32 %v5614_v63, 0.0  ;;  %v3714_v8 = vld [vmem:[#allocation14 + $0x6b0] sm:$0xff]  ;;  %v3719_v63 = vld [vmem:[#allocation14 + $0x6d8] sm:$0xff]  ;;  %v3753_v26 = vld [vmem:[#allocation14 + $0x7e8] sm:$0xff] }
 0xa76   :  { %v5615_v4 = vadd.f32 %v3571_v9, %v7410_v15  ;;  %v3573_v10 = vpop.f32.mrb[155].mxu1  ;;  %5292 = vmatpush1.bf16.msra.mxu0 %v5291_v36  ;;  %v5321_v36 = vpack.c.bf16 %v3715_v34, %v3713_v31  ;;  %v5323_v9 = vpack.c.bf16 %v3714_v8, %v3712_v30  ;;  %v5361_v34 = vpack.c.bf16 %v3755_v6, %v3753_v26  ;;  %v3829_v8 = vld [vmem:[%s7770_s24] sm:$0xff]  ;;  %v3890_v26 = vld [vmem:[#allocation15 + $0x128] sm:$0xff]  ;;  %v3892_v6 = vld [vmem:[#allocation15 + $0x138] sm:$0xff] }
 0xa77   :  { %v5616_v62 = vadd.f32 %v3573_v10, %v7413_v58  ;;  %v3716_v10 = vld [vmem:[#allocation14 + $0x6c0] sm:$0xff] }
 0xa78   :  { %v3614_v22 = vmax.f32 %v5615_v4, 0.0  ;;  %v5325_v4 = vpack.c.bf16 %v3719_v63, %v3717_v50  ;;  %v3854_v50 = vld [vmem:[#allocation15 + $0x8] sm:$0xff]  ;;  %v3856_v63 = vld [vmem:[#allocation15 + $0x18] sm:$0xff] }
 0xa79   :  { %v3615_v3 = vmax.f32 %v5616_v62, 0.0  ;;  %v3577_v59 = vpop.f32.mrb[156].mxu1  ;;  %v3718_v62 = vld [vmem:[#allocation14 + $0x6d0] sm:$0xff] }
 0xa7a   :  { %v5295_v55 = vpack.c.bf16 %v3614_v22, %v3612_v28  ;;  %v3579_v48 = vpop.f32.mrb[157].mxu1  ;;  %v5617_v33 = vadd.f32 %v3577_v59, %v7410_v15  ;;  %v3721_v28 = vld [vmem:[#allocation14 + $0x6e8] sm:$0xff]  ;;  %v3723_v22 = vld [vmem:[#allocation14 + $0x6f8] sm:$0xff]  ;;  %v3720_v59 = vld [vmem:[#allocation14 + $0x6e0] sm:$0xff] }
 0xa7b   :  { %v5293_v29 = vpack.c.bf16 %v3615_v3, %v3613_v16  ;;  %v5618_v38 = vadd.f32 %v3579_v48, %v7413_v58  ;;  %v5327_v16 = vpack.c.bf16 %v3718_v62, %v3716_v10  ;;  %v5329_v3 = vpack.c.bf16 %v3723_v22, %v3721_v28  ;;  %v3725_v48 = vld [vmem:[#allocation14 + $0x708] sm:$0xff]  ;;  %v3853_v10 = vld [vmem:[#allocation15] sm:$0xff]  ;;  %v3855_v62 = vld [vmem:[#allocation15 + $0x10] sm:$0xff] }
 0xa7c   :  { %v3616_v21 = vmax.f32 %v5617_v33, 0.0  ;;  %v3858_v28 = vld [vmem:[#allocation15 + $0x28] sm:$0xff]  ;;  %v5367_v22 = vpack.c.bf16 %v3855_v62, %v3853_v10  ;;  %v3900_v62 = vld [vmem:[#allocation15 + $0x178] sm:$0xff] }
 0xa7d   :  { %v3583_v25 = vpop.f32.mrb[158].mxu1  ;;  %5294 = vmatprep.subr.bf16.mxu0 %v5293_v29  ;;  %v3617_v11 = vmax.f32 %v5618_v38, 0.0  ;;  %v3727_v29 = vld [vmem:[#allocation14 + $0x718] sm:$0xff]  ;;  %v3898_v10 = vld [vmem:[#allocation15 + $0x168] sm:$0xff] }
 0xa7e   :  { %v5619_v51 = vadd.f32 %v3583_v25, %v7410_v15  ;;  %v3585_v35 = vpop.f32.mrb[159].mxu1  ;;  %5296 = vmatpush1.bf16.msra.mxu0 %v5295_v55  ;;  %v5303_v15 = vpack.c.bf16 %v3694_v18, %v3692_v1  ;;  %v3722_v55 = vld [vmem:[#allocation14 + $0x6f0] sm:$0xff]  ;;  %v5333_v38 = vpack.c.bf16 %v3727_v29, %v3725_v48  ;;  %v3724_v25 = vld [vmem:[#allocation14 + $0x700] sm:$0xff]  ;;  %v3737_v18 = vld [vmem:[#allocation14 + $0x768] sm:$0xff] }
 0xa7f   :  { %v5620_v13 = vadd.f32 %v3585_v35, %v7413_v58  ;;  %v3698_v58 = vld [vmem:[#allocation14 + $0x630] sm:$0xff]  ;;  %v5331_v33 = vpack.c.bf16 %v3722_v55, %v3720_v59  ;;  %v3729_v35 = vld [vmem:[#allocation14 + $0x728] sm:$0xff]  ;;  %v3864_v29 = vld [vmem:[#allocation15 + $0x58] sm:$0xff] }
 0xa80   :  { %v3618_v47 = vmax.f32 %v5619_v51, 0.0  ;;  %v5307_v60 = vpack.c.bf16 %v3698_v58, %v3696_v57  ;;  %v3726_v51 = vld [vmem:[#allocation14 + $0x710] sm:$0xff]  ;;  %v3741_v58 = vld [vmem:[#allocation14 + $0x788] sm:$0xff] }
 0xa81   :  { %v3619_v41 = vmax.f32 %v5620_v13, 0.0  ;;  %v3731_v13 = vld [vmem:[#allocation14 + $0x738] sm:$0xff]  ;;  %v3734_v1 = vld [vmem:[#allocation14 + $0x750] sm:$0xff]  ;;  %v3862_v48 = vld [vmem:[#allocation15 + $0x48] sm:$0xff] }
 0xa82   :  { %v5299_v39 = vpack.c.bf16 %v3618_v47, %v3616_v21  ;;  %v5335_v21 = vpack.c.bf16 %v3726_v51, %v3724_v25  ;;  %v5337_v47 = vpack.c.bf16 %v3731_v13, %v3729_v35  ;;  %v3738_v57 = vld [vmem:[#allocation14 + $0x770] sm:$0xff]  ;;  %v3861_v25 = vld [vmem:[#allocation15 + $0x40] sm:$0xff]  ;;  %v3866_v35 = vld [vmem:[#allocation15 + $0x68] sm:$0xff] }
 0xa83   :  { %v5297_v37 = vpack.c.bf16 %v3619_v41, %v3617_v11  ;;  %v3733_v11 = vld [vmem:[#allocation14 + $0x748] sm:$0xff]  ;;  %v3735_v41 = vld [vmem:[#allocation14 + $0x758] sm:$0xff]  ;;  %v3859_v59 = vld [vmem:[#allocation15 + $0x30] sm:$0xff] }
 0xa84   :  { %v3863_v51 = vld [vmem:[#allocation15 + $0x50] sm:$0xff]  ;;  %v3868_v13 = vld [vmem:[#allocation15 + $0x78] sm:$0xff] }
 0xa85   :  { %5298 = vmatprep.subr.bf16.mxu0 %v5297_v37  ;;  %v5341_v37 = vpack.c.bf16 %v3735_v41, %v3733_v11  ;;  %v3870_v11 = vld [vmem:[#allocation15 + $0x88] sm:$0xff]  ;;  %v3872_v41 = vld [vmem:[#allocation15 + $0x98] sm:$0xff] }
 0xa86   :  { %5300 = vmatpush1.bf16.msra.mxu0 %v5299_v39  ;;  %v5339_v39 = vpack.c.bf16 %v3730_v52, %v3728_v53  ;;  %v3865_v53 = vld [vmem:[#allocation15 + $0x60] sm:$0xff]  ;;  %v3867_v52 = vld [vmem:[#allocation15 + $0x70] sm:$0xff] }
 0xa87   :  { %5302 = vmatprep.subr.bf16.mxu0 %v5301_v56  ;;  %v3732_v56 = vld [vmem:[#allocation14 + $0x740] sm:$0xff] }
 0xa88   :  { %v5343_v7 = vpack.c.bf16 %v3734_v1, %v3732_v56  ;;  %v3869_v56 = vld [vmem:[#allocation15 + $0x80] sm:$0xff]  ;;  %v3871_v1 = vld [vmem:[#allocation15 + $0x90] sm:$0xff] }
 0xa89   :  { %3685 = vmatmul.mubr.f32.vlgmr.msra.gmra.mrb[88].mxu0 %v5775_v44  ;;  %v5349_v44 = vpack.c.bf16 %v3743_v0, %v3741_v58  ;;  %v3878_v58 = vld [vmem:[#allocation15 + $0xc8] sm:$0xff]  ;;  %v3880_v0 = vld [vmem:[#allocation15 + $0xd8] sm:$0xff] }
 0xa8a   :  { %5304 = vmatpush1.bf16.msra.mxu0 %v5303_v15  ;;  %v5345_v15 = vpack.c.bf16 %v3739_v5, %v3737_v18  ;;  %v3874_v18 = vld [vmem:[#allocation15 + $0xa8] sm:$0xff]  ;;  %v3876_v5 = vld [vmem:[#allocation15 + $0xb8] sm:$0xff] }
 0xa8b   :  { %5306 = vmatprep.subr.bf16.mxu0 %v5305_v24  ;;  %v3736_v24 = vld [vmem:[#allocation14 + $0x760] sm:$0xff] }
 0xa8c   :  { %v5347_v46 = vpack.c.bf16 %v3738_v57, %v3736_v24  ;;  %v3873_v24 = vld [vmem:[#allocation15 + $0xa0] sm:$0xff]  ;;  %v3875_v57 = vld [vmem:[#allocation15 + $0xb0] sm:$0xff] }
 0xa8e   :  { %5308 = vmatpush1.bf16.msra.mxu0 %v5307_v60  ;;  %v3740_v60 = vld [vmem:[#allocation14 + $0x780] sm:$0xff] }
 0xa8f   :  { %5310 = vmatprep.subr.bf16.mxu0 %v5309_v45  ;;  %v3742_v45 = vld [vmem:[#allocation14 + $0x790] sm:$0xff] }
 0xa90   :  { %v5351_v54 = vpack.c.bf16 %v3742_v45, %v3740_v60  ;;  %v3877_v60 = vld [vmem:[#allocation15 + $0xc0] sm:$0xff]  ;;  %v3879_v45 = vld [vmem:[#allocation15 + $0xd0] sm:$0xff] }
 0xa92   :  { %5312 = vmatpush1.bf16.msra.mxu0 %v5311_v42  ;;  %v3744_v42 = vld [vmem:[#allocation14 + $0x7a0] sm:$0xff] }
 0xa93   :  { %5314 = vmatprep.subr.bf16.mxu0 %v5313_v27  ;;  %v3746_v27 = vld [vmem:[#allocation14 + $0x7b0] sm:$0xff] }
 0xa94   :  { %v5355_v32 = vpack.c.bf16 %v3746_v27, %v3744_v42  ;;  %v3881_v42 = vld [vmem:[#allocation15 + $0xe0] sm:$0xff]  ;;  %v3883_v27 = vld [vmem:[#allocation15 + $0xf0] sm:$0xff] }
 0xa96   :  { %5316 = vmatpush1.bf16.msra.mxu0 %v5315_v14  ;;  %v3748_v14 = vld [vmem:[#allocation14 + $0x7c0] sm:$0xff] }
 0xa97   :  { %5318 = vmatprep.subr.bf16.mxu0 %v5317_v20  ;;  %v3750_v20 = vld [vmem:[#allocation14 + $0x7d0] sm:$0xff] }
 0xa98   :  { %v5359_v31 = vpack.c.bf16 %v3750_v20, %v3748_v14  ;;  %v3885_v14 = vld [vmem:[#allocation15 + $0x100] sm:$0xff]  ;;  %v3887_v20 = vld [vmem:[#allocation15 + $0x110] sm:$0xff] }
 0xa9a   :  { %5320 = vmatpush1.bf16.msra.mxu0 %v5319_v23  ;;  %v3752_v23 = vld [vmem:[#allocation14 + $0x7e0] sm:$0xff] }
 0xa9b   :  { %5322 = vmatprep.subr.bf16.mxu0 %v5321_v36  ;;  %v3754_v36 = vld [vmem:[#allocation14 + $0x7f0] sm:$0xff] }
 0xa9c   :  { %v5363_v30 = vpack.c.bf16 %v3754_v36, %v3752_v23  ;;  %v3889_v23 = vld [vmem:[#allocation15 + $0x120] sm:$0xff]  ;;  %v3891_v36 = vld [vmem:[#allocation15 + $0x130] sm:$0xff] }
 0xa9e   :  { %5324 = vmatpush1.bf16.msra.mxu0 %v5323_v9  ;;  %v6047_v9 = vmov 0  }
 0xa9f   :  { %5326 = vmatprep.subr.bf16.mxu0 %v5325_v4  ;;  %5740 = vset.pattern.permute.xlu0 %v6047_v9  ;;  %v5365_v4 = vpack.c.bf16 %v3856_v63, %v3854_v50  ;;  %v5403_v50 = vpack.c.bf16 %v3891_v36, %v3889_v23  ;;  %v3893_v9 = vld [vmem:[#allocation15 + $0x140] sm:$0xff]  ;;  %v4016_v36 = vld [vmem:[#allocation17 + $0x70] sm:$0xff] }
 0xaa0   :  { %3832 = vperm.xlu0 %5740, %v3829_v8   ;;  %v3896_v8 = vld [vmem:[#allocation15 + $0x158] sm:$0xff]  ;;  %v4014_v23 = vld [vmem:[#allocation17 + $0x60] sm:$0xff] }
 0xaa1   :  { %5366 = vmatprep.subr.bf16.mxu1 %v5365_v4  ;;  %v3895_v4 = vld [vmem:[#allocation15 + $0x150] sm:$0xff] }
 0xaa2   :  { %5328 = vmatpush1.bf16.msra.mxu0 %v5327_v16  ;;  %v3860_v16 = vld [vmem:[#allocation15 + $0x38] sm:$0xff]  ;;  %5368 = vmatpush1.bf16.msra.mxu1 %v5367_v22  ;;  %v5409_v22 = vpack.c.bf16 %v3900_v62, %v3898_v10  ;;  %v4023_v10 = vld [vmem:[#allocation17 + $0xa8] sm:$0xff] }
 0xaa3   :  { %5330 = vmatprep.subr.bf16.mxu0 %v5329_v3  ;;  %v3857_v3 = vld [vmem:[#allocation15 + $0x20] sm:$0xff]  ;;  %v5369_v55 = vpack.c.bf16 %v3860_v16, %v3858_v28  ;;  %v5407_v28 = vpack.c.bf16 %v3895_v4, %v3893_v9  ;;  %v4020_v4 = vld [vmem:[#allocation17 + $0x90] sm:$0xff]  ;;  %v4025_v62 = vld [vmem:[#allocation17 + $0xb8] sm:$0xff] }
 0xaa4   :  { %v3897_v16 = vld [vmem:[#allocation15 + $0x160] sm:$0xff] }
 0xaa5   :  { %5370 = vmatprep.subr.bf16.mxu1 %v5369_v55  ;;  %v3904_v55 = vld [vmem:[#allocation15 + $0x198] sm:$0xff]  ;;  %v4018_v9 = vld [vmem:[#allocation17 + $0x80] sm:$0xff] }
 0xaa6   :  { %5332 = vmatpush1.bf16.msra.mxu0 %v5331_v33  ;;  %v5371_v33 = vpack.c.bf16 %v3859_v59, %v3857_v3  ;;  %v3899_v3 = vld [vmem:[#allocation15 + $0x170] sm:$0xff]  ;;  %v3902_v59 = vld [vmem:[#allocation15 + $0x188] sm:$0xff] }
 0xaa7   :  { %5334 = vmatprep.subr.bf16.mxu0 %v5333_v38  ;;  %v5373_v38 = vpack.c.bf16 %v3864_v29, %v3862_v48  ;;  %v5411_v48 = vpack.c.bf16 %v3899_v3, %v3897_v16  ;;  %v5413_v29 = vpack.c.bf16 %v3904_v55, %v3902_v59  ;;  %v4022_v16 = vld [vmem:[#allocation17 + $0xa0] sm:$0xff]  ;;  %v4024_v3 = vld [vmem:[#allocation17 + $0xb0] sm:$0xff]  ;;  %v4027_v59 = vld [vmem:[#allocation17 + $0xc8] sm:$0xff] }
 0xaa8   :  { %5372 = vmatpush1.bf16.msra.mxu1 %v5371_v33  ;;  %v3901_v33 = vld [vmem:[#allocation15 + $0x180] sm:$0xff]  ;;  %v4029_v55 = vld [vmem:[#allocation17 + $0xd8] sm:$0xff] }
 0xaa9   :  { %5374 = vmatprep.subr.bf16.mxu1 %v5373_v38  ;;  %v3903_v38 = vld [vmem:[#allocation15 + $0x190] sm:$0xff] }
 0xaaa   :  { %5336 = vmatpush1.bf16.msra.mxu0 %v5335_v21  ;;  %v5375_v21 = vpack.c.bf16 %v3863_v51, %v3861_v25  ;;  %v3906_v25 = vld [vmem:[#allocation15 + $0x1a8] sm:$0xff]  ;;  %v3908_v51 = vld [vmem:[#allocation15 + $0x1b8] sm:$0xff] }
 0xaab   :  { %5338 = vmatprep.subr.bf16.mxu0 %v5337_v47  ;;  %v5377_v47 = vpack.c.bf16 %v3868_v13, %v3866_v35  ;;  %v5415_v35 = vpack.c.bf16 %v3903_v38, %v3901_v33  ;;  %v5417_v13 = vpack.c.bf16 %v3908_v51, %v3906_v25  ;;  %v4026_v33 = vld [vmem:[#allocation17 + $0xc0] sm:$0xff]  ;;  %v4028_v38 = vld [vmem:[#allocation17 + $0xd0] sm:$0xff]  ;;  %v4031_v25 = vld [vmem:[#allocation17 + $0xe8] sm:$0xff] }
 0xaac   :  { %5376 = vmatpush1.bf16.msra.mxu1 %v5375_v21  ;;  %v3905_v21 = vld [vmem:[#allocation15 + $0x1a0] sm:$0xff]  ;;  %v4033_v51 = vld [vmem:[#allocation17 + $0xf8] sm:$0xff] }
 0xaad   :  { %5378 = vmatprep.subr.bf16.mxu1 %v5377_v47  ;;  %v3907_v47 = vld [vmem:[#allocation15 + $0x1b0] sm:$0xff] }
 0xaae   :  { %5340 = vmatpush1.bf16.msra.mxu0 %v5339_v39  ;;  %v5379_v39 = vpack.c.bf16 %v3867_v52, %v3865_v53  ;;  %v5419_v53 = vpack.c.bf16 %v3907_v47, %v3905_v21  ;;  %v4030_v21 = vld [vmem:[#allocation17 + $0xe0] sm:$0xff]  ;;  %v4032_v47 = vld [vmem:[#allocation17 + $0xf0] sm:$0xff] }
 0xaaf   :  { %5342 = vmatprep.subr.bf16.mxu0 %v5341_v37  ;;  %v5381_v37 = vpack.c.bf16 %v3872_v41, %v3870_v11  ;;  %v3910_v41 = vld [vmem:[#allocation15 + $0x1c8] sm:$0xff] }
 0xab0   :  { %5380 = vmatpush1.bf16.msra.mxu1 %v5379_v39  ;;  %v3912_v39 = vld [vmem:[#allocation15 + $0x1d8] sm:$0xff] }
 0xab1   :  { %5382 = vmatprep.subr.bf16.mxu1 %v5381_v37  ;;  %v5421_v37 = vpack.c.bf16 %v3912_v39, %v3910_v41  ;;  %v4034_v39 = vld [vmem:[#allocation17 + $0x100] sm:$0xff] }
 0xab2   :  { %5344 = vmatpush1.bf16.msra.mxu0 %v5343_v7  ;;  %v5383_v7 = vpack.c.bf16 %v3871_v1, %v3869_v56  ;;  %v3909_v56 = vld [vmem:[#allocation15 + $0x1c0] sm:$0xff]  ;;  %v3911_v1 = vld [vmem:[#allocation15 + $0x1d0] sm:$0xff] }
 0xab3   :  { %5346 = vmatprep.subr.bf16.mxu0 %v5345_v15  ;;  %v5385_v15 = vpack.c.bf16 %v3876_v5, %v3874_v18  ;;  %v5423_v18 = vpack.c.bf16 %v3911_v1, %v3909_v56  ;;  %v3914_v5 = vld [vmem:[#allocation15 + $0x1e8] sm:$0xff]  ;;  %v4041_v1 = vld [vmem:[#allocation17 + $0x138] sm:$0xff] }
 0xab4   :  { %5384 = vmatpush1.bf16.msra.mxu1 %v5383_v7  ;;  %v3916_v7 = vld [vmem:[#allocation15 + $0x1f8] sm:$0xff]  ;;  %v4039_v56 = vld [vmem:[#allocation17 + $0x128] sm:$0xff] }
 0xab5   :  { %5386 = vmatprep.subr.bf16.mxu1 %v5385_v15  ;;  %v5425_v15 = vpack.c.bf16 %v3916_v7, %v3914_v5  ;;  %v5465_v5 = vpack.c.bf16 %v4041_v1, %v4039_v56  ;;  %v4038_v7 = vld [vmem:[#allocation17 + $0x120] sm:$0xff] }
 0xab6   :  { %5348 = vmatpush1.bf16.msra.mxu0 %v5347_v46  ;;  %v5387_v46 = vpack.c.bf16 %v3875_v57, %v3873_v24  ;;  %v3913_v24 = vld [vmem:[#allocation15 + $0x1e0] sm:$0xff]  ;;  %v3915_v57 = vld [vmem:[#allocation15 + $0x1f0] sm:$0xff] }
 0xab7   :  { %5350 = vmatprep.subr.bf16.mxu0 %v5349_v44  ;;  %v5389_v44 = vpack.c.bf16 %v3880_v0, %v3878_v58  ;;  %v5427_v58 = vpack.c.bf16 %v3915_v57, %v3913_v24  ;;  %v4003_v0 = vld [vmem:[#allocation17 + $0x8] sm:$0xff]  ;;  %v4045_v57 = vld [vmem:[#allocation17 + $0x158] sm:$0xff] }
 0xab8   :  { %5388 = vmatpush1.bf16.msra.mxu1 %v5387_v46  ;;  %v4005_v46 = vld [vmem:[#allocation17 + $0x18] sm:$0xff]  ;;  %v4043_v24 = vld [vmem:[#allocation17 + $0x148] sm:$0xff] }
 0xab9   :  { %5390 = vmatprep.subr.bf16.mxu1 %v5389_v44  ;;  %v4002_v44 = vld [vmem:[#allocation17] sm:$0xff] }
 0xaba   :  { %5352 = vmatpush1.bf16.msra.mxu0 %v5351_v54  ;;  %v5391_v54 = vpack.c.bf16 %v3879_v45, %v3877_v60  ;;  %v5429_v60 = vpack.c.bf16 %v4005_v46, %v4003_v0  ;;  %v4004_v45 = vld [vmem:[#allocation17 + $0x10] sm:$0xff]  ;;  %v5469_v0 = vpack.c.bf16 %v4045_v57, %v4043_v24  ;;  %v4042_v46 = vld [vmem:[#allocation17 + $0x140] sm:$0xff] }
 0xabb   :  { %5354 = vmatprep.subr.bf16.mxu0 %v5353_v43  ;;  %v5393_v43 = vpack.c.bf16 %v3884_v19, %v3882_v61  ;;  %v4007_v61 = vld [vmem:[#allocation17 + $0x28] sm:$0xff]  ;;  %v4009_v19 = vld [vmem:[#allocation17 + $0x38] sm:$0xff] }
 0xabc   :  { %5392 = vmatpush1.bf16.msra.mxu1 %v5391_v54  ;;  %v5431_v54 = vpack.c.bf16 %v4004_v45, %v4002_v44  ;;  %v4044_v44 = vld [vmem:[#allocation17 + $0x150] sm:$0xff]  ;;  %v4049_v45 = vld [vmem:[#allocation17 + $0x178] sm:$0xff] }
 0xabd   :  { %5394 = vmatprep.subr.bf16.mxu1 %v5393_v43  ;;  %v5433_v43 = vpack.c.bf16 %v4009_v19, %v4007_v61  ;;  %v5471_v61 = vpack.c.bf16 %v4044_v44, %v4042_v46  ;;  %v4173_v46 = vld [vmem:[#allocation18 + $0xb0] sm:$0xff]  ;;  %v4174_v44 = vld [vmem:[#allocation18 + $0xb8] sm:$0xff] }
 0xabe   :  { %5356 = vmatpush1.bf16.msra.mxu0 %v5355_v32  ;;  %v5395_v32 = vpack.c.bf16 %v3883_v27, %v3881_v42  ;;  %v4006_v42 = vld [vmem:[#allocation17 + $0x20] sm:$0xff]  ;;  %v4008_v27 = vld [vmem:[#allocation17 + $0x30] sm:$0xff] }
 0xabf   :  { %5358 = vmatprep.subr.bf16.mxu0 %v5357_v17  ;;  %v5397_v17 = vpack.c.bf16 %v3888_v40, %v3886_v12  ;;  %v4011_v12 = vld [vmem:[#allocation17 + $0x48] sm:$0xff]  ;;  %v4013_v40 = vld [vmem:[#allocation17 + $0x58] sm:$0xff] }
 0xac0   :  { %5396 = vmatpush1.bf16.msra.mxu1 %v5395_v32  ;;  %v5435_v32 = vpack.c.bf16 %v4008_v27, %v4006_v42  ;;  %v4051_v42 = vld [vmem:[#allocation17 + $0x188] sm:$0xff]  ;;  %v4053_v27 = vld [vmem:[#allocation17 + $0x198] sm:$0xff] }
 0xac1   :  { %5398 = vmatprep.subr.bf16.mxu1 %v5397_v17  ;;  %v5437_v17 = vpack.c.bf16 %v4013_v40, %v4011_v12  ;;  %v5477_v40 = vpack.c.bf16 %v4053_v27, %v4051_v42 }
 0xac2   :  { %5360 = vmatpush1.bf16.msra.mxu0 %v5359_v31  ;;  %v5399_v31 = vpack.c.bf16 %v3887_v20, %v3885_v14  ;;  %v4010_v14 = vld [vmem:[#allocation17 + $0x40] sm:$0xff]  ;;  %v4012_v20 = vld [vmem:[#allocation17 + $0x50] sm:$0xff] }
 0xac3   :  { %5362 = vmatprep.subr.bf16.mxu0 %v5361_v34  ;;  %v5401_v34 = vpack.c.bf16 %v3892_v6, %v3890_v26  ;;  %v4015_v26 = vld [vmem:[#allocation17 + $0x68] sm:$0xff]  ;;  %v4017_v6 = vld [vmem:[#allocation17 + $0x78] sm:$0xff] }
 0xac4   :  { %5400 = vmatpush1.bf16.msra.mxu1 %v5399_v31  ;;  %v5439_v31 = vpack.c.bf16 %v4012_v20, %v4010_v14  ;;  %v4055_v14 = vld [vmem:[#allocation17 + $0x1a8] sm:$0xff]  ;;  %v4057_v20 = vld [vmem:[#allocation17 + $0x1b8] sm:$0xff] }
 0xac5   :  { %5402 = vmatprep.subr.bf16.mxu1 %v5401_v34  ;;  %v5441_v34 = vpack.c.bf16 %v4017_v6, %v4015_v26  ;;  %v5481_v6 = vpack.c.bf16 %v4057_v20, %v4055_v14 }
 0xac6   :  { %5364 = vmatpush1.bf16.msra.mxu0 %v5363_v30  ;;  %v3894_v30 = vld [vmem:[#allocation15 + $0x148] sm:$0xff] }
 0xac7   :  { %v5405_v63 = vpack.c.bf16 %v3896_v8, %v3894_v30  ;;  %5430 = vmatprep.subr.bf16.mxu0 %v5429_v60  ;;  %v4019_v30 = vld [vmem:[#allocation17 + $0x88] sm:$0xff]  ;;  %v4021_v8 = vld [vmem:[#allocation17 + $0x98] sm:$0xff] }
 0xac8   :  { %5404 = vmatpush1.bf16.msra.mxu1 %v5403_v50  ;;  %v5443_v50 = vpack.c.bf16 %v4016_v36, %v4014_v23  ;;  %v4047_v60 = vld [vmem:[#allocation17 + $0x168] sm:$0xff]  ;;  %v4061_v36 = vld [vmem:[#allocation17 + $0x1d8] sm:$0xff] }
 0xac9   :  { %5406 = vmatprep.subr.bf16.mxu1 %v5405_v63  ;;  %v5445_v63 = vpack.c.bf16 %v4021_v8, %v4019_v30  ;;  %v5473_v19 = vpack.c.bf16 %v4049_v45, %v4047_v60  ;;  %v4059_v23 = vld [vmem:[#allocation17 + $0x1c8] sm:$0xff]  ;;  %v5505_v45 = vpack.c.bf16 %v4174_v44, %v4173_v46 }
 0xaca   :  { %v5485_v8 = vpack.c.bf16 %v4061_v36, %v4059_v23 }
 0xacc   :  { %5408 = vmatpush1.bf16.msra.mxu1 %v5407_v28  ;;  %v5447_v28 = vpack.c.bf16 %v4020_v4, %v4018_v9 }
 0xacd   :  { %5410 = vmatprep.subr.bf16.mxu1 %v5409_v22  ;;  %v5449_v22 = vpack.c.bf16 %v4025_v62, %v4023_v10 }
 0xad0   :  { %5412 = vmatpush1.bf16.msra.mxu1 %v5411_v48  ;;  %v5451_v48 = vpack.c.bf16 %v4024_v3, %v4022_v16 }
 0xad1   :  { %5414 = vmatprep.subr.bf16.mxu1 %v5413_v29  ;;  %v5453_v29 = vpack.c.bf16 %v4029_v55, %v4027_v59 }
 0xad4   :  { %5416 = vmatpush1.bf16.msra.mxu1 %v5415_v35  ;;  %v5455_v35 = vpack.c.bf16 %v4028_v38, %v4026_v33  ;;  %v4063_v38 = vld [vmem:[#allocation17 + $0x1e8] sm:$0xff] }
 0xad5   :  { %5418 = vmatprep.subr.bf16.mxu1 %v5417_v13  ;;  %v5457_v13 = vpack.c.bf16 %v4033_v51, %v4031_v25  ;;  %v4065_v25 = vld [vmem:[#allocation17 + $0x1f8] sm:$0xff] }
 0xad6   :  { %v5489_v51 = vpack.c.bf16 %v4065_v25, %v4063_v38  ;;  %v4066_v25 = vld [vmem:[%s7500_s17] sm:$0x3]  ;;  %s4267_s17 = sshll.u32 %s6048_s2, 4  ;;  %s4268_s17 = int_to_ptr.vmem [resolvable:$true] %s4267_s17 }
 0xad7   :  { %s5996_s18 = scalar_lea.vmem %s4268_s17, 128  ;;  %p6001_p11 = scmp.lt.s32.totalorder %s4268_s17, %s4268_s17 }
 0xad8   :  { %5420 = vmatpush1.bf16.msra.mxu1 %v5419_v53  ;;  %v4035_v53 = vld [vmem:[#allocation17 + $0x108] sm:$0xff]  ;;  %p5997_p10 = scmp.ne.s32.totalorder %s4268_s17, %s5996_s18  ;;  %p6002_p12 = scmp.lt.s32.totalorder %s5996_s18, %s5996_s18 }
 0xad9   :  { %5422 = vmatprep.subr.bf16.mxu1 %v5421_v37  ;;  %v4036_v37 = vld [vmem:[#allocation17 + $0x110] sm:$0xff] }
 0xada   :  { %p6003_p13 = por %p6002_p12, %p6001_p11 }
 0xadc   :  { %5424 = vmatpush1.bf16.msra.mxu1 %v5423_v18  ;;  %v5463_v18 = vpack.c.bf16 %v4036_v37, %v4034_v39  ;;  %v4169_v39 = vld [vmem:[#allocation18 + $0x90] sm:$0xff]  ;;  %v4170_v37 = vld [vmem:[#allocation18 + $0x98] sm:$0xff]  ;;  %p6004_p0 = pnand %p6003_p13, %p5997_p10 }
 0xadd   :  { %5426 = vmatprep.subr.bf16.mxu1 %v5425_v15  ;;  %v4040_v15 = vld [vmem:[#allocation17 + $0x130] sm:$0xff]  ;;  %v5497_v1 = vpack.c.bf16 %v4170_v37, %v4169_v39  ;;  %v4281_v39 = vld [vmem:[%s7771_s16] ss:$0 sm:$0xff] }
 0xae0   :  { %5428 = vmatpush1.bf16.msra.mxu1 %v5427_v58  ;;  %v5467_v58 = vpack.c.bf16 %v4040_v15, %v4038_v7  ;;  %v4171_v7 = vld [vmem:[#allocation18 + $0xa0] sm:$0xff]  ;;  %v4172_v15 = vld [vmem:[#allocation18 + $0xa8] sm:$0xff] }
 0xae1   :  { %v5501_v57 = vpack.c.bf16 %v4172_v15, %v4171_v7 }
 0xb5c   :  { %v3686_v52 = vpop.f32.mrb[88].mxu0 }
 0xb5d   :  { %v3688_v11 = vpop.f32.mrb[89].mxu0 }
 0xb5e   :  { %3820 = vmatprep.mubr.f32.mxu0 %v3688_v11  ;;  %v5459_v11 = vpack.c.bf16 %v4032_v47, %v4030_v21  ;;  %v4167_v47 = vld [vmem:[#allocation18 + $0x80] sm:$0xff] }
 0xb5f   :  { %3821 = vmatmul.mubr.f32.vlgmr.msra.gmra.mrb[52].mxu0 %v3686_v52  ;;  %v4037_v52 = vld [vmem:[#allocation17 + $0x118] sm:$0xff] }
 0xb60   :  { %5432 = vmatpush1.bf16.msra.mxu0 %v5431_v54  ;;  %v5461_v41 = vpack.c.bf16 %v4037_v52, %v4035_v53  ;;  %v4046_v54 = vld [vmem:[#allocation17 + $0x160] sm:$0xff]  ;;  %v4168_v53 = vld [vmem:[#allocation18 + $0x88] sm:$0xff] }
 0xb61   :  { %5434 = vmatprep.subr.bf16.mxu0 %v5433_v43  ;;  %v4048_v43 = vld [vmem:[#allocation17 + $0x170] sm:$0xff]  ;;  %v4151_v52 = vld [vmem:[#allocation18] sm:$0xff] }
 0xb62   :  { %v5475_v12 = vpack.c.bf16 %v4048_v43, %v4046_v54  ;;  %v4175_v54 = vld [vmem:[#allocation18 + $0xc0] sm:$0xff]  ;;  %v4176_v43 = vld [vmem:[#allocation18 + $0xc8] sm:$0xff] }
 0xb63   :  { %v5509_v27 = vpack.c.bf16 %v4176_v43, %v4175_v54 }
 0xb64   :  { %5436 = vmatpush1.bf16.msra.mxu0 %v5435_v32  ;;  %v4050_v32 = vld [vmem:[#allocation17 + $0x180] sm:$0xff] }
 0xb65   :  { %5438 = vmatprep.subr.bf16.mxu0 %v5437_v17  ;;  %v4052_v17 = vld [vmem:[#allocation17 + $0x190] sm:$0xff] }
 0xb66   :  { %v5479_v26 = vpack.c.bf16 %v4052_v17, %v4050_v32  ;;  %v4177_v32 = vld [vmem:[#allocation18 + $0xd0] sm:$0xff]  ;;  %v4178_v17 = vld [vmem:[#allocation18 + $0xd8] sm:$0xff] }
 0xb67   :  { %v5513_v20 = vpack.c.bf16 %v4178_v17, %v4177_v32 }
 0xb68   :  { %5440 = vmatpush1.bf16.msra.mxu0 %v5439_v31  ;;  %v4054_v31 = vld [vmem:[#allocation17 + $0x1a0] sm:$0xff] }
 0xb69   :  { %5442 = vmatprep.subr.bf16.mxu0 %v5441_v34  ;;  %v4056_v34 = vld [vmem:[#allocation17 + $0x1b0] sm:$0xff] }
 0xb6a   :  { %v5483_v30 = vpack.c.bf16 %v4056_v34, %v4054_v31  ;;  %v4179_v31 = vld [vmem:[#allocation18 + $0xe0] sm:$0xff]  ;;  %v4180_v34 = vld [vmem:[#allocation18 + $0xe8] sm:$0xff] }
 0xb6b   :  { %v5517_v36 = vpack.c.bf16 %v4180_v34, %v4179_v31 }
 0xb6c   :  { %5444 = vmatpush1.bf16.msra.mxu0 %v5443_v50  ;;  %v3837_v50 = vld [vmem:[%s7496_s13] sm:$0x3] }
 0xb6d   :  { %5446 = vmatprep.subr.bf16.mxu0 %v5445_v63  ;;  %v3833_v63 = vpop.permute.xlu0 %3832  ;;  %v3842_v9 = vrot.slane %v3837_v50, %v7768_v49  ;;  %v3846_v10 = vrot.slane %v3837_v50, %v7769_v2 }
 0xb70   :  { %5448 = vmatpush1.bf16.msra.mxu0 %v5447_v28 }
 0xb71   :  { %5450 = vmatprep.subr.bf16.mxu0 %v5449_v22 }
 0xb74   :  { %5452 = vmatpush1.bf16.msra.mxu0 %v5451_v48  ;;  %v4058_v48 = vld [vmem:[#allocation17 + $0x1c0] sm:$0xff] }
 0xb75   :  { %5454 = vmatprep.subr.bf16.mxu0 %v5453_v29  ;;  %v4060_v29 = vld [vmem:[#allocation17 + $0x1d0] sm:$0xff] }
 0xb76   :  { %v5487_v33 = vpack.c.bf16 %v4060_v29, %v4058_v48  ;;  %v4165_v29 = vld [vmem:[#allocation18 + $0x70] sm:$0xff] }
 0xb78   :  { %5456 = vmatpush1.bf16.msra.mxu0 %v5455_v35  ;;  %v4062_v35 = vld [vmem:[#allocation17 + $0x1e0] sm:$0xff] }
 0xb79   :  { %5458 = vmatprep.subr.bf16.mxu0 %v5457_v13  ;;  %v4064_v13 = vld [vmem:[#allocation17 + $0x1f0] sm:$0xff] }
 0xb7a   :  { %v5491_v21 = vpack.c.bf16 %v4064_v13, %v4062_v35  ;;  %v4075_v35 = vrot.slane %v4066_v25, %v7769_v2 }
 0xb7c   :  { %5460 = vmatpush1.bf16.msra.mxu0 %v5459_v11  ;;  %v5493_v11 = vpack.c.bf16 %v4168_v53, %v4167_v47 }
 0xb7d   :  { %5462 = vmatprep.subr.bf16.mxu0 %v5461_v41  ;;  %v4152_v41 = vld [vmem:[#allocation18 + $0x8] sm:$0xff] }
 0xb7e   :  { %v5495_v56 = vpack.c.bf16 %v4152_v41, %v4151_v52  ;;  %5494 = vmatprep.subr.bf16.mxu1 %v5493_v11 }
 0xb80   :  { %5464 = vmatpush1.bf16.msra.mxu0 %v5463_v18  ;;  %v4153_v18 = vld [vmem:[#allocation18 + $0x10] sm:$0xff] }
 0xb81   :  { %5466 = vmatprep.subr.bf16.mxu0 %v5465_v5  ;;  %v4154_v5 = vld [vmem:[#allocation18 + $0x18] sm:$0xff] }
 0xb82   :  { %v5499_v24 = vpack.c.bf16 %v4154_v5, %v4153_v18 }
 0xb84   :  { %5468 = vmatpush1.bf16.msra.mxu0 %v5467_v58  ;;  %v4155_v58 = vld [vmem:[#allocation18 + $0x20] sm:$0xff] }
 0xb85   :  { %5470 = vmatprep.subr.bf16.mxu0 %v5469_v0  ;;  %v4156_v0 = vld [vmem:[#allocation18 + $0x28] sm:$0xff] }
 0xb86   :  { %v5503_v60 = vpack.c.bf16 %v4156_v0, %v4155_v58 }
 0xb88   :  { %5472 = vmatpush1.bf16.msra.mxu0 %v5471_v61  ;;  %v4157_v61 = vld [vmem:[#allocation18 + $0x30] sm:$0xff] }
 0xb89   :  { %5474 = vmatprep.subr.bf16.mxu0 %v5473_v19  ;;  %v4158_v19 = vld [vmem:[#allocation18 + $0x38] sm:$0xff] }
 0xb8a   :  { %v5507_v42 = vpack.c.bf16 %v4158_v19, %v4157_v61 }
 0xb8c   :  { %5476 = vmatpush1.bf16.msra.mxu0 %v5475_v12  ;;  %v4159_v12 = vld [vmem:[#allocation18 + $0x40] sm:$0xff] }
 0xb8d   :  { %5478 = vmatprep.subr.bf16.mxu0 %v5477_v40  ;;  %v4160_v40 = vld [vmem:[#allocation18 + $0x48] sm:$0xff] }
 0xb8e   :  { %v5511_v14 = vpack.c.bf16 %v4160_v40, %v4159_v12 }
 0xb90   :  { %5480 = vmatpush1.bf16.msra.mxu0 %v5479_v26  ;;  %v4161_v26 = vld [vmem:[#allocation18 + $0x50] sm:$0xff] }
 0xb91   :  { %5482 = vmatprep.subr.bf16.mxu0 %v5481_v6  ;;  %v4162_v6 = vld [vmem:[#allocation18 + $0x58] sm:$0xff] }
 0xb92   :  { %v5515_v23 = vpack.c.bf16 %v4162_v6, %v4161_v26 }
 0xb94   :  { %5484 = vmatpush1.bf16.msra.mxu0 %v5483_v30  ;;  %v3917_v30 = vld [vmem:[%s7498_s15] sm:$0x3] }
 0xb95   :  { %5486 = vmatprep.subr.bf16.mxu0 %v5485_v8  ;;  %v3922_v8 = vrot.slane %v3917_v30, %v7768_v49  ;;  %v3926_v50 = vrot.slane %v3917_v30, %v7769_v2 }
 0xb98   :  { %5488 = vmatpush1.bf16.msra.mxu0 %v5487_v33  ;;  %v4166_v33 = vld [vmem:[#allocation18 + $0x78] sm:$0xff] }
 0xb99   :  { %5490 = vmatprep.subr.bf16.mxu0 %v5489_v51  ;;  %v5523_v38 = vpack.c.bf16 %v4166_v33, %v4165_v29  ;;  %v4071_v51 = vrot.slane %v4066_v25, %v7768_v49 }
 0xb9c   :  { %5492 = vmatpush1.bf16.msra.mxu0 %v5491_v21 }
 0xc32   :  { %v3822_v4 = vpop.f32.mrb[52].mxu0 }
 0xc33   :  { %v3835_v62 = vmul.f32 %v3833_v63, %v3822_v4  ;;  %v3824_v28 = vpop.f32.mrb[53].mxu0 }
 0xc34   :  { %v3836_v22 = vmul.f32 %v3833_v63, %v3824_v28 }
 0xc35   :  { %v3849_v16 = vadd.f32 %v3842_v9, %v3835_v62 }
 0xc36   :  { %v3850_v3 = vadd.f32 %v3846_v10, %v3836_v22  ;;  %v4163_v22 = vld [vmem:[#allocation18 + $0x60] sm:$0xff] }
 0xc37   :  { %v3851_v55 = vmax.f32 %v3849_v16, 0.0  ;;  %v4164_v16 = vld [vmem:[#allocation18 + $0x68] sm:$0xff] }
 0xc38   :  { %v3852_v59 = vmax.f32 %v3850_v3, 0.0  ;;  %v5519_v3 = vpack.c.bf16 %v4164_v16, %v4163_v22 }
 0xc3a   :  { %3993 = vmatprep.mubr.f32.mxu1 %v3852_v59  ;;  %v4181_v59 = vld [vmem:[#allocation18 + $0xf0] sm:$0xff] }
 0xc3b   :  { %3994 = vmatmul.mubr.f32.vlgmr.msra.gmra.mrb[160].mxu1 %v3851_v55  ;;  %v4182_v55 = vld [vmem:[#allocation18 + $0xf8] sm:$0xff] }
 0xc3c   :  { %5496 = vmatpush3.bf16.msra.mxu1 %v5495_v56  ;;  %v5521_v48 = vpack.c.bf16 %v4182_v55, %v4181_v59 }
 0xc3d   :  { %5498 = vmatprep.subr.bf16.mxu1 %v5497_v1 }
 0xc40   :  { %5500 = vmatpush3.bf16.msra.mxu1 %v5499_v24 }
 0xc41   :  { %5502 = vmatprep.subr.bf16.mxu1 %v5501_v57 }
 0xc44   :  { %5504 = vmatpush3.bf16.msra.mxu1 %v5503_v60 }
 0xc45   :  { %5506 = vmatprep.subr.bf16.mxu1 %v5505_v45 }
 0xc48   :  { %5508 = vmatpush3.bf16.msra.mxu1 %v5507_v42 }
 0xc49   :  { %5510 = vmatprep.subr.bf16.mxu1 %v5509_v27 }
 0xc4c   :  { %5512 = vmatpush3.bf16.msra.mxu1 %v5511_v14 }
 0xc4d   :  { %5514 = vmatprep.subr.bf16.mxu1 %v5513_v20 }
 0xc50   :  { %5516 = vmatpush3.bf16.msra.mxu1 %v5515_v23 }
 0xc51   :  { %5518 = vmatprep.subr.bf16.mxu1 %v5517_v36 }
 0xc54   :  { %5520 = vmatpush3.bf16.msra.mxu1 %v5519_v3 }
 0xc55   :  { %5522 = vmatprep.subr.bf16.mxu1 %v5521_v48 }
 0xc58   :  { %5524 = vmatpush3.bf16.msra.mxu1 %v5523_v38 }
 0xd0e   :  { %v3995_v63 = vpop.f32.mrb[160].mxu1 }
 0xd0f   :  { %v3996_v9 = vadd.f32 %v3995_v63, %v3922_v8  ;;  %v3997_v4 = vpop.f32.mrb[161].mxu1 }
 0xd10   :  { %v3998_v10 = vadd.f32 %v3997_v4, %v3926_v50 }
 0xd11   :  { %v4000_v28 = vmax.f32 %v3996_v9, 0.0 }
 0xd12   :  { %v4001_v62 = vmax.f32 %v3998_v10, 0.0 }
 0xd14   :  { %4142 = vmatprep.mubr.f32.mxu0 %v4001_v62 }
 0xd15   :  { %4143 = vmatmul.mubr.f32.vlgmr.msra.gmra.mrb[90].mxu0 %v4000_v28 }
 0xde8   :  { %v4144_v13 = vpop.f32.mrb[90].mxu0 }
 0xde9   :  { %v4145_v21 = vadd.f32 %v4144_v13, %v4071_v51  ;;  %v4146_v47 = vpop.f32.mrb[91].mxu0 }
 0xdea   :  { %v4147_v53 = vadd.f32 %v4146_v47, %v4075_v35 }
 0xdeb   :  { %v4149_v11 = vmax.f32 %v4145_v21, 0.0 }
 0xdec   :  { %v4150_v52 = vmax.f32 %v4147_v53, 0.0 }
 0xdee   :  { %4254 = vmatprep.mubr.f32.mxu1 %v4150_v52 }
 0xdef   :  { %4255 = vmatmul.mubr.f32.vlgmr.msra.gmra.mrb[162].mxu1 %v4149_v11 }
 0xec2   :  { %v4346_v41 = vpop.f32.mrb[162].mxu1 }
 0xec3   :  { %v4347_v37 = vpop.f32.mrb[163].mxu1 }
 0xec4   :  { %v4348_v56 = vadd.f32 %v4347_v37, %v4346_v41 }
 0xec6   :  { %v4257_v49 = vadd.f32 %v4348_v56, %v4281_v39 }
 0xec8   :  { %4260 = vst [vmem:[#allocation20] sm:$0xff] %v4257_v49 }
 0xec9   :  { %6007 = shalt.err (!%p6004_p0)
}
 0xeca   :  { %s7772_s30 = sld [smem:[#allocation50_spill]] }
 0xed0   :  { %s6008_s0 = scalar_lea.hbm %s7772_s30, 128 }
 0xed1   :  { %p6009_p1 = scmp.ne.s32.totalorder %s7772_s30, %s6008_s0  ;;  %p6012_p2 = scmp.lt.u32.totalorder %s6008_s0, %s7772_s30 }
 0xed3   :  { %p6014_p3 = pnand %p6012_p2, %p6009_p1 }
 0xed5   :  { %6017 = shalt.err (!%p6014_p3)
}
 0xed6   :  { %4270 = dma.vmem_to_hbm [thread:$0]  %s4268_s17, 128, %s7772_s30, [#allocation5]  }
 0xed7   :  { %6030 = dma.done.wait [#allocation5], 128  }
 0xed8   :  { %6031 = vsyncadd [#allocation5], 4294967168 }
 0xed9   :  { %4274 = vsyncpa [#allocation4], 1 }
 0xeda   :  { %4275 = vsyncpa [#allocation7], 1 }
 0xedb   :  { %4276 = vsyncpa [#allocation10], 1 }
 0xedc   :  { %4277 = vsyncpa [#allocation13], 1 }
 0xedd   :  { %4278 = vsyncpa [#allocation16], 1 }
 0xede   :  { %4279 = vsyncpa [#allocation19], 1 }
 0xedf   :  { %4280 = vsyncpa [#allocation5], 1 }

</bundles_post_ra>
